<compile_context>
chip_gen: v7x
topology: tpu7x:2x2x1
jax: 0.10.0
libtpu: 0.0.40
codegen_flags: <defaults>
</compile_context>

<pallas_src>
import functools

import jax
import jax.numpy as jnp
from jax.experimental import pallas as pl
from jax.experimental.pallas import tpu as pltpu

JOINT_DIM = 8

_VMEM = pl.BlockSpec(memory_space=pltpu.MemorySpace.VMEM)


# ----------------------------------------------------------------------------
# Fused kernel factory.
#
# Ref layout (all full-array VMEM windows):
#   x_ref   : (N, D_in)        time-major flattened input, row index = t*B + b
#   gru_ref : (rows, 3H)       per layer: wih_rzn (d_in,3H) | whh_rzn (H,3H) |
#                              bias rows (2,3H): row0 = [bih_r+bhh_r | bih_z+bhh_z | bih_n]
#                                                row1 = [bhh_n | 0 | 0]
#   w1_ref  : (rows, 576+160)  W1 = [m_w1|v_w1|j_w1] (H,736); aux rows:
#                              b1 (736), j_g1 (160), j_be1 (160)
#   w2_ref  : (rows, 80)       mv_w2 block-diag (576,2z) | j_w2 (160,80) |
#                              j_w34 = j_w3@j_w4 (80,jd) | aux rows:
#                              mv_b2, j_b2, j_g2, j_be2, j_b34
#   out_ref : (N, 2z + jd)     packed [mean | log_var | joint]
#   a_scr   : (T, B, 3H)       VMEM scratch for hoisted input-to-hidden gates
# ----------------------------------------------------------------------------
def _make_fused_kernel(meta, T, B):
    H = meta["H"]
    z2 = 2 * meta["z_dim"]
    jd = meta["joint_dim"]
    mv1, j1, j2 = meta["mv1"], meta["j1"], meta["j2"]
    layer_dims = meta["layer_dims"]
    gm, w1m, w2m = meta["gru_meta"], meta["w1_meta"], meta["w2_meta"]

    def grab(ref, m):
        off, r, c = m           # static, 8-row-aligned offsets -> free views
        return ref[off:off + r, :c]

    def kernel(x_ref, gru_ref, w1_ref, w2_ref, out_ref, a_scr):
        dot = lambda a, b: jnp.dot(a, b, preferred_element_type=jnp.float32)
        relu = lambda v: jnp.maximum(v, 0.0)

        X = x_ref[...]                                    # (N, D_in) time-major
        for l in range(len(layer_dims)):
            wih = grab(gru_ref, gm[f"wih{l}"])            # (d_in, 3H)
            whh = grab(gru_ref, gm[f"whh{l}"])            # (H, 3H)
            brows = grab(gru_ref, gm[f"b{l}"])            # (2, 3H)
            b_rzn = brows[0:1, :]                         # folded (1, 3H)
            bhn = jnp.broadcast_to(brows[1:2, :H], (B, H))  # hoisted broadcast

            # Hoisted input-to-hidden: ONE (N,d)x(d,3H) matmul per layer, then
            # stage per-step slices into tile-aligned VMEM scratch.
            a_all = dot(X, wih) + b_rzn                   # (N, 3H)
            for t in range(T):                            # off the serial chain
                a_scr[t] = a_all[t * B:(t + 1) * B, :]

            h = jnp.zeros((B, H), jnp.float32)
            outs = []
            for t in range(T):                            # serial recurrence (unrolled)
                a_t = a_scr[t]                            # (B, 3H) aligned load
                g = dot(h, whh)                           # ONE fused MXU push / step
                rz = jax.nn.sigmoid(a_t[:, :2 * H] + g[:, :2 * H])
                r = rz[:, :H]
                z = rz[:, H:]
                n = jnp.tanh(a_t[:, 2 * H:] + r * (g[:, 2 * H:] + bhn))
                h = (1.0 - z) * n + z * h
                outs.append(h)
            X = jnp.concatenate(outs, axis=0)             # (N, H) hoisted hand-off

        # ---- heads ------------------------------------------------------------
        w1 = grab(w1_ref, w1m["w1"])                      # (H, 576+160)
        aux1 = grab(w1_ref, w1m["aux1"])                  # (3, 576+160)
        y = dot(X, w1) + aux1[0:1, :]                     # fused first layers

        def bn(v, g, b):  # training-mode BatchNorm1d: batch stats, biased var
            mu = jnp.mean(v, axis=0, keepdims=True)
            var = jnp.mean((v - mu) * (v - mu), axis=0, keepdims=True)
            return (v - mu) * jax.lax.rsqrt(var + 1e-5) * g + b

        hcat = relu(y[:, :mv1])                                       # mean|log_var hidden
        hj = relu(bn(y[:, mv1:], aux1[1:2, :j1], aux1[2:3, :j1]))     # joint hidden 1

        mv_w2 = grab(w2_ref, w2m["mv_w2"])
        j_w2 = grab(w2_ref, w2m["j_w2"])
        j_w34 = grab(w2_ref, w2m["j_w34"])
        aux2 = grab(w2_ref, w2m["aux2"])                  # (5, w2_width)

        mlv = dot(hcat, mv_w2) + aux2[0:1, :z2]                          # (N, 2z)
        hj2 = relu(bn(dot(hj, j_w2) + aux2[1:2, :j2],
                      aux2[2:3, :j2], aux2[3:4, :j2]))                   # (N, 80)
        joint = dot(hj2, j_w34) + aux2[4:5, :jd]                         # (N, jd)

        # lane-range stores into the single packed output
        out_ref[:, :z2] = mlv
        out_ref[:, z2:] = joint

    return kernel


# ----------------------------------------------------------------------------
# Parameter init (deterministic, PyTorch-style uniform(-1/sqrt(fan), 1/sqrt(fan)))
# ----------------------------------------------------------------------------
def init_params(key, input_size, hidden_size, num_layers, z_dim, joint_dim):
    n_keys = 4 * num_layers + 16
    keys = iter(jax.random.split(key, n_keys))

    def u(shape, fan):
        bound = 1.0 / float(fan) ** 0.5
        return jax.random.uniform(next(keys), shape, jnp.float32, -bound, bound)

    gru = []
    for l in range(num_layers):
        d_in = input_size if l == 0 else hidden_size
        gru.append(dict(
            wih=u((d_in, 3 * hidden_size), hidden_size),
            whh=u((hidden_size, 3 * hidden_size), hidden_size),
            bih=u((1, 3 * hidden_size), hidden_size),
            bhh=u((1, 3 * hidden_size), hidden_size),
        ))

    def linear(d_in, d_out):
        return u((d_in, d_out), d_in), u((1, d_out), d_in)

    p = {"gru": gru}
    p["m_w1"], p["m_b1"] = linear(hidden_size, 288)
    p["m_w2"], p["m_b2"] = linear(288, z_dim)
    p["v_w1"], p["v_b1"] = linear(hidden_size, 288)
    p["v_w2"], p["v_b2"] = linear(288, z_dim)
    p["j_w1"], p["j_b1"] = linear(hidden_size, 160)
    p["j_g1"], p["j_be1"] = jnp.ones((1, 160), jnp.float32), jnp.zeros((1, 160), jnp.float32)
    p["j_w2"], p["j_b2"] = linear(160, 80)
    p["j_g2"], p["j_be2"] = jnp.ones((1, 80), jnp.float32), jnp.zeros((1, 80), jnp.float32)
    p["j_w3"], p["j_b3"] = linear(80, 30)
    p["j_w4"], p["j_b4"] = linear(30, joint_dim)
    return p


# ----------------------------------------------------------------------------
# ONE-TIME preprocessing: repack raw (PyTorch-layout) params into kernel slabs.
# Runs eagerly once; the jitted forward never re-does this work.
# ----------------------------------------------------------------------------
def pack_params(params, *, input_size, hidden_size, z_dim, joint_dim):
    H = hidden_size

    def pack_slab(named, width):
        parts, meta, off = [], {}, 0
        for name, m in named:
            m = jnp.asarray(m, jnp.float32)
            r, c = m.shape
            rp = -(-r // 8) * 8                 # 8-row align each section
            buf = jnp.zeros((rp, width), jnp.float32).at[:r, :c].set(m)
            parts.append(buf)
            meta[name] = (off, r, c)
            off += rp
        return jnp.concatenate(parts, axis=0), meta

    # --- GRU slab (lane width 3H) ---
    gru_named, layer_dims = [], []
    for l, layer in enumerate(params["gru"]):
        d_in = input_size if l == 0 else H
        layer_dims.append(d_in)
        wih, whh, bih, bhh = layer["wih"], layer["whh"], layer["bih"], layer["bhh"]
        b_rzn = jnp.concatenate([bih[:, :H] + bhh[:, :H],
                                 bih[:, H:2 * H] + bhh[:, H:2 * H],
                                 bih[:, 2 * H:]], axis=1)                 # (1, 3H)
        bias2 = jnp.concatenate(
            [b_rzn, jnp.pad(bhh[:, 2 * H:], ((0, 0), (0, 2 * H)))], axis=0)  # (2, 3H)
        gru_named += [(f"wih{l}", wih), (f"whh{l}", whh), (f"b{l}", bias2)]
    gru_slab, gru_meta = pack_slab(gru_named, 3 * H)

    # --- Head first-layer slab (mean | log_var | joint fused) ---
    mv1 = params["m_w1"].shape[1] + params["v_w1"].shape[1]   # 576
    j1 = params["j_w1"].shape[1]                              # 160
    w1 = jnp.concatenate([params["m_w1"], params["v_w1"], params["j_w1"]], axis=1)
    b1 = jnp.concatenate([params["m_b1"], params["v_b1"], params["j_b1"]], axis=1)
    aux1 = jnp.zeros((3, mv1 + j1), jnp.float32)
    aux1 = aux1.at[0:1, :].set(b1)
    aux1 = aux1.at[1:2, :j1].set(params["j_g1"])
    aux1 = aux1.at[2:3, :j1].set(params["j_be1"])
    w1_slab, w1_meta = pack_slab([("w1", w1), ("aux1", aux1)], mv1 + j1)

    # --- Head second-stage slab ---
    m2 = params["m_w2"].shape[0]                              # 288
    zd = params["m_w2"].shape[1]
    z2 = 2 * zd
    j2 = params["j_w2"].shape[1]                              # 80
    jd = params["j_w4"].shape[1]
    zblk = jnp.zeros((m2, zd), jnp.float32)
    mv_w2 = jnp.concatenate(
        [jnp.concatenate([params["m_w2"], zblk], axis=1),
         jnp.concatenate([zblk, params["v_w2"]], axis=1)], axis=0)        # (576, 2z)
    mv_b2 = jnp.concatenate([params["m_b2"], params["v_b2"]], axis=1)     # (1, 2z)
    j_w34 = params["j_w3"] @ params["j_w4"]                               # (80, jd) fold
    j_b34 = params["j_b3"] @ params["j_w4"] + params["j_b4"]              # (1, jd)
    w2_width = max(j2, z2, jd)
    aux2 = jnp.zeros((5, w2_width), jnp.float32)
    aux2 = aux2.at[0:1, :z2].set(mv_b2)
    aux2 = aux2.at[1:2, :j2].set(params["j_b2"])
    aux2 = aux2.at[2:3, :j2].set(params["j_g2"])
    aux2 = aux2.at[3:4, :j2].set(params["j_be2"])
    aux2 = aux2.at[4:5, :jd].set(j_b34)
    w2_slab, w2_meta = pack_slab(
        [("mv_w2", mv_w2), ("j_w2", params["j_w2"]), ("j_w34", j_w34), ("aux2", aux2)],
        w2_width)

    arrays = dict(gru=gru_slab, w1=w1_slab, w2=w2_slab)
    meta = dict(H=H, layer_dims=tuple(layer_dims), z_dim=zd, joint_dim=jd,
                mv1=mv1, j1=j1, j2=j2,
                gru_meta=gru_meta, w1_meta=w1_meta, w2_meta=w2_meta)
    return arrays, meta


# ----------------------------------------------------------------------------
# Forward (matches GRU_.forward with h0 = None, i.e. zeros).  `meta` is static
# (Python ints / offsets) and closed over; `arrays` are the packed weight slabs.
# ----------------------------------------------------------------------------
def build_forward(meta):
    z_dim = meta["z_dim"]
    jd = meta["joint_dim"]
    H = meta["H"]

    def forward(arrays, z_i_t, z_i_g, j_pre):
        B = j_pre.shape[0]
        z_i_t = z_i_t.reshape(B, -1, z_dim)
        z_i_g = z_i_g.reshape(B, -1, z_dim)
        j_pre = j_pre.reshape(B, -1, jd)
        x = jnp.concatenate([z_i_t, z_i_g, j_pre], axis=2)       # (B, T, D_in)
        T, D = x.shape[1], x.shape[2]
        N = T * B
        # time-major flatten: row t*B + b  ->  (b, t)
        x_tm = jnp.transpose(x, (1, 0, 2)).reshape(N, D)

        out_dim = 2 * z_dim + jd
        kernel = _make_fused_kernel(meta, T, B)

        # advisory cost estimate (tiny kernel; keeps XLA from over-serializing)
        flops = 0
        for d_in in meta["layer_dims"]:
            flops += 2 * N * d_in * 3 * H + 2 * T * B * H * 3 * H
        flops += 2 * N * H * (meta["mv1"] + meta["j1"])
        flops += 2 * N * meta["mv1"] * 2 * z_dim
        flops += 2 * N * meta["j1"] * meta["j2"]
        flops += 2 * N * meta["j2"] * jd
        trans = len(meta["layer_dims"]) * T * B * 3 * H
        nbytes = 4 * (x_tm.size + arrays["gru"].size + arrays["w1"].size
                      + arrays["w2"].size + N * out_dim)

        packed = pl.pallas_call(
            kernel,
            out_shape=jax.ShapeDtypeStruct((N, out_dim), jnp.float32),
            in_specs=[_VMEM] * 4,
            out_specs=_VMEM,
            scratch_shapes=[pltpu.VMEM((T, B, 3 * H), jnp.float32)],
            cost_estimate=pl.CostEstimate(
                flops=flops, transcendentals=trans, bytes_accessed=nbytes),
        )(x_tm, arrays["gru"], arrays["w1"], arrays["w2"])

        # unpack + restore (B, T, ...) layout
        packed = packed.reshape(T, B, out_dim).transpose(1, 0, 2)   # (B, T, out)
        mean = packed[..., :z_dim]
        log_var = packed[..., z_dim:2 * z_dim]
        joint = packed[..., 2 * z_dim:]
        return mean, log_var, joint

    return forward


if __name__ == "__main__":
    B, T = 2, 8
    z_dim = 12
    joint_dim = JOINT_DIM
    hidden_size = 32
    num_layers = 2
    input_size = 2 * z_dim + joint_dim  # 32 — concat([z_i_t, z_i_g, j_pre], dim=2)

    key = jax.random.PRNGKey(0)
    k1, k2, k3, kp = jax.random.split(key, 4)
    z_i_t = jax.random.normal(k1, (B, T, z_dim), jnp.float32)
    z_i_g = jax.random.normal(k2, (B, T, z_dim), jnp.float32)
    j_pre = jax.random.normal(k3, (B, T, joint_dim), jnp.float32)

    params = init_params(kp, input_size, hidden_size, num_layers, z_dim, joint_dim)
    # one-time repack into kernel-layout slabs (outside the jitted forward)
    arrays, meta = pack_params(params, input_size=input_size,
                               hidden_size=hidden_size,
                               z_dim=z_dim, joint_dim=joint_dim)

    fwd = jax.jit(build_forward(meta))
    mean, log_var, j_next_out = fwd(arrays, z_i_t, z_i_g, j_pre)
    jax.block_until_ready((mean, log_var, j_next_out))

    assert mean.shape == (B, T, z_dim)
    assert log_var.shape == (B, T, z_dim)
    assert j_next_out.shape == (B, T, joint_dim)
    assert bool(jnp.all(jnp.isfinite(mean)) & jnp.all(jnp.isfinite(log_var))
                & jnp.all(jnp.isfinite(j_next_out)))
    print("KERNEL_OK")
</pallas_src>

<mosaic_0001>
module attributes {stable_mosaic.version = 11 : i64} {
  func.func @kernel(%arg0: memref<16x32xf32, #tpu.memory_space<vmem>>, %arg1: memref<144x96xf32, #tpu.memory_space<vmem>>, %arg2: memref<40x736xf32, #tpu.memory_space<vmem>>, %arg3: memref<824x80xf32, #tpu.memory_space<vmem>>, %arg4: memref<16x32xf32, #tpu.memory_space<vmem>>, %arg5: memref<8x2x96xf32, #tpu.memory_space<vmem>>) attributes {dimension_semantics = [], scalar_prefetch = 0 : i64, scratch_operands = 1 : i64, tpu.core_type = #tpu.core_type<tc>} {
    %c0 = arith.constant 0 : index
    %c0_0 = arith.constant 0 : index
    %0 = vector.load %arg0[%c0, %c0_0] : memref<16x32xf32, #tpu.memory_space<vmem>>, vector<16x32xf32>
    %c0_1 = arith.constant 0 : index
    %c0_2 = arith.constant 0 : index
    %1 = vector.load %arg1[%c0_1, %c0_2] : memref<144x96xf32, #tpu.memory_space<vmem>>, vector<32x96xf32>
    %c32 = arith.constant 32 : index
    %c0_3 = arith.constant 0 : index
    %2 = vector.load %arg1[%c32, %c0_3] : memref<144x96xf32, #tpu.memory_space<vmem>>, vector<32x96xf32>
    %c64 = arith.constant 64 : index
    %c0_4 = arith.constant 0 : index
    %3 = vector.load %arg1[%c64, %c0_4] : memref<144x96xf32, #tpu.memory_space<vmem>>, vector<2x96xf32>
    %4 = vector.extract_strided_slice %3 {offsets = [0, 0], sizes = [1, 96], strides = [1, 1]} : vector<2x96xf32> to vector<1x96xf32>
    %5 = vector.extract_strided_slice %3 {offsets = [1, 0], sizes = [1, 32], strides = [1, 1]} : vector<2x96xf32> to vector<1x32xf32>
    %6 = vector.shape_cast %5 : vector<1x32xf32> to vector<1x32xf32>
    %7 = vector.broadcast %6 : vector<1x32xf32> to vector<2x32xf32>
    %cst = arith.constant dense<0.000000e+00> : vector<16x96xf32>
    %8 = tpu.matmul %0, %1, %cst {dimension_numbers = #tpu.dot_dimension_numbers<[1], [0], [0], [1], [0, 0, 1, 1], [], []>} : vector<16x32xf32>, vector<32x96xf32>, vector<16x96xf32> -> vector<16x96xf32>
    %9 = vector.broadcast %4 : vector<1x96xf32> to vector<16x96xf32>
    %10 = arith.addf %8, %9 : vector<16x96xf32>
    %11 = vector.extract_strided_slice %10 {offsets = [0, 0], sizes = [2, 96], strides = [1, 1]} : vector<16x96xf32> to vector<2x96xf32>
    %c0_5 = arith.constant 0 : index
    %c0_6 = arith.constant 0 : index
    %c0_7 = arith.constant 0 : index
    %12 = vector.load %arg5[%c0_5, %c0_6, %c0_7] : memref<8x2x96xf32, #tpu.memory_space<vmem>>, vector<1x2x96xf32>
    %13 = vector.shape_cast %12 : vector<1x2x96xf32> to vector<2x96xf32>
    %14 = vector.shape_cast %11 : vector<2x96xf32> to vector<1x2x96xf32>
    tpu.vector_store %arg5[%c0_5, %c0_6, %c0_7], %14 {strides = array<i32>} : memref<8x2x96xf32, #tpu.memory_space<vmem>>, vector<1x2x96xf32>,
    %15 = vector.extract_strided_slice %10 {offsets = [2, 0], sizes = [2, 96], strides = [1, 1]} : vector<16x96xf32> to vector<2x96xf32>
    %c1 = arith.constant 1 : index
    %c0_8 = arith.constant 0 : index
    %c0_9 = arith.constant 0 : index
    %16 = vector.load %arg5[%c1, %c0_8, %c0_9] : memref<8x2x96xf32, #tpu.memory_space<vmem>>, vector<1x2x96xf32>
    %17 = vector.shape_cast %16 : vector<1x2x96xf32> to vector<2x96xf32>
    %18 = vector.shape_cast %15 : vector<2x96xf32> to vector<1x2x96xf32>
    tpu.vector_store %arg5[%c1, %c0_8, %c0_9], %18 {strides = array<i32>} : memref<8x2x96xf32, #tpu.memory_space<vmem>>, vector<1x2x96xf32>,
    %19 = vector.extract_strided_slice %10 {offsets = [4, 0], sizes = [2, 96], strides = [1, 1]} : vector<16x96xf32> to vector<2x96xf32>
    %c2 = arith.constant 2 : index
    %c0_10 = arith.constant 0 : index
    %c0_11 = arith.constant 0 : index
    %20 = vector.load %arg5[%c2, %c0_10, %c0_11] : memref<8x2x96xf32, #tpu.memory_space<vmem>>, vector<1x2x96xf32>
    %21 = vector.shape_cast %20 : vector<1x2x96xf32> to vector<2x96xf32>
    %22 = vector.shape_cast %19 : vector<2x96xf32> to vector<1x2x96xf32>
    tpu.vector_store %arg5[%c2, %c0_10, %c0_11], %22 {strides = array<i32>} : memref<8x2x96xf32, #tpu.memory_space<vmem>>, vector<1x2x96xf32>,
    %23 = vector.extract_strided_slice %10 {offsets = [6, 0], sizes = [2, 96], strides = [1, 1]} : vector<16x96xf32> to vector<2x96xf32>
    %c3 = arith.constant 3 : index
    %c0_12 = arith.constant 0 : index
    %c0_13 = arith.constant 0 : index
    %24 = vector.load %arg5[%c3, %c0_12, %c0_13] : memref<8x2x96xf32, #tpu.memory_space<vmem>>, vector<1x2x96xf32>
    %25 = vector.shape_cast %24 : vector<1x2x96xf32> to vector<2x96xf32>
    %26 = vector.shape_cast %23 : vector<2x96xf32> to vector<1x2x96xf32>
    tpu.vector_store %arg5[%c3, %c0_12, %c0_13], %26 {strides = array<i32>} : memref<8x2x96xf32, #tpu.memory_space<vmem>>, vector<1x2x96xf32>,
    %27 = vector.extract_strided_slice %10 {offsets = [8, 0], sizes = [2, 96], strides = [1, 1]} : vector<16x96xf32> to vector<2x96xf32>
    %c4 = arith.constant 4 : index
    %c0_14 = arith.constant 0 : index
    %c0_15 = arith.constant 0 : index
    %28 = vector.load %arg5[%c4, %c0_14, %c0_15] : memref<8x2x96xf32, #tpu.memory_space<vmem>>, vector<1x2x96xf32>
    %29 = vector.shape_cast %28 : vector<1x2x96xf32> to vector<2x96xf32>
    %30 = vector.shape_cast %27 : vector<2x96xf32> to vector<1x2x96xf32>
    tpu.vector_store %arg5[%c4, %c0_14, %c0_15], %30 {strides = array<i32>} : memref<8x2x96xf32, #tpu.memory_space<vmem>>, vector<1x2x96xf32>,
    %31 = vector.extract_strided_slice %10 {offsets = [10, 0], sizes = [2, 96], strides = [1, 1]} : vector<16x96xf32> to vector<2x96xf32>
    %c5 = arith.constant 5 : index
    %c0_16 = arith.constant 0 : index
    %c0_17 = arith.constant 0 : index
    %32 = vector.load %arg5[%c5, %c0_16, %c0_17] : memref<8x2x96xf32, #tpu.memory_space<vmem>>, vector<1x2x96xf32>
    %33 = vector.shape_cast %32 : vector<1x2x96xf32> to vector<2x96xf32>
    %34 = vector.shape_cast %31 : vector<2x96xf32> to vector<1x2x96xf32>
    tpu.vector_store %arg5[%c5, %c0_16, %c0_17], %34 {strides = array<i32>} : memref<8x2x96xf32, #tpu.memory_space<vmem>>, vector<1x2x96xf32>,
    %35 = vector.extract_strided_slice %10 {offsets = [12, 0], sizes = [2, 96], strides = [1, 1]} : vector<16x96xf32> to vector<2x96xf32>
    %c6 = arith.constant 6 : index
    %c0_18 = arith.constant 0 : index
    %c0_19 = arith.constant 0 : index
    %36 = vector.load %arg5[%c6, %c0_18, %c0_19] : memref<8x2x96xf32, #tpu.memory_space<vmem>>, vector<1x2x96xf32>
    %37 = vector.shape_cast %36 : vector<1x2x96xf32> to vector<2x96xf32>
    %38 = vector.shape_cast %35 : vector<2x96xf32> to vector<1x2x96xf32>
    tpu.vector_store %arg5[%c6, %c0_18, %c0_19], %38 {strides = array<i32>} : memref<8x2x96xf32, #tpu.memory_space<vmem>>, vector<1x2x96xf32>,
    %39 = vector.extract_strided_slice %10 {offsets = [14, 0], sizes = [2, 96], strides = [1, 1]} : vector<16x96xf32> to vector<2x96xf32>
    %c7 = arith.constant 7 : index
    %c0_20 = arith.constant 0 : index
    %c0_21 = arith.constant 0 : index
    %40 = vector.load %arg5[%c7, %c0_20, %c0_21] : memref<8x2x96xf32, #tpu.memory_space<vmem>>, vector<1x2x96xf32>
    %41 = vector.shape_cast %40 : vector<1x2x96xf32> to vector<2x96xf32>
    %42 = vector.shape_cast %39 : vector<2x96xf32> to vector<1x2x96xf32>
    tpu.vector_store %arg5[%c7, %c0_20, %c0_21], %42 {strides = array<i32>} : memref<8x2x96xf32, #tpu.memory_space<vmem>>, vector<1x2x96xf32>,
    %cst_22 = arith.constant 0.000000e+00 : f32
    %43 = vector.broadcast %cst_22 : f32 to vector<2x32xf32>
    %c0_23 = arith.constant 0 : index
    %c0_24 = arith.constant 0 : index
    %c0_25 = arith.constant 0 : index
    %44 = vector.load %arg5[%c0_23, %c0_24, %c0_25] : memref<8x2x96xf32, #tpu.memory_space<vmem>>, vector<1x2x96xf32>
    %45 = vector.shape_cast %44 : vector<1x2x96xf32> to vector<2x96xf32>
    %cst_26 = arith.constant dense<0.000000e+00> : vector<2x96xf32>
    %46 = tpu.matmul %43, %2, %cst_26 {dimension_numbers = #tpu.dot_dimension_numbers<[1], [0], [0], [1], [0, 0, 1, 1], [], []>} : vector<2x32xf32>, vector<32x96xf32>, vector<2x96xf32> -> vector<2x96xf32>
    %47 = vector.extract_strided_slice %45 {offsets = [0, 0], sizes = [2, 64], strides = [1, 1]} : vector<2x96xf32> to vector<2x64xf32>
    %48 = vector.extract_strided_slice %46 {offsets = [0, 0], sizes = [2, 64], strides = [1, 1]} : vector<2x96xf32> to vector<2x64xf32>
    %49 = arith.addf %47, %48 : vector<2x64xf32>
    %50 = arith.negf %49 : vector<2x64xf32>
    %51 = math.exp %50 : vector<2x64xf32>
    %cst_27 = arith.constant 1.000000e+00 : f32
    %52 = vector.broadcast %cst_27 : f32 to vector<2x64xf32>
    %53 = arith.addf %52, %51 : vector<2x64xf32>
    %54 = arith.divf %52, %53 : vector<2x64xf32>
    %55 = vector.extract_strided_slice %54 {offsets = [0, 0], sizes = [2, 32], strides = [1, 1]} : vector<2x64xf32> to vector<2x32xf32>
    %56 = vector.extract_strided_slice %54 {offsets = [0, 32], sizes = [2, 32], strides = [1, 1]} : vector<2x64xf32> to vector<2x32xf32>
    %57 = vector.extract_strided_slice %45 {offsets = [0, 64], sizes = [2, 32], strides = [1, 1]} : vector<2x96xf32> to vector<2x32xf32>
    %58 = vector.extract_strided_slice %46 {offsets = [0, 64], sizes = [2, 32], strides = [1, 1]} : vector<2x96xf32> to vector<2x32xf32>
    %59 = arith.addf %58, %7 : vector<2x32xf32>
    %60 = arith.mulf %55, %59 : vector<2x32xf32>
    %61 = arith.addf %57, %60 : vector<2x32xf32>
    %62 = math.tanh %61 : vector<2x32xf32>
    %cst_28 = arith.constant 1.000000e+00 : f32
    %63 = vector.broadcast %cst_28 : f32 to vector<2x32xf32>
    %64 = arith.subf %63, %56 : vector<2x32xf32>
    %65 = arith.mulf %64, %62 : vector<2x32xf32>
    %66 = arith.mulf %56, %43 : vector<2x32xf32>
    %67 = arith.addf %65, %66 : vector<2x32xf32>
    %c1_29 = arith.constant 1 : index
    %c0_30 = arith.constant 0 : index
    %c0_31 = arith.constant 0 : index
    %68 = vector.load %arg5[%c1_29, %c0_30, %c0_31] : memref<8x2x96xf32, #tpu.memory_space<vmem>>, vector<1x2x96xf32>
    %69 = vector.shape_cast %68 : vector<1x2x96xf32> to vector<2x96xf32>
    %cst_32 = arith.constant dense<0.000000e+00> : vector<2x96xf32>
    %70 = tpu.matmul %67, %2, %cst_32 {dimension_numbers = #tpu.dot_dimension_numbers<[1], [0], [0], [1], [0, 0, 1, 1], [], []>} : vector<2x32xf32>, vector<32x96xf32>, vector<2x96xf32> -> vector<2x96xf32>
    %71 = vector.extract_strided_slice %69 {offsets = [0, 0], sizes = [2, 64], strides = [1, 1]} : vector<2x96xf32> to vector<2x64xf32>
    %72 = vector.extract_strided_slice %70 {offsets = [0, 0], sizes = [2, 64], strides = [1, 1]} : vector<2x96xf32> to vector<2x64xf32>
    %73 = arith.addf %71, %72 : vector<2x64xf32>
    %74 = arith.negf %73 : vector<2x64xf32>
    %75 = math.exp %74 : vector<2x64xf32>
    %cst_33 = arith.constant 1.000000e+00 : f32
    %76 = vector.broadcast %cst_33 : f32 to vector<2x64xf32>
    %77 = arith.addf %76, %75 : vector<2x64xf32>
    %78 = arith.divf %76, %77 : vector<2x64xf32>
    %79 = vector.extract_strided_slice %78 {offsets = [0, 0], sizes = [2, 32], strides = [1, 1]} : vector<2x64xf32> to vector<2x32xf32>
    %80 = vector.extract_strided_slice %78 {offsets = [0, 32], sizes = [2, 32], strides = [1, 1]} : vector<2x64xf32> to vector<2x32xf32>
    %81 = vector.extract_strided_slice %69 {offsets = [0, 64], sizes = [2, 32], strides = [1, 1]} : vector<2x96xf32> to vector<2x32xf32>
    %82 = vector.extract_strided_slice %70 {offsets = [0, 64], sizes = [2, 32], strides = [1, 1]} : vector<2x96xf32> to vector<2x32xf32>
    %83 = arith.addf %82, %7 : vector<2x32xf32>
    %84 = arith.mulf %79, %83 : vector<2x32xf32>
    %85 = arith.addf %81, %84 : vector<2x32xf32>
    %86 = math.tanh %85 : vector<2x32xf32>
    %cst_34 = arith.constant 1.000000e+00 : f32
    %87 = vector.broadcast %cst_34 : f32 to vector<2x32xf32>
    %88 = arith.subf %87, %80 : vector<2x32xf32>
    %89 = arith.mulf %88, %86 : vector<2x32xf32>
    %90 = arith.mulf %80, %67 : vector<2x32xf32>
    %91 = arith.addf %89, %90 : vector<2x32xf32>
    %c2_35 = arith.constant 2 : index
    %c0_36 = arith.constant 0 : index
    %c0_37 = arith.constant 0 : index
    %92 = vector.load %arg5[%c2_35, %c0_36, %c0_37] : memref<8x2x96xf32, #tpu.memory_space<vmem>>, vector<1x2x96xf32>
    %93 = vector.shape_cast %92 : vector<1x2x96xf32> to vector<2x96xf32>
    %cst_38 = arith.constant dense<0.000000e+00> : vector<2x96xf32>
    %94 = tpu.matmul %91, %2, %cst_38 {dimension_numbers = #tpu.dot_dimension_numbers<[1], [0], [0], [1], [0, 0, 1, 1], [], []>} : vector<2x32xf32>, vector<32x96xf32>, vector<2x96xf32> -> vector<2x96xf32>
    %95 = vector.extract_strided_slice %93 {offsets = [0, 0], sizes = [2, 64], strides = [1, 1]} : vector<2x96xf32> to vector<2x64xf32>
    %96 = vector.extract_strided_slice %94 {offsets = [0, 0], sizes = [2, 64], strides = [1, 1]} : vector<2x96xf32> to vector<2x64xf32>
    %97 = arith.addf %95, %96 : vector<2x64xf32>
    %98 = arith.negf %97 : vector<2x64xf32>
    %99 = math.exp %98 : vector<2x64xf32>
    %cst_39 = arith.constant 1.000000e+00 : f32
    %100 = vector.broadcast %cst_39 : f32 to vector<2x64xf32>
    %101 = arith.addf %100, %99 : vector<2x64xf32>
    %102 = arith.divf %100, %101 : vector<2x64xf32>
    %103 = vector.extract_strided_slice %102 {offsets = [0, 0], sizes = [2, 32], strides = [1, 1]} : vector<2x64xf32> to vector<2x32xf32>
    %104 = vector.extract_strided_slice %102 {offsets = [0, 32], sizes = [2, 32], strides = [1, 1]} : vector<2x64xf32> to vector<2x32xf32>
    %105 = vector.extract_strided_slice %93 {offsets = [0, 64], sizes = [2, 32], strides = [1, 1]} : vector<2x96xf32> to vector<2x32xf32>
    %106 = vector.extract_strided_slice %94 {offsets = [0, 64], sizes = [2, 32], strides = [1, 1]} : vector<2x96xf32> to vector<2x32xf32>
    %107 = arith.addf %106, %7 : vector<2x32xf32>
    %108 = arith.mulf %103, %107 : vector<2x32xf32>
    %109 = arith.addf %105, %108 : vector<2x32xf32>
    %110 = math.tanh %109 : vector<2x32xf32>
    %cst_40 = arith.constant 1.000000e+00 : f32
    %111 = vector.broadcast %cst_40 : f32 to vector<2x32xf32>
    %112 = arith.subf %111, %104 : vector<2x32xf32>
    %113 = arith.mulf %112, %110 : vector<2x32xf32>
    %114 = arith.mulf %104, %91 : vector<2x32xf32>
    %115 = arith.addf %113, %114 : vector<2x32xf32>
    %c3_41 = arith.constant 3 : index
    %c0_42 = arith.constant 0 : index
    %c0_43 = arith.constant 0 : index
    %116 = vector.load %arg5[%c3_41, %c0_42, %c0_43] : memref<8x2x96xf32, #tpu.memory_space<vmem>>, vector<1x2x96xf32>
    %117 = vector.shape_cast %116 : vector<1x2x96xf32> to vector<2x96xf32>
    %cst_44 = arith.constant dense<0.000000e+00> : vector<2x96xf32>
    %118 = tpu.matmul %115, %2, %cst_44 {dimension_numbers = #tpu.dot_dimension_numbers<[1], [0], [0], [1], [0, 0, 1, 1], [], []>} : vector<2x32xf32>, vector<32x96xf32>, vector<2x96xf32> -> vector<2x96xf32>
    %119 = vector.extract_strided_slice %117 {offsets = [0, 0], sizes = [2, 64], strides = [1, 1]} : vector<2x96xf32> to vector<2x64xf32>
    %120 = vector.extract_strided_slice %118 {offsets = [0, 0], sizes = [2, 64], strides = [1, 1]} : vector<2x96xf32> to vector<2x64xf32>
    %121 = arith.addf %119, %120 : vector<2x64xf32>
    %122 = arith.negf %121 : vector<2x64xf32>
    %123 = math.exp %122 : vector<2x64xf32>
    %cst_45 = arith.constant 1.000000e+00 : f32
    %124 = vector.broadcast %cst_45 : f32 to vector<2x64xf32>
    %125 = arith.addf %124, %123 : vector<2x64xf32>
    %126 = arith.divf %124, %125 : vector<2x64xf32>
    %127 = vector.extract_strided_slice %126 {offsets = [0, 0], sizes = [2, 32], strides = [1, 1]} : vector<2x64xf32> to vector<2x32xf32>
    %128 = vector.extract_strided_slice %126 {offsets = [0, 32], sizes = [2, 32], strides = [1, 1]} : vector<2x64xf32> to vector<2x32xf32>
    %129 = vector.extract_strided_slice %117 {offsets = [0, 64], sizes = [2, 32], strides = [1, 1]} : vector<2x96xf32> to vector<2x32xf32>
    %130 = vector.extract_strided_slice %118 {offsets = [0, 64], sizes = [2, 32], strides = [1, 1]} : vector<2x96xf32> to vector<2x32xf32>
    %131 = arith.addf %130, %7 : vector<2x32xf32>
    %132 = arith.mulf %127, %131 : vector<2x32xf32>
    %133 = arith.addf %129, %132 : vector<2x32xf32>
    %134 = math.tanh %133 : vector<2x32xf32>
    %cst_46 = arith.constant 1.000000e+00 : f32
    %135 = vector.broadcast %cst_46 : f32 to vector<2x32xf32>
    %136 = arith.subf %135, %128 : vector<2x32xf32>
    %137 = arith.mulf %136, %134 : vector<2x32xf32>
    %138 = arith.mulf %128, %115 : vector<2x32xf32>
    %139 = arith.addf %137, %138 : vector<2x32xf32>
    %c4_47 = arith.constant 4 : index
    %c0_48 = arith.constant 0 : index
    %c0_49 = arith.constant 0 : index
    %140 = vector.load %arg5[%c4_47, %c0_48, %c0_49] : memref<8x2x96xf32, #tpu.memory_space<vmem>>, vector<1x2x96xf32>
    %141 = vector.shape_cast %140 : vector<1x2x96xf32> to vector<2x96xf32>
    %cst_50 = arith.constant dense<0.000000e+00> : vector<2x96xf32>
    %142 = tpu.matmul %139, %2, %cst_50 {dimension_numbers = #tpu.dot_dimension_numbers<[1], [0], [0], [1], [0, 0, 1, 1], [], []>} : vector<2x32xf32>, vector<32x96xf32>, vector<2x96xf32> -> vector<2x96xf32>
    %143 = vector.extract_strided_slice %141 {offsets = [0, 0], sizes = [2, 64], strides = [1, 1]} : vector<2x96xf32> to vector<2x64xf32>
    %144 = vector.extract_strided_slice %142 {offsets = [0, 0], sizes = [2, 64], strides = [1, 1]} : vector<2x96xf32> to vector<2x64xf32>
    %145 = arith.addf %143, %144 : vector<2x64xf32>
    %146 = arith.negf %145 : vector<2x64xf32>
    %147 = math.exp %146 : vector<2x64xf32>
    %cst_51 = arith.constant 1.000000e+00 : f32
    %148 = vector.broadcast %cst_51 : f32 to vector<2x64xf32>
    %149 = arith.addf %148, %147 : vector<2x64xf32>
    %150 = arith.divf %148, %149 : vector<2x64xf32>
    %151 = vector.extract_strided_slice %150 {offsets = [0, 0], sizes = [2, 32], strides = [1, 1]} : vector<2x64xf32> to vector<2x32xf32>
    %152 = vector.extract_strided_slice %150 {offsets = [0, 32], sizes = [2, 32], strides = [1, 1]} : vector<2x64xf32> to vector<2x32xf32>
    %153 = vector.extract_strided_slice %141 {offsets = [0, 64], sizes = [2, 32], strides = [1, 1]} : vector<2x96xf32> to vector<2x32xf32>
    %154 = vector.extract_strided_slice %142 {offsets = [0, 64], sizes = [2, 32], strides = [1, 1]} : vector<2x96xf32> to vector<2x32xf32>
    %155 = arith.addf %154, %7 : vector<2x32xf32>
    %156 = arith.mulf %151, %155 : vector<2x32xf32>
    %157 = arith.addf %153, %156 : vector<2x32xf32>
    %158 = math.tanh %157 : vector<2x32xf32>
    %cst_52 = arith.constant 1.000000e+00 : f32
    %159 = vector.broadcast %cst_52 : f32 to vector<2x32xf32>
    %160 = arith.subf %159, %152 : vector<2x32xf32>
    %161 = arith.mulf %160, %158 : vector<2x32xf32>
    %162 = arith.mulf %152, %139 : vector<2x32xf32>
    %163 = arith.addf %161, %162 : vector<2x32xf32>
    %c5_53 = arith.constant 5 : index
    %c0_54 = arith.constant 0 : index
    %c0_55 = arith.constant 0 : index
    %164 = vector.load %arg5[%c5_53, %c0_54, %c0_55] : memref<8x2x96xf32, #tpu.memory_space<vmem>>, vector<1x2x96xf32>
    %165 = vector.shape_cast %164 : vector<1x2x96xf32> to vector<2x96xf32>
    %cst_56 = arith.constant dense<0.000000e+00> : vector<2x96xf32>
    %166 = tpu.matmul %163, %2, %cst_56 {dimension_numbers = #tpu.dot_dimension_numbers<[1], [0], [0], [1], [0, 0, 1, 1], [], []>} : vector<2x32xf32>, vector<32x96xf32>, vector<2x96xf32> -> vector<2x96xf32>
    %167 = vector.extract_strided_slice %165 {offsets = [0, 0], sizes = [2, 64], strides = [1, 1]} : vector<2x96xf32> to vector<2x64xf32>
    %168 = vector.extract_strided_slice %166 {offsets = [0, 0], sizes = [2, 64], strides = [1, 1]} : vector<2x96xf32> to vector<2x64xf32>
    %169 = arith.addf %167, %168 : vector<2x64xf32>
    %170 = arith.negf %169 : vector<2x64xf32>
    %171 = math.exp %170 : vector<2x64xf32>
    %cst_57 = arith.constant 1.000000e+00 : f32
    %172 = vector.broadcast %cst_57 : f32 to vector<2x64xf32>
    %173 = arith.addf %172, %171 : vector<2x64xf32>
    %174 = arith.divf %172, %173 : vector<2x64xf32>
    %175 = vector.extract_strided_slice %174 {offsets = [0, 0], sizes = [2, 32], strides = [1, 1]} : vector<2x64xf32> to vector<2x32xf32>
    %176 = vector.extract_strided_slice %174 {offsets = [0, 32], sizes = [2, 32], strides = [1, 1]} : vector<2x64xf32> to vector<2x32xf32>
    %177 = vector.extract_strided_slice %165 {offsets = [0, 64], sizes = [2, 32], strides = [1, 1]} : vector<2x96xf32> to vector<2x32xf32>
    %178 = vector.extract_strided_slice %166 {offsets = [0, 64], sizes = [2, 32], strides = [1, 1]} : vector<2x96xf32> to vector<2x32xf32>
    %179 = arith.addf %178, %7 : vector<2x32xf32>
    %180 = arith.mulf %175, %179 : vector<2x32xf32>
    %181 = arith.addf %177, %180 : vector<2x32xf32>
    %182 = math.tanh %181 : vector<2x32xf32>
    %cst_58 = arith.constant 1.000000e+00 : f32
    %183 = vector.broadcast %cst_58 : f32 to vector<2x32xf32>
    %184 = arith.subf %183, %176 : vector<2x32xf32>
    %185 = arith.mulf %184, %182 : vector<2x32xf32>
    %186 = arith.mulf %176, %163 : vector<2x32xf32>
    %187 = arith.addf %185, %186 : vector<2x32xf32>
    %c6_59 = arith.constant 6 : index
    %c0_60 = arith.constant 0 : index
    %c0_61 = arith.constant 0 : index
    %188 = vector.load %arg5[%c6_59, %c0_60, %c0_61] : memref<8x2x96xf32, #tpu.memory_space<vmem>>, vector<1x2x96xf32>
    %189 = vector.shape_cast %188 : vector<1x2x96xf32> to vector<2x96xf32>
    %cst_62 = arith.constant dense<0.000000e+00> : vector<2x96xf32>
    %190 = tpu.matmul %187, %2, %cst_62 {dimension_numbers = #tpu.dot_dimension_numbers<[1], [0], [0], [1], [0, 0, 1, 1], [], []>} : vector<2x32xf32>, vector<32x96xf32>, vector<2x96xf32> -> vector<2x96xf32>
    %191 = vector.extract_strided_slice %189 {offsets = [0, 0], sizes = [2, 64], strides = [1, 1]} : vector<2x96xf32> to vector<2x64xf32>
    %192 = vector.extract_strided_slice %190 {offsets = [0, 0], sizes = [2, 64], strides = [1, 1]} : vector<2x96xf32> to vector<2x64xf32>
    %193 = arith.addf %191, %192 : vector<2x64xf32>
    %194 = arith.negf %193 : vector<2x64xf32>
    %195 = math.exp %194 : vector<2x64xf32>
    %cst_63 = arith.constant 1.000000e+00 : f32
    %196 = vector.broadcast %cst_63 : f32 to vector<2x64xf32>
    %197 = arith.addf %196, %195 : vector<2x64xf32>
    %198 = arith.divf %196, %197 : vector<2x64xf32>
    %199 = vector.extract_strided_slice %198 {offsets = [0, 0], sizes = [2, 32], strides = [1, 1]} : vector<2x64xf32> to vector<2x32xf32>
    %200 = vector.extract_strided_slice %198 {offsets = [0, 32], sizes = [2, 32], strides = [1, 1]} : vector<2x64xf32> to vector<2x32xf32>
    %201 = vector.extract_strided_slice %189 {offsets = [0, 64], sizes = [2, 32], strides = [1, 1]} : vector<2x96xf32> to vector<2x32xf32>
    %202 = vector.extract_strided_slice %190 {offsets = [0, 64], sizes = [2, 32], strides = [1, 1]} : vector<2x96xf32> to vector<2x32xf32>
    %203 = arith.addf %202, %7 : vector<2x32xf32>
    %204 = arith.mulf %199, %203 : vector<2x32xf32>
    %205 = arith.addf %201, %204 : vector<2x32xf32>
    %206 = math.tanh %205 : vector<2x32xf32>
    %cst_64 = arith.constant 1.000000e+00 : f32
    %207 = vector.broadcast %cst_64 : f32 to vector<2x32xf32>
    %208 = arith.subf %207, %200 : vector<2x32xf32>
    %209 = arith.mulf %208, %206 : vector<2x32xf32>
    %210 = arith.mulf %200, %187 : vector<2x32xf32>
    %211 = arith.addf %209, %210 : vector<2x32xf32>
    %c7_65 = arith.constant 7 : index
    %c0_66 = arith.constant 0 : index
    %c0_67 = arith.constant 0 : index
    %212 = vector.load %arg5[%c7_65, %c0_66, %c0_67] : memref<8x2x96xf32, #tpu.memory_space<vmem>>, vector<1x2x96xf32>
    %213 = vector.shape_cast %212 : vector<1x2x96xf32> to vector<2x96xf32>
    %cst_68 = arith.constant dense<0.000000e+00> : vector<2x96xf32>
    %214 = tpu.matmul %211, %2, %cst_68 {dimension_numbers = #tpu.dot_dimension_numbers<[1], [0], [0], [1], [0, 0, 1, 1], [], []>} : vector<2x32xf32>, vector<32x96xf32>, vector<2x96xf32> -> vector<2x96xf32>
    %215 = vector.extract_strided_slice %213 {offsets = [0, 0], sizes = [2, 64], strides = [1, 1]} : vector<2x96xf32> to vector<2x64xf32>
    %216 = vector.extract_strided_slice %214 {offsets = [0, 0], sizes = [2, 64], strides = [1, 1]} : vector<2x96xf32> to vector<2x64xf32>
    %217 = arith.addf %215, %216 : vector<2x64xf32>
    %218 = arith.negf %217 : vector<2x64xf32>
    %219 = math.exp %218 : vector<2x64xf32>
    %cst_69 = arith.constant 1.000000e+00 : f32
    %220 = vector.broadcast %cst_69 : f32 to vector<2x64xf32>
    %221 = arith.addf %220, %219 : vector<2x64xf32>
    %222 = arith.divf %220, %221 : vector<2x64xf32>
    %223 = vector.extract_strided_slice %222 {offsets = [0, 0], sizes = [2, 32], strides = [1, 1]} : vector<2x64xf32> to vector<2x32xf32>
    %224 = vector.extract_strided_slice %222 {offsets = [0, 32], sizes = [2, 32], strides = [1, 1]} : vector<2x64xf32> to vector<2x32xf32>
    %225 = vector.extract_strided_slice %213 {offsets = [0, 64], sizes = [2, 32], strides = [1, 1]} : vector<2x96xf32> to vector<2x32xf32>
    %226 = vector.extract_strided_slice %214 {offsets = [0, 64], sizes = [2, 32], strides = [1, 1]} : vector<2x96xf32> to vector<2x32xf32>
    %227 = arith.addf %226, %7 : vector<2x32xf32>
    %228 = arith.mulf %223, %227 : vector<2x32xf32>
    %229 = arith.addf %225, %228 : vector<2x32xf32>
    %230 = math.tanh %229 : vector<2x32xf32>
    %cst_70 = arith.constant 1.000000e+00 : f32
    %231 = vector.broadcast %cst_70 : f32 to vector<2x32xf32>
    %232 = arith.subf %231, %224 : vector<2x32xf32>
    %233 = arith.mulf %232, %230 : vector<2x32xf32>
    %234 = arith.mulf %224, %211 : vector<2x32xf32>
    %235 = arith.addf %233, %234 : vector<2x32xf32>
    %236 = tpu.concatenate %67, %91, %115, %139, %163, %187, %211, %235 in 0 : vector<2x32xf32>, vector<2x32xf32>, vector<2x32xf32>, vector<2x32xf32>, vector<2x32xf32>, vector<2x32xf32>, vector<2x32xf32>, vector<2x32xf32> -> vector<16x32xf32>
    %c72 = arith.constant 72 : index
    %c0_71 = arith.constant 0 : index
    %237 = vector.load %arg1[%c72, %c0_71] : memref<144x96xf32, #tpu.memory_space<vmem>>, vector<32x96xf32>
    %c104 = arith.constant 104 : index
    %c0_72 = arith.constant 0 : index
    %238 = vector.load %arg1[%c104, %c0_72] : memref<144x96xf32, #tpu.memory_space<vmem>>, vector<32x96xf32>
    %c136 = arith.constant 136 : index
    %c0_73 = arith.constant 0 : index
    %239 = vector.load %arg1[%c136, %c0_73] : memref<144x96xf32, #tpu.memory_space<vmem>>, vector<2x96xf32>
    %240 = vector.extract_strided_slice %239 {offsets = [0, 0], sizes = [1, 96], strides = [1, 1]} : vector<2x96xf32> to vector<1x96xf32>
    %241 = vector.extract_strided_slice %239 {offsets = [1, 0], sizes = [1, 32], strides = [1, 1]} : vector<2x96xf32> to vector<1x32xf32>
    %242 = vector.shape_cast %241 : vector<1x32xf32> to vector<1x32xf32>
    %243 = vector.broadcast %242 : vector<1x32xf32> to vector<2x32xf32>
    %cst_74 = arith.constant dense<0.000000e+00> : vector<16x96xf32>
    %244 = tpu.matmul %236, %237, %cst_74 {dimension_numbers = #tpu.dot_dimension_numbers<[1], [0], [0], [1], [0, 0, 1, 1], [], []>} : vector<16x32xf32>, vector<32x96xf32>, vector<16x96xf32> -> vector<16x96xf32>
    %245 = vector.broadcast %240 : vector<1x96xf32> to vector<16x96xf32>
    %246 = arith.addf %244, %245 : vector<16x96xf32>
    %247 = vector.extract_strided_slice %246 {offsets = [0, 0], sizes = [2, 96], strides = [1, 1]} : vector<16x96xf32> to vector<2x96xf32>
    %c0_75 = arith.constant 0 : index
    %c0_76 = arith.constant 0 : index
    %c0_77 = arith.constant 0 : index
    %248 = vector.load %arg5[%c0_75, %c0_76, %c0_77] : memref<8x2x96xf32, #tpu.memory_space<vmem>>, vector<1x2x96xf32>
    %249 = vector.shape_cast %248 : vector<1x2x96xf32> to vector<2x96xf32>
    %250 = vector.shape_cast %247 : vector<2x96xf32> to vector<1x2x96xf32>
    tpu.vector_store %arg5[%c0_75, %c0_76, %c0_77], %250 {strides = array<i32>} : memref<8x2x96xf32, #tpu.memory_space<vmem>>, vector<1x2x96xf32>,
    %251 = vector.extract_strided_slice %246 {offsets = [2, 0], sizes = [2, 96], strides = [1, 1]} : vector<16x96xf32> to vector<2x96xf32>
    %c1_78 = arith.constant 1 : index
    %c0_79 = arith.constant 0 : index
    %c0_80 = arith.constant 0 : index
    %252 = vector.load %arg5[%c1_78, %c0_79, %c0_80] : memref<8x2x96xf32, #tpu.memory_space<vmem>>, vector<1x2x96xf32>
    %253 = vector.shape_cast %252 : vector<1x2x96xf32> to vector<2x96xf32>
    %254 = vector.shape_cast %251 : vector<2x96xf32> to vector<1x2x96xf32>
    tpu.vector_store %arg5[%c1_78, %c0_79, %c0_80], %254 {strides = array<i32>} : memref<8x2x96xf32, #tpu.memory_space<vmem>>, vector<1x2x96xf32>,
    %255 = vector.extract_strided_slice %246 {offsets = [4, 0], sizes = [2, 96], strides = [1, 1]} : vector<16x96xf32> to vector<2x96xf32>
    %c2_81 = arith.constant 2 : index
    %c0_82 = arith.constant 0 : index
    %c0_83 = arith.constant 0 : index
    %256 = vector.load %arg5[%c2_81, %c0_82, %c0_83] : memref<8x2x96xf32, #tpu.memory_space<vmem>>, vector<1x2x96xf32>
    %257 = vector.shape_cast %256 : vector<1x2x96xf32> to vector<2x96xf32>
    %258 = vector.shape_cast %255 : vector<2x96xf32> to vector<1x2x96xf32>
    tpu.vector_store %arg5[%c2_81, %c0_82, %c0_83], %258 {strides = array<i32>} : memref<8x2x96xf32, #tpu.memory_space<vmem>>, vector<1x2x96xf32>,
    %259 = vector.extract_strided_slice %246 {offsets = [6, 0], sizes = [2, 96], strides = [1, 1]} : vector<16x96xf32> to vector<2x96xf32>
    %c3_84 = arith.constant 3 : index
    %c0_85 = arith.constant 0 : index
    %c0_86 = arith.constant 0 : index
    %260 = vector.load %arg5[%c3_84, %c0_85, %c0_86] : memref<8x2x96xf32, #tpu.memory_space<vmem>>, vector<1x2x96xf32>
    %261 = vector.shape_cast %260 : vector<1x2x96xf32> to vector<2x96xf32>
    %262 = vector.shape_cast %259 : vector<2x96xf32> to vector<1x2x96xf32>
    tpu.vector_store %arg5[%c3_84, %c0_85, %c0_86], %262 {strides = array<i32>} : memref<8x2x96xf32, #tpu.memory_space<vmem>>, vector<1x2x96xf32>,
    %263 = vector.extract_strided_slice %246 {offsets = [8, 0], sizes = [2, 96], strides = [1, 1]} : vector<16x96xf32> to vector<2x96xf32>
    %c4_87 = arith.constant 4 : index
    %c0_88 = arith.constant 0 : index
    %c0_89 = arith.constant 0 : index
    %264 = vector.load %arg5[%c4_87, %c0_88, %c0_89] : memref<8x2x96xf32, #tpu.memory_space<vmem>>, vector<1x2x96xf32>
    %265 = vector.shape_cast %264 : vector<1x2x96xf32> to vector<2x96xf32>
    %266 = vector.shape_cast %263 : vector<2x96xf32> to vector<1x2x96xf32>
    tpu.vector_store %arg5[%c4_87, %c0_88, %c0_89], %266 {strides = array<i32>} : memref<8x2x96xf32, #tpu.memory_space<vmem>>, vector<1x2x96xf32>,
    %267 = vector.extract_strided_slice %246 {offsets = [10, 0], sizes = [2, 96], strides = [1, 1]} : vector<16x96xf32> to vector<2x96xf32>
    %c5_90 = arith.constant 5 : index
    %c0_91 = arith.constant 0 : index
    %c0_92 = arith.constant 0 : index
    %268 = vector.load %arg5[%c5_90, %c0_91, %c0_92] : memref<8x2x96xf32, #tpu.memory_space<vmem>>, vector<1x2x96xf32>
    %269 = vector.shape_cast %268 : vector<1x2x96xf32> to vector<2x96xf32>
    %270 = vector.shape_cast %267 : vector<2x96xf32> to vector<1x2x96xf32>
    tpu.vector_store %arg5[%c5_90, %c0_91, %c0_92], %270 {strides = array<i32>} : memref<8x2x96xf32, #tpu.memory_space<vmem>>, vector<1x2x96xf32>,
    %271 = vector.extract_strided_slice %246 {offsets = [12, 0], sizes = [2, 96], strides = [1, 1]} : vector<16x96xf32> to vector<2x96xf32>
    %c6_93 = arith.constant 6 : index
    %c0_94 = arith.constant 0 : index
    %c0_95 = arith.constant 0 : index
    %272 = vector.load %arg5[%c6_93, %c0_94, %c0_95] : memref<8x2x96xf32, #tpu.memory_space<vmem>>, vector<1x2x96xf32>
    %273 = vector.shape_cast %272 : vector<1x2x96xf32> to vector<2x96xf32>
    %274 = vector.shape_cast %271 : vector<2x96xf32> to vector<1x2x96xf32>
    tpu.vector_store %arg5[%c6_93, %c0_94, %c0_95], %274 {strides = array<i32>} : memref<8x2x96xf32, #tpu.memory_space<vmem>>, vector<1x2x96xf32>,
    %275 = vector.extract_strided_slice %246 {offsets = [14, 0], sizes = [2, 96], strides = [1, 1]} : vector<16x96xf32> to vector<2x96xf32>
    %c7_96 = arith.constant 7 : index
    %c0_97 = arith.constant 0 : index
    %c0_98 = arith.constant 0 : index
    %276 = vector.load %arg5[%c7_96, %c0_97, %c0_98] : memref<8x2x96xf32, #tpu.memory_space<vmem>>, vector<1x2x96xf32>
    %277 = vector.shape_cast %276 : vector<1x2x96xf32> to vector<2x96xf32>
    %278 = vector.shape_cast %275 : vector<2x96xf32> to vector<1x2x96xf32>
    tpu.vector_store %arg5[%c7_96, %c0_97, %c0_98], %278 {strides = array<i32>} : memref<8x2x96xf32, #tpu.memory_space<vmem>>, vector<1x2x96xf32>,
    %cst_99 = arith.constant 0.000000e+00 : f32
    %279 = vector.broadcast %cst_99 : f32 to vector<2x32xf32>
    %c0_100 = arith.constant 0 : index
    %c0_101 = arith.constant 0 : index
    %c0_102 = arith.constant 0 : index
    %280 = vector.load %arg5[%c0_100, %c0_101, %c0_102] : memref<8x2x96xf32, #tpu.memory_space<vmem>>, vector<1x2x96xf32>
    %281 = vector.shape_cast %280 : vector<1x2x96xf32> to vector<2x96xf32>
    %cst_103 = arith.constant dense<0.000000e+00> : vector<2x96xf32>
    %282 = tpu.matmul %279, %238, %cst_103 {dimension_numbers = #tpu.dot_dimension_numbers<[1], [0], [0], [1], [0, 0, 1, 1], [], []>} : vector<2x32xf32>, vector<32x96xf32>, vector<2x96xf32> -> vector<2x96xf32>
    %283 = vector.extract_strided_slice %281 {offsets = [0, 0], sizes = [2, 64], strides = [1, 1]} : vector<2x96xf32> to vector<2x64xf32>
    %284 = vector.extract_strided_slice %282 {offsets = [0, 0], sizes = [2, 64], strides = [1, 1]} : vector<2x96xf32> to vector<2x64xf32>
    %285 = arith.addf %283, %284 : vector<2x64xf32>
    %286 = arith.negf %285 : vector<2x64xf32>
    %287 = math.exp %286 : vector<2x64xf32>
    %cst_104 = arith.constant 1.000000e+00 : f32
    %288 = vector.broadcast %cst_104 : f32 to vector<2x64xf32>
    %289 = arith.addf %288, %287 : vector<2x64xf32>
    %290 = arith.divf %288, %289 : vector<2x64xf32>
    %291 = vector.extract_strided_slice %290 {offsets = [0, 0], sizes = [2, 32], strides = [1, 1]} : vector<2x64xf32> to vector<2x32xf32>
    %292 = vector.extract_strided_slice %290 {offsets = [0, 32], sizes = [2, 32], strides = [1, 1]} : vector<2x64xf32> to vector<2x32xf32>
    %293 = vector.extract_strided_slice %281 {offsets = [0, 64], sizes = [2, 32], strides = [1, 1]} : vector<2x96xf32> to vector<2x32xf32>
    %294 = vector.extract_strided_slice %282 {offsets = [0, 64], sizes = [2, 32], strides = [1, 1]} : vector<2x96xf32> to vector<2x32xf32>
    %295 = arith.addf %294, %243 : vector<2x32xf32>
    %296 = arith.mulf %291, %295 : vector<2x32xf32>
    %297 = arith.addf %293, %296 : vector<2x32xf32>
    %298 = math.tanh %297 : vector<2x32xf32>
    %cst_105 = arith.constant 1.000000e+00 : f32
    %299 = vector.broadcast %cst_105 : f32 to vector<2x32xf32>
    %300 = arith.subf %299, %292 : vector<2x32xf32>
    %301 = arith.mulf %300, %298 : vector<2x32xf32>
    %302 = arith.mulf %292, %279 : vector<2x32xf32>
    %303 = arith.addf %301, %302 : vector<2x32xf32>
    %c1_106 = arith.constant 1 : index
    %c0_107 = arith.constant 0 : index
    %c0_108 = arith.constant 0 : index
    %304 = vector.load %arg5[%c1_106, %c0_107, %c0_108] : memref<8x2x96xf32, #tpu.memory_space<vmem>>, vector<1x2x96xf32>
    %305 = vector.shape_cast %304 : vector<1x2x96xf32> to vector<2x96xf32>
    %cst_109 = arith.constant dense<0.000000e+00> : vector<2x96xf32>
    %306 = tpu.matmul %303, %238, %cst_109 {dimension_numbers = #tpu.dot_dimension_numbers<[1], [0], [0], [1], [0, 0, 1, 1], [], []>} : vector<2x32xf32>, vector<32x96xf32>, vector<2x96xf32> -> vector<2x96xf32>
    %307 = vector.extract_strided_slice %305 {offsets = [0, 0], sizes = [2, 64], strides = [1, 1]} : vector<2x96xf32> to vector<2x64xf32>
    %308 = vector.extract_strided_slice %306 {offsets = [0, 0], sizes = [2, 64], strides = [1, 1]} : vector<2x96xf32> to vector<2x64xf32>
    %309 = arith.addf %307, %308 : vector<2x64xf32>
    %310 = arith.negf %309 : vector<2x64xf32>
    %311 = math.exp %310 : vector<2x64xf32>
    %cst_110 = arith.constant 1.000000e+00 : f32
    %312 = vector.broadcast %cst_110 : f32 to vector<2x64xf32>
    %313 = arith.addf %312, %311 : vector<2x64xf32>
    %314 = arith.divf %312, %313 : vector<2x64xf32>
    %315 = vector.extract_strided_slice %314 {offsets = [0, 0], sizes = [2, 32], strides = [1, 1]} : vector<2x64xf32> to vector<2x32xf32>
    %316 = vector.extract_strided_slice %314 {offsets = [0, 32], sizes = [2, 32], strides = [1, 1]} : vector<2x64xf32> to vector<2x32xf32>
    %317 = vector.extract_strided_slice %305 {offsets = [0, 64], sizes = [2, 32], strides = [1, 1]} : vector<2x96xf32> to vector<2x32xf32>
    %318 = vector.extract_strided_slice %306 {offsets = [0, 64], sizes = [2, 32], strides = [1, 1]} : vector<2x96xf32> to vector<2x32xf32>
    %319 = arith.addf %318, %243 : vector<2x32xf32>
    %320 = arith.mulf %315, %319 : vector<2x32xf32>
    %321 = arith.addf %317, %320 : vector<2x32xf32>
    %322 = math.tanh %321 : vector<2x32xf32>
    %cst_111 = arith.constant 1.000000e+00 : f32
    %323 = vector.broadcast %cst_111 : f32 to vector<2x32xf32>
    %324 = arith.subf %323, %316 : vector<2x32xf32>
    %325 = arith.mulf %324, %322 : vector<2x32xf32>
    %326 = arith.mulf %316, %303 : vector<2x32xf32>
    %327 = arith.addf %325, %326 : vector<2x32xf32>
    %c2_112 = arith.constant 2 : index
    %c0_113 = arith.constant 0 : index
    %c0_114 = arith.constant 0 : index
    %328 = vector.load %arg5[%c2_112, %c0_113, %c0_114] : memref<8x2x96xf32, #tpu.memory_space<vmem>>, vector<1x2x96xf32>
    %329 = vector.shape_cast %328 : vector<1x2x96xf32> to vector<2x96xf32>
    %cst_115 = arith.constant dense<0.000000e+00> : vector<2x96xf32>
    %330 = tpu.matmul %327, %238, %cst_115 {dimension_numbers = #tpu.dot_dimension_numbers<[1], [0], [0], [1], [0, 0, 1, 1], [], []>} : vector<2x32xf32>, vector<32x96xf32>, vector<2x96xf32> -> vector<2x96xf32>
    %331 = vector.extract_strided_slice %329 {offsets = [0, 0], sizes = [2, 64], strides = [1, 1]} : vector<2x96xf32> to vector<2x64xf32>
    %332 = vector.extract_strided_slice %330 {offsets = [0, 0], sizes = [2, 64], strides = [1, 1]} : vector<2x96xf32> to vector<2x64xf32>
    %333 = arith.addf %331, %332 : vector<2x64xf32>
    %334 = arith.negf %333 : vector<2x64xf32>
    %335 = math.exp %334 : vector<2x64xf32>
    %cst_116 = arith.constant 1.000000e+00 : f32
    %336 = vector.broadcast %cst_116 : f32 to vector<2x64xf32>
    %337 = arith.addf %336, %335 : vector<2x64xf32>
    %338 = arith.divf %336, %337 : vector<2x64xf32>
    %339 = vector.extract_strided_slice %338 {offsets = [0, 0], sizes = [2, 32], strides = [1, 1]} : vector<2x64xf32> to vector<2x32xf32>
    %340 = vector.extract_strided_slice %338 {offsets = [0, 32], sizes = [2, 32], strides = [1, 1]} : vector<2x64xf32> to vector<2x32xf32>
    %341 = vector.extract_strided_slice %329 {offsets = [0, 64], sizes = [2, 32], strides = [1, 1]} : vector<2x96xf32> to vector<2x32xf32>
    %342 = vector.extract_strided_slice %330 {offsets = [0, 64], sizes = [2, 32], strides = [1, 1]} : vector<2x96xf32> to vector<2x32xf32>
    %343 = arith.addf %342, %243 : vector<2x32xf32>
    %344 = arith.mulf %339, %343 : vector<2x32xf32>
    %345 = arith.addf %341, %344 : vector<2x32xf32>
    %346 = math.tanh %345 : vector<2x32xf32>
    %cst_117 = arith.constant 1.000000e+00 : f32
    %347 = vector.broadcast %cst_117 : f32 to vector<2x32xf32>
    %348 = arith.subf %347, %340 : vector<2x32xf32>
    %349 = arith.mulf %348, %346 : vector<2x32xf32>
    %350 = arith.mulf %340, %327 : vector<2x32xf32>
    %351 = arith.addf %349, %350 : vector<2x32xf32>
    %c3_118 = arith.constant 3 : index
    %c0_119 = arith.constant 0 : index
    %c0_120 = arith.constant 0 : index
    %352 = vector.load %arg5[%c3_118, %c0_119, %c0_120] : memref<8x2x96xf32, #tpu.memory_space<vmem>>, vector<1x2x96xf32>
    %353 = vector.shape_cast %352 : vector<1x2x96xf32> to vector<2x96xf32>
    %cst_121 = arith.constant dense<0.000000e+00> : vector<2x96xf32>
    %354 = tpu.matmul %351, %238, %cst_121 {dimension_numbers = #tpu.dot_dimension_numbers<[1], [0], [0], [1], [0, 0, 1, 1], [], []>} : vector<2x32xf32>, vector<32x96xf32>, vector<2x96xf32> -> vector<2x96xf32>
    %355 = vector.extract_strided_slice %353 {offsets = [0, 0], sizes = [2, 64], strides = [1, 1]} : vector<2x96xf32> to vector<2x64xf32>
    %356 = vector.extract_strided_slice %354 {offsets = [0, 0], sizes = [2, 64], strides = [1, 1]} : vector<2x96xf32> to vector<2x64xf32>
    %357 = arith.addf %355, %356 : vector<2x64xf32>
    %358 = arith.negf %357 : vector<2x64xf32>
    %359 = math.exp %358 : vector<2x64xf32>
    %cst_122 = arith.constant 1.000000e+00 : f32
    %360 = vector.broadcast %cst_122 : f32 to vector<2x64xf32>
    %361 = arith.addf %360, %359 : vector<2x64xf32>
    %362 = arith.divf %360, %361 : vector<2x64xf32>
    %363 = vector.extract_strided_slice %362 {offsets = [0, 0], sizes = [2, 32], strides = [1, 1]} : vector<2x64xf32> to vector<2x32xf32>
    %364 = vector.extract_strided_slice %362 {offsets = [0, 32], sizes = [2, 32], strides = [1, 1]} : vector<2x64xf32> to vector<2x32xf32>
    %365 = vector.extract_strided_slice %353 {offsets = [0, 64], sizes = [2, 32], strides = [1, 1]} : vector<2x96xf32> to vector<2x32xf32>
    %366 = vector.extract_strided_slice %354 {offsets = [0, 64], sizes = [2, 32], strides = [1, 1]} : vector<2x96xf32> to vector<2x32xf32>
    %367 = arith.addf %366, %243 : vector<2x32xf32>
    %368 = arith.mulf %363, %367 : vector<2x32xf32>
    %369 = arith.addf %365, %368 : vector<2x32xf32>
    %370 = math.tanh %369 : vector<2x32xf32>
    %cst_123 = arith.constant 1.000000e+00 : f32
    %371 = vector.broadcast %cst_123 : f32 to vector<2x32xf32>
    %372 = arith.subf %371, %364 : vector<2x32xf32>
    %373 = arith.mulf %372, %370 : vector<2x32xf32>
    %374 = arith.mulf %364, %351 : vector<2x32xf32>
    %375 = arith.addf %373, %374 : vector<2x32xf32>
    %c4_124 = arith.constant 4 : index
    %c0_125 = arith.constant 0 : index
    %c0_126 = arith.constant 0 : index
    %376 = vector.load %arg5[%c4_124, %c0_125, %c0_126] : memref<8x2x96xf32, #tpu.memory_space<vmem>>, vector<1x2x96xf32>
    %377 = vector.shape_cast %376 : vector<1x2x96xf32> to vector<2x96xf32>
    %cst_127 = arith.constant dense<0.000000e+00> : vector<2x96xf32>
    %378 = tpu.matmul %375, %238, %cst_127 {dimension_numbers = #tpu.dot_dimension_numbers<[1], [0], [0], [1], [0, 0, 1, 1], [], []>} : vector<2x32xf32>, vector<32x96xf32>, vector<2x96xf32> -> vector<2x96xf32>
    %379 = vector.extract_strided_slice %377 {offsets = [0, 0], sizes = [2, 64], strides = [1, 1]} : vector<2x96xf32> to vector<2x64xf32>
    %380 = vector.extract_strided_slice %378 {offsets = [0, 0], sizes = [2, 64], strides = [1, 1]} : vector<2x96xf32> to vector<2x64xf32>
    %381 = arith.addf %379, %380 : vector<2x64xf32>
    %382 = arith.negf %381 : vector<2x64xf32>
    %383 = math.exp %382 : vector<2x64xf32>
    %cst_128 = arith.constant 1.000000e+00 : f32
    %384 = vector.broadcast %cst_128 : f32 to vector<2x64xf32>
    %385 = arith.addf %384, %383 : vector<2x64xf32>
    %386 = arith.divf %384, %385 : vector<2x64xf32>
    %387 = vector.extract_strided_slice %386 {offsets = [0, 0], sizes = [2, 32], strides = [1, 1]} : vector<2x64xf32> to vector<2x32xf32>
    %388 = vector.extract_strided_slice %386 {offsets = [0, 32], sizes = [2, 32], strides = [1, 1]} : vector<2x64xf32> to vector<2x32xf32>
    %389 = vector.extract_strided_slice %377 {offsets = [0, 64], sizes = [2, 32], strides = [1, 1]} : vector<2x96xf32> to vector<2x32xf32>
    %390 = vector.extract_strided_slice %378 {offsets = [0, 64], sizes = [2, 32], strides = [1, 1]} : vector<2x96xf32> to vector<2x32xf32>
    %391 = arith.addf %390, %243 : vector<2x32xf32>
    %392 = arith.mulf %387, %391 : vector<2x32xf32>
    %393 = arith.addf %389, %392 : vector<2x32xf32>
    %394 = math.tanh %393 : vector<2x32xf32>
    %cst_129 = arith.constant 1.000000e+00 : f32
    %395 = vector.broadcast %cst_129 : f32 to vector<2x32xf32>
    %396 = arith.subf %395, %388 : vector<2x32xf32>
    %397 = arith.mulf %396, %394 : vector<2x32xf32>
    %398 = arith.mulf %388, %375 : vector<2x32xf32>
    %399 = arith.addf %397, %398 : vector<2x32xf32>
    %c5_130 = arith.constant 5 : index
    %c0_131 = arith.constant 0 : index
    %c0_132 = arith.constant 0 : index
    %400 = vector.load %arg5[%c5_130, %c0_131, %c0_132] : memref<8x2x96xf32, #tpu.memory_space<vmem>>, vector<1x2x96xf32>
    %401 = vector.shape_cast %400 : vector<1x2x96xf32> to vector<2x96xf32>
    %cst_133 = arith.constant dense<0.000000e+00> : vector<2x96xf32>
    %402 = tpu.matmul %399, %238, %cst_133 {dimension_numbers = #tpu.dot_dimension_numbers<[1], [0], [0], [1], [0, 0, 1, 1], [], []>} : vector<2x32xf32>, vector<32x96xf32>, vector<2x96xf32> -> vector<2x96xf32>
    %403 = vector.extract_strided_slice %401 {offsets = [0, 0], sizes = [2, 64], strides = [1, 1]} : vector<2x96xf32> to vector<2x64xf32>
    %404 = vector.extract_strided_slice %402 {offsets = [0, 0], sizes = [2, 64], strides = [1, 1]} : vector<2x96xf32> to vector<2x64xf32>
    %405 = arith.addf %403, %404 : vector<2x64xf32>
    %406 = arith.negf %405 : vector<2x64xf32>
    %407 = math.exp %406 : vector<2x64xf32>
    %cst_134 = arith.constant 1.000000e+00 : f32
    %408 = vector.broadcast %cst_134 : f32 to vector<2x64xf32>
    %409 = arith.addf %408, %407 : vector<2x64xf32>
    %410 = arith.divf %408, %409 : vector<2x64xf32>
    %411 = vector.extract_strided_slice %410 {offsets = [0, 0], sizes = [2, 32], strides = [1, 1]} : vector<2x64xf32> to vector<2x32xf32>
    %412 = vector.extract_strided_slice %410 {offsets = [0, 32], sizes = [2, 32], strides = [1, 1]} : vector<2x64xf32> to vector<2x32xf32>
    %413 = vector.extract_strided_slice %401 {offsets = [0, 64], sizes = [2, 32], strides = [1, 1]} : vector<2x96xf32> to vector<2x32xf32>
    %414 = vector.extract_strided_slice %402 {offsets = [0, 64], sizes = [2, 32], strides = [1, 1]} : vector<2x96xf32> to vector<2x32xf32>
    %415 = arith.addf %414, %243 : vector<2x32xf32>
    %416 = arith.mulf %411, %415 : vector<2x32xf32>
    %417 = arith.addf %413, %416 : vector<2x32xf32>
    %418 = math.tanh %417 : vector<2x32xf32>
    %cst_135 = arith.constant 1.000000e+00 : f32
    %419 = vector.broadcast %cst_135 : f32 to vector<2x32xf32>
    %420 = arith.subf %419, %412 : vector<2x32xf32>
    %421 = arith.mulf %420, %418 : vector<2x32xf32>
    %422 = arith.mulf %412, %399 : vector<2x32xf32>
    %423 = arith.addf %421, %422 : vector<2x32xf32>
    %c6_136 = arith.constant 6 : index
    %c0_137 = arith.constant 0 : index
    %c0_138 = arith.constant 0 : index
    %424 = vector.load %arg5[%c6_136, %c0_137, %c0_138] : memref<8x2x96xf32, #tpu.memory_space<vmem>>, vector<1x2x96xf32>
    %425 = vector.shape_cast %424 : vector<1x2x96xf32> to vector<2x96xf32>
    %cst_139 = arith.constant dense<0.000000e+00> : vector<2x96xf32>
    %426 = tpu.matmul %423, %238, %cst_139 {dimension_numbers = #tpu.dot_dimension_numbers<[1], [0], [0], [1], [0, 0, 1, 1], [], []>} : vector<2x32xf32>, vector<32x96xf32>, vector<2x96xf32> -> vector<2x96xf32>
    %427 = vector.extract_strided_slice %425 {offsets = [0, 0], sizes = [2, 64], strides = [1, 1]} : vector<2x96xf32> to vector<2x64xf32>
    %428 = vector.extract_strided_slice %426 {offsets = [0, 0], sizes = [2, 64], strides = [1, 1]} : vector<2x96xf32> to vector<2x64xf32>
    %429 = arith.addf %427, %428 : vector<2x64xf32>
    %430 = arith.negf %429 : vector<2x64xf32>
    %431 = math.exp %430 : vector<2x64xf32>
    %cst_140 = arith.constant 1.000000e+00 : f32
    %432 = vector.broadcast %cst_140 : f32 to vector<2x64xf32>
    %433 = arith.addf %432, %431 : vector<2x64xf32>
    %434 = arith.divf %432, %433 : vector<2x64xf32>
    %435 = vector.extract_strided_slice %434 {offsets = [0, 0], sizes = [2, 32], strides = [1, 1]} : vector<2x64xf32> to vector<2x32xf32>
    %436 = vector.extract_strided_slice %434 {offsets = [0, 32], sizes = [2, 32], strides = [1, 1]} : vector<2x64xf32> to vector<2x32xf32>
    %437 = vector.extract_strided_slice %425 {offsets = [0, 64], sizes = [2, 32], strides = [1, 1]} : vector<2x96xf32> to vector<2x32xf32>
    %438 = vector.extract_strided_slice %426 {offsets = [0, 64], sizes = [2, 32], strides = [1, 1]} : vector<2x96xf32> to vector<2x32xf32>
    %439 = arith.addf %438, %243 : vector<2x32xf32>
    %440 = arith.mulf %435, %439 : vector<2x32xf32>
    %441 = arith.addf %437, %440 : vector<2x32xf32>
    %442 = math.tanh %441 : vector<2x32xf32>
    %cst_141 = arith.constant 1.000000e+00 : f32
    %443 = vector.broadcast %cst_141 : f32 to vector<2x32xf32>
    %444 = arith.subf %443, %436 : vector<2x32xf32>
    %445 = arith.mulf %444, %442 : vector<2x32xf32>
    %446 = arith.mulf %436, %423 : vector<2x32xf32>
    %447 = arith.addf %445, %446 : vector<2x32xf32>
    %c7_142 = arith.constant 7 : index
    %c0_143 = arith.constant 0 : index
    %c0_144 = arith.constant 0 : index
    %448 = vector.load %arg5[%c7_142, %c0_143, %c0_144] : memref<8x2x96xf32, #tpu.memory_space<vmem>>, vector<1x2x96xf32>
    %449 = vector.shape_cast %448 : vector<1x2x96xf32> to vector<2x96xf32>
    %cst_145 = arith.constant dense<0.000000e+00> : vector<2x96xf32>
    %450 = tpu.matmul %447, %238, %cst_145 {dimension_numbers = #tpu.dot_dimension_numbers<[1], [0], [0], [1], [0, 0, 1, 1], [], []>} : vector<2x32xf32>, vector<32x96xf32>, vector<2x96xf32> -> vector<2x96xf32>
    %451 = vector.extract_strided_slice %449 {offsets = [0, 0], sizes = [2, 64], strides = [1, 1]} : vector<2x96xf32> to vector<2x64xf32>
    %452 = vector.extract_strided_slice %450 {offsets = [0, 0], sizes = [2, 64], strides = [1, 1]} : vector<2x96xf32> to vector<2x64xf32>
    %453 = arith.addf %451, %452 : vector<2x64xf32>
    %454 = arith.negf %453 : vector<2x64xf32>
    %455 = math.exp %454 : vector<2x64xf32>
    %cst_146 = arith.constant 1.000000e+00 : f32
    %456 = vector.broadcast %cst_146 : f32 to vector<2x64xf32>
    %457 = arith.addf %456, %455 : vector<2x64xf32>
    %458 = arith.divf %456, %457 : vector<2x64xf32>
    %459 = vector.extract_strided_slice %458 {offsets = [0, 0], sizes = [2, 32], strides = [1, 1]} : vector<2x64xf32> to vector<2x32xf32>
    %460 = vector.extract_strided_slice %458 {offsets = [0, 32], sizes = [2, 32], strides = [1, 1]} : vector<2x64xf32> to vector<2x32xf32>
    %461 = vector.extract_strided_slice %449 {offsets = [0, 64], sizes = [2, 32], strides = [1, 1]} : vector<2x96xf32> to vector<2x32xf32>
    %462 = vector.extract_strided_slice %450 {offsets = [0, 64], sizes = [2, 32], strides = [1, 1]} : vector<2x96xf32> to vector<2x32xf32>
    %463 = arith.addf %462, %243 : vector<2x32xf32>
    %464 = arith.mulf %459, %463 : vector<2x32xf32>
    %465 = arith.addf %461, %464 : vector<2x32xf32>
    %466 = math.tanh %465 : vector<2x32xf32>
    %cst_147 = arith.constant 1.000000e+00 : f32
    %467 = vector.broadcast %cst_147 : f32 to vector<2x32xf32>
    %468 = arith.subf %467, %460 : vector<2x32xf32>
    %469 = arith.mulf %468, %466 : vector<2x32xf32>
    %470 = arith.mulf %460, %447 : vector<2x32xf32>
    %471 = arith.addf %469, %470 : vector<2x32xf32>
    %472 = tpu.concatenate %303, %327, %351, %375, %399, %423, %447, %471 in 0 : vector<2x32xf32>, vector<2x32xf32>, vector<2x32xf32>, vector<2x32xf32>, vector<2x32xf32>, vector<2x32xf32>, vector<2x32xf32>, vector<2x32xf32> -> vector<16x32xf32>
    %c0_148 = arith.constant 0 : index
    %c0_149 = arith.constant 0 : index
    %473 = vector.load %arg2[%c0_148, %c0_149] : memref<40x736xf32, #tpu.memory_space<vmem>>, vector<32x736xf32>
    %c32_150 = arith.constant 32 : index
    %c0_151 = arith.constant 0 : index
    %474 = vector.load %arg2[%c32_150, %c0_151] : memref<40x736xf32, #tpu.memory_space<vmem>>, vector<3x736xf32>
    %cst_152 = arith.constant dense<0.000000e+00> : vector<16x736xf32>
    %475 = tpu.matmul %472, %473, %cst_152 {dimension_numbers = #tpu.dot_dimension_numbers<[1], [0], [0], [1], [0, 0, 1, 1], [], []>} : vector<16x32xf32>, vector<32x736xf32>, vector<16x736xf32> -> vector<16x736xf32>
    %476 = vector.extract_strided_slice %474 {offsets = [0, 0], sizes = [1, 736], strides = [1, 1]} : vector<3x736xf32> to vector<1x736xf32>
    %477 = vector.broadcast %476 : vector<1x736xf32> to vector<16x736xf32>
    %478 = arith.addf %475, %477 : vector<16x736xf32>
    %479 = vector.extract_strided_slice %478 {offsets = [0, 0], sizes = [16, 576], strides = [1, 1]} : vector<16x736xf32> to vector<16x576xf32>
    %cst_153 = arith.constant 0.000000e+00 : f32
    %480 = vector.broadcast %cst_153 : f32 to vector<16x576xf32>
    %481 = arith.maximumf %479, %480 : vector<16x576xf32>
    %482 = vector.extract_strided_slice %478 {offsets = [0, 576], sizes = [16, 160], strides = [1, 1]} : vector<16x736xf32> to vector<16x160xf32>
    %483 = vector.extract_strided_slice %474 {offsets = [1, 0], sizes = [1, 160], strides = [1, 1]} : vector<3x736xf32> to vector<1x160xf32>
    %484 = vector.extract_strided_slice %474 {offsets = [2, 0], sizes = [1, 160], strides = [1, 1]} : vector<3x736xf32> to vector<1x160xf32>
    %cst_154 = arith.constant dense<0.000000e+00> : vector<160xf32>
    %485 = vector.multi_reduction <add>, %482, %cst_154 [0] : vector<16x160xf32> to vector<160xf32>
    %486 = vector.shape_cast %485 : vector<160xf32> to vector<1x160xf32>
    %cst_155 = arith.constant 1.600000e+01 : f32
    %487 = vector.broadcast %cst_155 : f32 to vector<1x160xf32>
    %488 = arith.divf %486, %487 : vector<1x160xf32>
    %489 = vector.broadcast %488 : vector<1x160xf32> to vector<16x160xf32>
    %490 = arith.subf %482, %489 : vector<16x160xf32>
    %491 = vector.broadcast %488 : vector<1x160xf32> to vector<16x160xf32>
    %492 = arith.subf %482, %491 : vector<16x160xf32>
    %493 = arith.mulf %490, %492 : vector<16x160xf32>
    %cst_156 = arith.constant dense<0.000000e+00> : vector<160xf32>
    %494 = vector.multi_reduction <add>, %493, %cst_156 [0] : vector<16x160xf32> to vector<160xf32>
    %495 = vector.shape_cast %494 : vector<160xf32> to vector<1x160xf32>
    %cst_157 = arith.constant 1.600000e+01 : f32
    %496 = vector.broadcast %cst_157 : f32 to vector<1x160xf32>
    %497 = arith.divf %495, %496 : vector<1x160xf32>
    %498 = vector.broadcast %488 : vector<1x160xf32> to vector<16x160xf32>
    %499 = arith.subf %482, %498 : vector<16x160xf32>
    %cst_158 = arith.constant 9.99999974E-6 : f32
    %500 = vector.broadcast %cst_158 : f32 to vector<1x160xf32>
    %501 = arith.addf %497, %500 : vector<1x160xf32>
    %502 = math.rsqrt %501 : vector<1x160xf32>
    %503 = vector.broadcast %502 : vector<1x160xf32> to vector<16x160xf32>
    %504 = arith.mulf %499, %503 : vector<16x160xf32>
    %505 = vector.broadcast %483 : vector<1x160xf32> to vector<16x160xf32>
    %506 = arith.mulf %504, %505 : vector<16x160xf32>
    %507 = vector.broadcast %484 : vector<1x160xf32> to vector<16x160xf32>
    %508 = arith.addf %506, %507 : vector<16x160xf32>
    %cst_159 = arith.constant 0.000000e+00 : f32
    %509 = vector.broadcast %cst_159 : f32 to vector<16x160xf32>
    %510 = arith.maximumf %508, %509 : vector<16x160xf32>
    %c0_160 = arith.constant 0 : index
    %c0_161 = arith.constant 0 : index
    %511 = vector.load %arg3[%c0_160, %c0_161] : memref<824x80xf32, #tpu.memory_space<vmem>>, vector<576x24xf32>
    %c576 = arith.constant 576 : index
    %c0_162 = arith.constant 0 : index
    %512 = vector.load %arg3[%c576, %c0_162] : memref<824x80xf32, #tpu.memory_space<vmem>>, vector<160x80xf32>
    %c736 = arith.constant 736 : index
    %c0_163 = arith.constant 0 : index
    %513 = vector.load %arg3[%c736, %c0_163] : memref<824x80xf32, #tpu.memory_space<vmem>>, vector<80x8xf32>
    %c816 = arith.constant 816 : index
    %c0_164 = arith.constant 0 : index
    %514 = vector.load %arg3[%c816, %c0_164] : memref<824x80xf32, #tpu.memory_space<vmem>>, vector<5x80xf32>
    %cst_165 = arith.constant dense<0.000000e+00> : vector<16x24xf32>
    %515 = tpu.matmul %481, %511, %cst_165 {dimension_numbers = #tpu.dot_dimension_numbers<[1], [0], [0], [1], [0, 0, 1, 1], [], []>} : vector<16x576xf32>, vector<576x24xf32>, vector<16x24xf32> -> vector<16x24xf32>
    %516 = vector.extract_strided_slice %514 {offsets = [0, 0], sizes = [1, 24], strides = [1, 1]} : vector<5x80xf32> to vector<1x24xf32>
    %517 = vector.broadcast %516 : vector<1x24xf32> to vector<16x24xf32>
    %518 = arith.addf %515, %517 : vector<16x24xf32>
    %cst_166 = arith.constant dense<0.000000e+00> : vector<16x80xf32>
    %519 = tpu.matmul %510, %512, %cst_166 {dimension_numbers = #tpu.dot_dimension_numbers<[1], [0], [0], [1], [0, 0, 1, 1], [], []>} : vector<16x160xf32>, vector<160x80xf32>, vector<16x80xf32> -> vector<16x80xf32>
    %520 = vector.extract_strided_slice %514 {offsets = [1, 0], sizes = [1, 80], strides = [1, 1]} : vector<5x80xf32> to vector<1x80xf32>
    %521 = vector.broadcast %520 : vector<1x80xf32> to vector<16x80xf32>
    %522 = arith.addf %519, %521 : vector<16x80xf32>
    %523 = vector.extract_strided_slice %514 {offsets = [2, 0], sizes = [1, 80], strides = [1, 1]} : vector<5x80xf32> to vector<1x80xf32>
    %524 = vector.extract_strided_slice %514 {offsets = [3, 0], sizes = [1, 80], strides = [1, 1]} : vector<5x80xf32> to vector<1x80xf32>
    %cst_167 = arith.constant dense<0.000000e+00> : vector<80xf32>
    %525 = vector.multi_reduction <add>, %522, %cst_167 [0] : vector<16x80xf32> to vector<80xf32>
    %526 = vector.shape_cast %525 : vector<80xf32> to vector<1x80xf32>
    %cst_168 = arith.constant 1.600000e+01 : f32
    %527 = vector.broadcast %cst_168 : f32 to vector<1x80xf32>
    %528 = arith.divf %526, %527 : vector<1x80xf32>
    %529 = vector.broadcast %528 : vector<1x80xf32> to vector<16x80xf32>
    %530 = arith.subf %522, %529 : vector<16x80xf32>
    %531 = vector.broadcast %528 : vector<1x80xf32> to vector<16x80xf32>
    %532 = arith.subf %522, %531 : vector<16x80xf32>
    %533 = arith.mulf %530, %532 : vector<16x80xf32>
    %cst_169 = arith.constant dense<0.000000e+00> : vector<80xf32>
    %534 = vector.multi_reduction <add>, %533, %cst_169 [0] : vector<16x80xf32> to vector<80xf32>
    %535 = vector.shape_cast %534 : vector<80xf32> to vector<1x80xf32>
    %cst_170 = arith.constant 1.600000e+01 : f32
    %536 = vector.broadcast %cst_170 : f32 to vector<1x80xf32>
    %537 = arith.divf %535, %536 : vector<1x80xf32>
    %538 = vector.broadcast %528 : vector<1x80xf32> to vector<16x80xf32>
    %539 = arith.subf %522, %538 : vector<16x80xf32>
    %cst_171 = arith.constant 9.99999974E-6 : f32
    %540 = vector.broadcast %cst_171 : f32 to vector<1x80xf32>
    %541 = arith.addf %537, %540 : vector<1x80xf32>
    %542 = math.rsqrt %541 : vector<1x80xf32>
    %543 = vector.broadcast %542 : vector<1x80xf32> to vector<16x80xf32>
    %544 = arith.mulf %539, %543 : vector<16x80xf32>
    %545 = vector.broadcast %523 : vector<1x80xf32> to vector<16x80xf32>
    %546 = arith.mulf %544, %545 : vector<16x80xf32>
    %547 = vector.broadcast %524 : vector<1x80xf32> to vector<16x80xf32>
    %548 = arith.addf %546, %547 : vector<16x80xf32>
    %cst_172 = arith.constant 0.000000e+00 : f32
    %549 = vector.broadcast %cst_172 : f32 to vector<16x80xf32>
    %550 = arith.maximumf %548, %549 : vector<16x80xf32>
    %cst_173 = arith.constant dense<0.000000e+00> : vector<16x8xf32>
    %551 = tpu.matmul %550, %513, %cst_173 {dimension_numbers = #tpu.dot_dimension_numbers<[1], [0], [0], [1], [0, 0, 1, 1], [], []>} : vector<16x80xf32>, vector<80x8xf32>, vector<16x8xf32> -> vector<16x8xf32>
    %552 = vector.extract_strided_slice %514 {offsets = [4, 0], sizes = [1, 8], strides = [1, 1]} : vector<5x80xf32> to vector<1x8xf32>
    %553 = vector.broadcast %552 : vector<1x8xf32> to vector<16x8xf32>
    %554 = arith.addf %551, %553 : vector<16x8xf32>
    %c0_174 = arith.constant 0 : index
    %c0_175 = arith.constant 0 : index
    %555 = vector.load %arg4[%c0_174, %c0_175] : memref<16x32xf32, #tpu.memory_space<vmem>>, vector<16x24xf32>
    tpu.vector_store %arg4[%c0_174, %c0_175], %518 {strides = array<i32>} : memref<16x32xf32, #tpu.memory_space<vmem>>, vector<16x24xf32>,
    %c0_176 = arith.constant 0 : index
    %c24 = arith.constant 24 : index
    %556 = vector.load %arg4[%c0_176, %c24] : memref<16x32xf32, #tpu.memory_space<vmem>>, vector<16x8xf32>
    tpu.vector_store %arg4[%c0_176, %c24], %554 {strides = array<i32>} : memref<16x32xf32, #tpu.memory_space<vmem>>, vector<16x8xf32>,
    return
  }
}

</mosaic_0001>

<bundles_post_ra>
// kernel: forward.1
= control target key start
LH: loop header
LB: loop body
LE: loop exit
PB: predicated region body
PF: predicated region fallthrough
CT: control target
= control target key end

     0   :  { %vm36_vm0 = vcmask 261120   ;;  %v28_v3 = vlaneseq  ;;  %v3781_v4 = vmov 0.0|0.0   ;;  %vm3782_vm1 = vmmov 0   ;;  %s3784_s11 = smov 64   ;;  %s4718_s1 = inlined_call_operand.vmem [shape: f32[144,96], index: 1, kind: input, shape index: {}]   ;;  %s4719_s0 = inlined_call_operand.vmem [shape: f32[16,32], index: 0, kind: input, shape index: {}]   ;;  %s4720_s2 = inlined_call_operand.vmem [shape: f32[40,736], index: 2, kind: input, shape index: {}]   ;;  %s4721_s3 = inlined_call_operand.vmem [shape: f32[824,80], index: 3, kind: input, shape index: {}]   ;;  %s4722_s4 = inlined_call_operand.vmem [shape: f32[16,32], index: 4, kind: output, shape index: {}]  }
   0x1   :  { %v19_v0 = vld [vmem:[%s4718_s1] sm:$0xff]  ;;  %v20_v1 = vld [vmem:[%s4718_s1 + $0x8] sm:$0xff]  ;;  %v21_v2 = vld [vmem:[%s4718_s1 + $0x10] sm:$0xff]  ;;  %3421 = vmatprep.subr.bf16.mxu0 %v3781_v4  ;;  %v3783_v5 = vmov 0.0   ;;  %vm118_vm2 = vcmask 779264   ;;  %vm121_vm3 = vcmask 781314  }
   0x2   :  { %3197 = vmatprep.mubr.msk.f32.mxu0 %vm3782_vm1, %v3783_v5  ;;  %v3407_v6 = vpack.c.bf16 %v20_v1, %v19_v0  ;;  %v22_v7 = vld [vmem:[%s4718_s1 + $0x18] sm:$0xff]  ;;  %v17_v8 = vld [vmem:[%s4719_s0] sm:$0xff]  ;;  %v24_v11 = vld [vmem:[%s4718_s1 + $0x28] sm:$0xff]  ;;  %v3837_v12 = vshrl.u32 %v28_v3, 7  ;;  %vm124_vm4 = vcmask 783364   ;;  %vm127_vm5 = vcmask 785414  }
   0x3   :  { %v3411_v9 = vpack.c.bf16 %v22_v7, %v21_v2  ;;  %3175 = vmatprep.mubr.msk.f32.mxu1 %vm36_vm0, %v17_v8  ;;  %v23_v10 = vld [vmem:[%s4718_s1 + $0x20] sm:$0xff]  ;;  %v25_v15 = vld [vmem:[%s4718_s1 + $0x30] sm:$0xff]  ;;  %v26_v16 = vld [vmem:[%s4718_s1 + $0x38] sm:$0xff]  ;;  %vm976_vm6 = vcmask 1041408   ;;  %vm978_vm7 = vcmask 1043456   ;;  %vm980_vm8 = vcmask 1045504  }
   0x4   :  { %3408 = vmatprep.subr.bf16.mxu1 %v3407_v6  ;;  %v3839_v13 = vpack.c.bf16 %v24_v11, %v23_v10  ;;  %v27_v14 = vld [vmem:[%s4718_s1 + $0x40] sm:$0x3]  ;;  %v3851_v17 = vsub.s32 1, %v3837_v12  ;;  %v3856_v19 = vpack.c.bf16 %v26_v16, %v25_v15  ;;  %v18_v20 = vld [vmem:[%s4719_s0 + $0x8] sm:$0xff]  ;;  %v3880_v21 = vsub.s32 0, %v3837_v12  ;;  %s3785_s0 = smov 96  }
   0x5   :  { %3410 = vmatpush3.bf16.msra.mxu1 %v3407_v6  ;;  %vm2315_vm9 = vcmask 523264   ;;  %vm2242_vm10 = vcmask 1048064   ;;  %vm2252_vm11 = vcmask 785408   ;;  %vm2913_vm12 = vcmask 195584  }
   0x6   :  { %3412 = vmatprep.subr.bf16.mxu1 %v3411_v9  ;;  %3423 = vmatpush3.bf16.msra.mxu0 %v3839_v13  ;;  %v31_v18 = vrot.slane %v27_v14, %v3851_v17  ;;  %v35_v22 = vrot.slane %v27_v14, %v3880_v21  ;;  %vm2785_vm13 = vcmask 654336   ;;  %vm2924_vm14 = vcmask 261312  }
   0x7   :  { %3424 = vmatprep.subr.bf16.mxu0 %v3781_v4 }
   0x8   :  { %219 = vrot.lane.b32.xlu0 %v31_v18, %s3784_s11 }
   0x9   :  { %3414 = vmatpush3.bf16.msra.mxu1 %v3411_v9 }
   0xa   :  { %3415 = vmatprep.subr.bf16.mxu1 %v3781_v4  ;;  %3426 = vmatpush3.bf16.msra.mxu0 %v3856_v19 }
   0xb   :  { %3433 = vmatprep.subr.bf16.mxu0 %v3781_v4 }
   0xc   :  { %3176 = vmatmul.mubr.msk.f32.vlgmr.msra.gmra.mrb[0].mxu1 %vm36_vm0, %v18_v20 }
   0xd   :  { %3417 = vmatpush3.bf16.msra.mxu1 %v3839_v13  ;;  %3186 = vmatprep.mubr.msk.f32.mxu1 %vm3782_vm1, %v3783_v5 }
   0xe   :  { %3418 = vmatprep.subr.bf16.mxu1 %v3781_v4 }
  0x11   :  { %3420 = vmatpush3.bf16.msra.mxu1 %v3856_v19 }
  0x12   :  { %3427 = vmatprep.subr.bf16.mxu1 %v3781_v4 }
  0x14   :  { %3187 = vmatmul.mubr.f32.vlgmr.msra.gmra.mrb[2].mxu1 %v3783_v5 }
  0x15   :  { %3429 = vmatpush3.bf16.msra.mxu1 %v3839_v13  ;;  %3208 = vmatprep.mubr.msk.f32.mxu1 %vm3782_vm1, %v3783_v5 }
  0x16   :  { %3430 = vmatprep.subr.bf16.mxu1 %v3781_v4 }
  0x19   :  { %3432 = vmatpush3.bf16.msra.mxu1 %v3856_v19 }
  0x1a   :  { %3439 = vmatprep.subr.bf16.mxu1 %v3781_v4 }
  0x7a   :  { %v3891_v27 = vpop.permute.xlu0 %219 }
  0xdf   :  { %v3177_v23 = vpop.f32.mrb[0].mxu1 }
  0xe0   :  { %v115_v24 = vadd.f32 %v3177_v23, %v35_v22  ;;  %v109_v25 = vpop.f32.mrb[1].mxu1 }
  0xe1   :  { %v110_v26 = vadd.f32 %v109_v25, %v35_v22 }
  0xe2   :  { %130 = vst.msk [vmem:[#allocation2 + $0x8] sm:$0x3] %vm118_vm2, %v115_v24 }
  0xe3   :  { %132 = vst.msk [vmem:[#allocation2 + $0x8] sm:$0xc] %vm121_vm3, %v115_v24  ;;  %122 = vst.msk [vmem:[#allocation2] sm:$0xc] %vm121_vm3, %v110_v26 }
  0xe4   :  { %134 = vst.msk [vmem:[#allocation2 + $0x8] sm:$0x30] %vm124_vm4, %v115_v24  ;;  %125 = vst.msk [vmem:[#allocation2] sm:$0x30] %vm124_vm4, %v110_v26 }
  0xe5   :  { %136 = vst.msk [vmem:[#allocation2 + $0x8] sm:$0xc0] %vm127_vm5, %v115_v24  ;;  %128 = vst.msk [vmem:[#allocation2] sm:$0xc0] %vm127_vm5, %v110_v26 }
  0xe6   :  { %119 = vst.msk [vmem:[#allocation2] sm:$0x3] %vm118_vm2, %v110_v26 }
  0xe7   :  { %v207_v28 = vpop.f32.mrb[2].mxu1 }
  0xe8   :  { %v222_v29 = vadd.f32 %v3891_v27, %v207_v28  ;;  %v3188_v30 = vpop.f32.mrb[3].mxu1 }
  0xea   :  { %224 = vrot.lane.b32.xlu0 %v222_v29, %s3784_s11  ;;  %v242_v51 = vld [vmem:[#allocation2 + $0x2] sm:$0x3] }
  0xeb   :  { %v345_v9 = vld [vmem:[#allocation2 + $0x4] sm:$0x3] }
  0xed   :  { %v137_v31 = vld [vmem:[#allocation2] sm:$0x3] }
  0xee   :  { %v211_v32 = vadd.f32 %v207_v28, %v137_v31 }
  0xf0   :  { %v2933_v33 = vmul.f32 -1.442695, %v211_v32 }
  0xf2   :  { %3679 = vpow2.f32 %v2933_v33 }
  0xfc   :  { %v3680_v34 = vpop.eup %3679 }
  0xfd   :  { %v215_v35 = vadd.f32 1.0, %v3680_v34 }
  0xff   :  { %3681 = vrcp.f32 %v215_v35  ;;  %v448_v35 = vld [vmem:[#allocation2 + $0x6] sm:$0x3] }
 0x109   :  { %v3682_v36 = vpop.eup %3681 }
 0x10a   :  { %v234_v42 = vsub.f32 1.0, %v3682_v36  ;;  %v240_v44 = vmul.f32 0.0, %v3682_v36 }
 0x15c   :  { %v225_v37 = vpop.permute.xlu0 %224 }
 0x15d   :  { %v227_v38 = vmul.f32 %v3682_v36, %v225_v37 }
 0x15f   :  { %229 = vrot.lane.b32.xlu1 %v227_v38, %s3784_s11 }
 0x1d1   :  { %v230_v39 = vpop.permute.xlu1 %229 }
 0x1d2   :  { %v232_v40 = vadd.f32 %v230_v39, %v137_v31 }
 0x1d4   :  { %3683 = vtanh.f32 %v232_v40 }
 0x1de   :  { %v3684_v41 = vpop.eup %3683 }
 0x1df   :  { %236 = vrot.lane.b32.xlu1 %v3684_v41, %s3785_s0 }
 0x251   :  { %v237_v43 = vpop.permute.xlu1 %236 }
 0x252   :  { %v239_v45 = vmul.f32 %v237_v43, %v234_v42 }
 0x254   :  { %v3897_v46 = vadd.f32 %v240_v44, %v239_v45 }
 0x256   :  { %244 = vrot.lane.b32.xlu0 %v3897_v46, %s3785_s0 }
 0x2c8   :  { %v245_v47 = vpop.permute.xlu0 %244 }
 0x2c9   :  { %3198 = vmatmul.mubr.msk.f32.vlgmr.msra.gmra.mrb[0].mxu0 %vm36_vm0, %v245_v47 }
 0x2ca   :  { %3435 = vmatpush3.bf16.msra.mxu0 %v3839_v13  ;;  %3219 = vmatprep.mubr.msk.f32.mxu0 %vm3782_vm1, %v3783_v5 }
 0x2cb   :  { %3436 = vmatprep.subr.bf16.mxu0 %v3781_v4 }
 0x2ce   :  { %3438 = vmatpush3.bf16.msra.mxu0 %v3856_v19 }
 0x2cf   :  { %3445 = vmatprep.subr.bf16.mxu0 %v3781_v4 }
 0x39c   :  { %v314_v48 = vpop.f32.mrb[0].mxu0 }
 0x39d   :  { %v325_v49 = vadd.f32 %v314_v48, %v3891_v27  ;;  %v3199_v50 = vpop.f32.mrb[1].mxu0  ;;  %v318_v52 = vadd.f32 %v314_v48, %v242_v51 }
 0x39f   :  { %327 = vrot.lane.b32.xlu1 %v325_v49, %s3784_s11  ;;  %v2935_v53 = vmul.f32 -1.442695, %v318_v52 }
 0x3a1   :  { %3685 = vpow2.f32 %v2935_v53 }
 0x3ab   :  { %v3686_v54 = vpop.eup %3685 }
 0x3ac   :  { %v322_v55 = vadd.f32 1.0, %v3686_v54 }
 0x3ae   :  { %3687 = vrcp.f32 %v322_v55 }
 0x3b8   :  { %v3688_v56 = vpop.eup %3687 }
 0x3b9   :  { %v337_v62 = vsub.f32 1.0, %v3688_v56  ;;  %v343_v0 = vmul.f32 %v3688_v56, %v3897_v46 }
 0x411   :  { %v328_v57 = vpop.permute.xlu1 %327 }
 0x412   :  { %v330_v58 = vmul.f32 %v3688_v56, %v328_v57  ;;  %v551_v56 = vld [vmem:[#allocation2 + $0x8] sm:$0x3] }
 0x414   :  { %332 = vrot.lane.b32.xlu0 %v330_v58, %s3784_s11 }
 0x486   :  { %v333_v59 = vpop.permute.xlu0 %332 }
 0x487   :  { %v335_v60 = vadd.f32 %v333_v59, %v242_v51 }
 0x489   :  { %3689 = vtanh.f32 %v335_v60 }
 0x493   :  { %v3690_v61 = vpop.eup %3689 }
 0x494   :  { %339 = vrot.lane.b32.xlu1 %v3690_v61, %s3785_s0 }
 0x506   :  { %v340_v63 = vpop.permute.xlu1 %339 }
 0x507   :  { %v342_v1 = vmul.f32 %v340_v63, %v337_v62 }
 0x509   :  { %v3913_v2 = vadd.f32 %v343_v0, %v342_v1 }
 0x50b   :  { %347 = vrot.lane.b32.xlu0 %v3913_v2, %s3785_s0 }
 0x57d   :  { %v348_v3 = vpop.permute.xlu0 %347 }
 0x57e   :  { %3209 = vmatmul.mubr.msk.f32.vlgmr.msra.gmra.mrb[4].mxu1 %vm36_vm0, %v348_v3 }
 0x57f   :  { %3441 = vmatpush3.bf16.msra.mxu1 %v3839_v13  ;;  %3230 = vmatprep.mubr.msk.f32.mxu1 %vm3782_vm1, %v3783_v5 }
 0x580   :  { %3442 = vmatprep.subr.bf16.mxu1 %v3781_v4 }
 0x583   :  { %3444 = vmatpush3.bf16.msra.mxu1 %v3856_v19 }
 0x584   :  { %3451 = vmatprep.subr.bf16.mxu1 %v3781_v4 }
 0x651   :  { %v417_v6 = vpop.f32.mrb[4].mxu1 }
 0x652   :  { %v428_v7 = vadd.f32 %v417_v6, %v3891_v27  ;;  %v3210_v8 = vpop.f32.mrb[5].mxu1  ;;  %v421_v10 = vadd.f32 %v417_v6, %v345_v9 }
 0x654   :  { %430 = vrot.lane.b32.xlu1 %v428_v7, %s3784_s11  ;;  %v2937_v11 = vmul.f32 -1.442695, %v421_v10 }
 0x656   :  { %3691 = vpow2.f32 %v2937_v11 }
 0x660   :  { %v3692_v14 = vpop.eup %3691 }
 0x661   :  { %v425_v15 = vadd.f32 1.0, %v3692_v14 }
 0x663   :  { %3693 = vrcp.f32 %v425_v15 }
 0x66d   :  { %v3694_v16 = vpop.eup %3693 }
 0x66e   :  { %v440_v25 = vsub.f32 1.0, %v3694_v16  ;;  %v446_v28 = vmul.f32 %v3694_v16, %v3913_v2 }
 0x6c6   :  { %v431_v18 = vpop.permute.xlu1 %430 }
 0x6c7   :  { %v433_v20 = vmul.f32 %v3694_v16, %v431_v18  ;;  %v654_v18 = vld [vmem:[#allocation2 + $0xa] sm:$0x3] }
 0x6c9   :  { %435 = vrot.lane.b32.xlu0 %v433_v20, %s3784_s11 }
 0x73b   :  { %v436_v22 = vpop.permute.xlu0 %435 }
 0x73c   :  { %v438_v23 = vadd.f32 %v436_v22, %v345_v9 }
 0x73e   :  { %3695 = vtanh.f32 %v438_v23 }
 0x748   :  { %v3696_v24 = vpop.eup %3695 }
 0x749   :  { %442 = vrot.lane.b32.xlu1 %v3696_v24, %s3785_s0 }
 0x7bb   :  { %v443_v26 = vpop.permute.xlu1 %442 }
 0x7bc   :  { %v445_v29 = vmul.f32 %v443_v26, %v440_v25 }
 0x7be   :  { %v3929_v30 = vadd.f32 %v446_v28, %v445_v29 }
 0x7c0   :  { %450 = vrot.lane.b32.xlu0 %v3929_v30, %s3785_s0 }
 0x832   :  { %v451_v31 = vpop.permute.xlu0 %450 }
 0x833   :  { %3220 = vmatmul.mubr.msk.f32.vlgmr.msra.gmra.mrb[2].mxu0 %vm36_vm0, %v451_v31 }
 0x834   :  { %3447 = vmatpush3.bf16.msra.mxu0 %v3839_v13  ;;  %3241 = vmatprep.mubr.msk.f32.mxu0 %vm3782_vm1, %v3783_v5 }
 0x835   :  { %3448 = vmatprep.subr.bf16.mxu0 %v3781_v4 }
 0x838   :  { %3450 = vmatpush3.bf16.msra.mxu0 %v3856_v19 }
 0x839   :  { %3457 = vmatprep.subr.bf16.mxu0 %v3781_v4 }
 0x906   :  { %v520_v32 = vpop.f32.mrb[2].mxu0 }
 0x907   :  { %v531_v33 = vadd.f32 %v520_v32, %v3891_v27  ;;  %v3221_v34 = vpop.f32.mrb[3].mxu0  ;;  %v524_v36 = vadd.f32 %v520_v32, %v448_v35 }
 0x909   :  { %533 = vrot.lane.b32.xlu1 %v531_v33, %s3784_s11  ;;  %v2939_v37 = vmul.f32 -1.442695, %v524_v36 }
 0x90b   :  { %3697 = vpow2.f32 %v2939_v37 }
 0x915   :  { %v3698_v38 = vpop.eup %3697 }
 0x916   :  { %v528_v39 = vadd.f32 1.0, %v3698_v38 }
 0x918   :  { %3699 = vrcp.f32 %v528_v39 }
 0x922   :  { %v3700_v40 = vpop.eup %3699 }
 0x923   :  { %v543_v47 = vsub.f32 1.0, %v3700_v40  ;;  %v549_v49 = vmul.f32 %v3700_v40, %v3929_v30 }
 0x97b   :  { %v534_v41 = vpop.permute.xlu1 %533 }
 0x97c   :  { %v536_v42 = vmul.f32 %v3700_v40, %v534_v41  ;;  %v757_v40 = vld [vmem:[#allocation2 + $0xc] sm:$0x3] }
 0x97e   :  { %538 = vrot.lane.b32.xlu0 %v536_v42, %s3784_s11 }
 0x9f0   :  { %v539_v43 = vpop.permute.xlu0 %538 }
 0x9f1   :  { %v541_v44 = vadd.f32 %v539_v43, %v448_v35 }
 0x9f3   :  { %3701 = vtanh.f32 %v541_v44 }
 0x9fd   :  { %v3702_v45 = vpop.eup %3701 }
 0x9fe   :  { %545 = vrot.lane.b32.xlu1 %v3702_v45, %s3785_s0 }
 0xa70   :  { %v546_v48 = vpop.permute.xlu1 %545 }
 0xa71   :  { %v548_v50 = vmul.f32 %v546_v48, %v543_v47 }
 0xa73   :  { %v3945_v51 = vadd.f32 %v549_v49, %v548_v50 }
 0xa75   :  { %553 = vrot.lane.b32.xlu0 %v3945_v51, %s3785_s0 }
 0xae7   :  { %v554_v52 = vpop.permute.xlu0 %553 }
 0xae8   :  { %3231 = vmatmul.mubr.msk.f32.vlgmr.msra.gmra.mrb[6].mxu1 %vm36_vm0, %v554_v52 }
 0xae9   :  { %3453 = vmatpush3.bf16.msra.mxu1 %v3839_v13  ;;  %3252 = vmatprep.mubr.msk.f32.mxu1 %vm3782_vm1, %v3783_v5 }
 0xaea   :  { %3454 = vmatprep.subr.bf16.mxu1 %v3781_v4 }
 0xaed   :  { %3456 = vmatpush3.bf16.msra.mxu1 %v3856_v19 }
 0xbbb   :  { %v623_v53 = vpop.f32.mrb[6].mxu1 }
 0xbbc   :  { %v634_v54 = vadd.f32 %v623_v53, %v3891_v27  ;;  %v3232_v55 = vpop.f32.mrb[7].mxu1  ;;  %v627_v57 = vadd.f32 %v623_v53, %v551_v56 }
 0xbbe   :  { %636 = vrot.lane.b32.xlu1 %v634_v54, %s3784_s11  ;;  %v2941_v58 = vmul.f32 -1.442695, %v627_v57 }
 0xbc0   :  { %3703 = vpow2.f32 %v2941_v58 }
 0xbca   :  { %v3704_v59 = vpop.eup %3703 }
 0xbcb   :  { %v631_v60 = vadd.f32 1.0, %v3704_v59 }
 0xbcd   :  { %3705 = vrcp.f32 %v631_v60 }
 0xbd7   :  { %v3706_v61 = vpop.eup %3705 }
 0xbd8   :  { %v646_v6 = vsub.f32 1.0, %v3706_v61  ;;  %v652_v8 = vmul.f32 %v3706_v61, %v3945_v51 }
 0xc30   :  { %v637_v62 = vpop.permute.xlu1 %636 }
 0xc31   :  { %v639_v63 = vmul.f32 %v3706_v61, %v637_v62  ;;  %v860_v62 = vld [vmem:[#allocation2 + $0xe] sm:$0x3] }
 0xc33   :  { %641 = vrot.lane.b32.xlu0 %v639_v63, %s3784_s11 }
 0xca5   :  { %v642_v0 = vpop.permute.xlu0 %641 }
 0xca6   :  { %v644_v1 = vadd.f32 %v642_v0, %v551_v56 }
 0xca8   :  { %3707 = vtanh.f32 %v644_v1 }
 0xcb2   :  { %v3708_v3 = vpop.eup %3707 }
 0xcb3   :  { %648 = vrot.lane.b32.xlu1 %v3708_v3, %s3785_s0 }
 0xd25   :  { %v649_v7 = vpop.permute.xlu1 %648 }
 0xd26   :  { %v651_v9 = vmul.f32 %v649_v7, %v646_v6  ;;  %v963_v7 = vrot.slane %v3913_v2, 6 }
 0xd28   :  { %v3960_v10 = vadd.f32 %v652_v8, %v651_v9  ;;  %v965_v9 = vrot.slane %v3929_v30, 4 }
 0xd2a   :  { %656 = vrot.lane.b32.xlu0 %v3960_v10, %s3785_s0 }
 0xd9c   :  { %v657_v11 = vpop.permute.xlu0 %656 }
 0xd9d   :  { %3242 = vmatmul.mubr.msk.f32.vlgmr.msra.gmra.mrb[4].mxu0 %vm36_vm0, %v657_v11 }
 0xd9e   :  { %3459 = vmatpush3.bf16.msra.mxu0 %v3839_v13  ;;  %3263 = vmatprep.mubr.msk.f32.mxu0 %vm3782_vm1, %v3783_v5 }
 0xd9f   :  { %3460 = vmatprep.subr.bf16.mxu0 %v3781_v4 }
 0xda2   :  { %3462 = vmatpush3.bf16.msra.mxu0 %v3856_v19 }
 0xda3   :  { %3471 = vmatprep.subr.bf16.mxu0 %v3781_v4 }
 0xe70   :  { %v726_v14 = vpop.f32.mrb[4].mxu0 }
 0xe71   :  { %v737_v15 = vadd.f32 %v726_v14, %v3891_v27  ;;  %v3243_v16 = vpop.f32.mrb[5].mxu0  ;;  %v730_v20 = vadd.f32 %v726_v14, %v654_v18  ;;  %v977_v14 = vsel %vm976_vm6, %v3897_v46, %v963_v7  ;;  %v990_v46 = vld [vmem:[%s4718_s1 + $0x70] sm:$0xff] }
 0xe73   :  { %739 = vrot.lane.b32.xlu1 %v737_v15, %s3784_s11  ;;  %v2943_v22 = vmul.f32 -1.442695, %v730_v20  ;;  %v979_v15 = vsel %vm978_vm7, %v977_v14, %v965_v9  ;;  %v991_v20 = vld [vmem:[%s4718_s1 + $0x78] sm:$0xff] }
 0xe75   :  { %3709 = vpow2.f32 %v2943_v22 }
 0xe7f   :  { %v3710_v13 = vpop.eup %3709 }
 0xe80   :  { %v734_v23 = vadd.f32 1.0, %v3710_v13  ;;  %v992_v13 = vld [vmem:[%s4718_s1 + $0x80] sm:$0xff] }
 0xe82   :  { %3711 = vrcp.f32 %v734_v23  ;;  %v985_v23 = vld [vmem:[%s4718_s1 + $0x48] sm:$0xff] }
 0xe8c   :  { %v3712_v24 = vpop.eup %3711 }
 0xe8d   :  { %v749_v31 = vsub.f32 1.0, %v3712_v24  ;;  %v755_v33 = vmul.f32 %v3712_v24, %v3960_v10 }
 0xee5   :  { %v740_v25 = vpop.permute.xlu1 %739 }
 0xee6   :  { %v742_v26 = vmul.f32 %v3712_v24, %v740_v25  ;;  %v986_v24 = vld [vmem:[%s4718_s1 + $0x50] sm:$0xff] }
 0xee7   :  { %v3463_v25 = vpack.c.bf16 %v986_v24, %v985_v23 }
 0xee8   :  { %744 = vrot.lane.b32.xlu0 %v742_v26, %s3784_s11  ;;  %v987_v26 = vld [vmem:[%s4718_s1 + $0x58] sm:$0xff] }
 0xee9   :  { %3464 = vmatprep.subr.bf16.mxu1 %v3463_v25 }
 0xf5a   :  { %v745_v19 = vpop.permute.xlu0 %744 }
 0xf5b   :  { %v747_v28 = vadd.f32 %v745_v19, %v654_v18  ;;  %v988_v19 = vld [vmem:[%s4718_s1 + $0x60] sm:$0xff] }
 0xf5d   :  { %3713 = vtanh.f32 %v747_v28  ;;  %v4032_v28 = vpack.c.bf16 %v992_v13, %v991_v20 }
 0xf67   :  { %v3714_v29 = vpop.eup %3713 }
 0xf68   :  { %751 = vrot.lane.b32.xlu1 %v3714_v29, %s3785_s0  ;;  %v3467_v29 = vpack.c.bf16 %v988_v19, %v987_v26 }
 0xfda   :  { %v752_v32 = vpop.permute.xlu1 %751 }
 0xfdb   :  { %v754_v34 = vmul.f32 %v752_v32, %v749_v31  ;;  %v993_v32 = vld [vmem:[%s4718_s1 + $0x88] sm:$0x3] }
 0xfdd   :  { %v3976_v35 = vadd.f32 %v755_v33, %v754_v34  ;;  %v997_v33 = vrot.slane %v993_v32, %v3851_v17 }
 0xfdf   :  { %759 = vrot.lane.b32.xlu0 %v3976_v35, %s3785_s0 }
0x1051   :  { %v760_v36 = vpop.permute.xlu0 %759 }
0x1052   :  { %3253 = vmatmul.mubr.msk.f32.vlgmr.msra.gmra.mrb[8].mxu1 %vm36_vm0, %v760_v36 }
0x1053   :  { %3466 = vmatpush3.bf16.msra.mxu1 %v3463_v25 }
0x1054   :  { %3468 = vmatprep.subr.bf16.mxu1 %v3467_v29 }
0x1057   :  { %3470 = vmatpush3.bf16.msra.mxu1 %v3467_v29 }
0x1058   :  { %3477 = vmatprep.subr.bf16.mxu1 %v3781_v4 }
0x1125   :  { %v829_v37 = vpop.f32.mrb[8].mxu1 }
0x1126   :  { %v840_v38 = vadd.f32 %v829_v37, %v3891_v27  ;;  %v3254_v39 = vpop.f32.mrb[9].mxu1  ;;  %v833_v41 = vadd.f32 %v829_v37, %v757_v40  ;;  %v969_v37 = vrot.slane %v3976_v35, 6 }
0x1128   :  { %842 = vrot.lane.b32.xlu1 %v840_v38, %s3784_s11  ;;  %v2945_v42 = vmul.f32 -1.442695, %v833_v41 }
0x112a   :  { %3715 = vpow2.f32 %v2945_v42 }
0x1134   :  { %v3716_v43 = vpop.eup %3715 }
0x1135   :  { %v837_v44 = vadd.f32 1.0, %v3716_v43  ;;  %v982_v43 = vsel %vm976_vm6, %v3960_v10, %v969_v37  ;;  %v1001_v10 = vrot.slane %v993_v32, %v3880_v21 }
0x1137   :  { %3717 = vrcp.f32 %v837_v44 }
0x1141   :  { %v3718_v45 = vpop.eup %3717 }
0x1142   :  { %v852_v53 = vsub.f32 1.0, %v3718_v45  ;;  %v858_v55 = vmul.f32 %v3718_v45, %v3976_v35 }
0x119a   :  { %v843_v47 = vpop.permute.xlu1 %842 }
0x119b   :  { %v845_v48 = vmul.f32 %v3718_v45, %v843_v47 }
0x119d   :  { %847 = vrot.lane.b32.xlu0 %v845_v48, %s3784_s11 }
0x120f   :  { %v848_v49 = vpop.permute.xlu0 %847 }
0x1210   :  { %v850_v50 = vadd.f32 %v848_v49, %v757_v40 }
0x1212   :  { %3719 = vtanh.f32 %v850_v50 }
0x121c   :  { %v3720_v52 = vpop.eup %3719 }
0x121d   :  { %854 = vrot.lane.b32.xlu1 %v3720_v52, %s3785_s0 }
0x128f   :  { %v855_v54 = vpop.permute.xlu1 %854 }
0x1290   :  { %v857_v56 = vmul.f32 %v855_v54, %v852_v53 }
0x1292   :  { %v3986_v57 = vadd.f32 %v858_v55, %v857_v56 }
0x1294   :  { %862 = vrot.lane.b32.xlu0 %v3986_v57, %s3785_s0  ;;  %v971_v40 = vrot.slane %v3986_v57, 4 }
0x1296   :  { %v983_v44 = vsel %vm978_vm7, %v982_v43, %v971_v40 }
0x1306   :  { %v863_v58 = vpop.permute.xlu0 %862 }
0x1307   :  { %3264 = vmatmul.mubr.msk.f32.vlgmr.msra.gmra.mrb[6].mxu0 %vm36_vm0, %v863_v58 }
0x1308   :  { %3285 = vmatprep.mubr.msk.f32.mxu0 %vm3782_vm1, %v3783_v5 }
0x13da   :  { %v932_v59 = vpop.f32.mrb[6].mxu0 }
0x13db   :  { %v943_v60 = vadd.f32 %v932_v59, %v3891_v27  ;;  %v3265_v61 = vpop.f32.mrb[7].mxu0  ;;  %v936_v63 = vadd.f32 %v932_v59, %v860_v62  ;;  %v967_v27 = vrot.slane %v3945_v51, 2  ;;  %v989_v51 = vld [vmem:[%s4718_s1 + $0x68] sm:$0xff] }
0x13dc   :  { %v4014_v22 = vpack.c.bf16 %v990_v46, %v989_v51 }
0x13dd   :  { %945 = vrot.lane.b32.xlu1 %v943_v60, %s3784_s11  ;;  %v2947_v0 = vmul.f32 -1.442695, %v936_v63  ;;  %v981_v16 = vsel %vm980_vm8, %v979_v15, %v967_v27 }
0x13de   :  { %3473 = vmatpush3.bf16.msra.mxu0 %v4014_v22 }
0x13df   :  { %3721 = vpow2.f32 %v2947_v0  ;;  %3474 = vmatprep.subr.bf16.mxu0 %v3781_v4 }
0x13e2   :  { %3476 = vmatpush3.bf16.msra.mxu0 %v4032_v28 }
0x13e3   :  { %3483 = vmatprep.subr.bf16.mxu0 %v3781_v4 }
0x13e5   :  { %3286 = vmatmul.mubr.f32.vlgmr.msra.gmra.mrb[8].mxu0 %v3783_v5 }
0x13e6   :  { %3485 = vmatpush3.bf16.msra.mxu0 %v4014_v22  ;;  %3307 = vmatprep.mubr.msk.f32.mxu0 %vm3782_vm1, %v3783_v5 }
0x13e7   :  { %3486 = vmatprep.subr.bf16.mxu0 %v3781_v4 }
0x13e9   :  { %v3722_v1 = vpop.eup %3721 }
0x13ea   :  { %v940_v3 = vadd.f32 1.0, %v3722_v1  ;;  %3488 = vmatpush3.bf16.msra.mxu0 %v4032_v28 }
0x13eb   :  { %3495 = vmatprep.subr.bf16.mxu0 %v3781_v4 }
0x13ec   :  { %3723 = vrcp.f32 %v940_v3 }
0x13f6   :  { %v3724_v6 = vpop.eup %3723 }
0x13f7   :  { %v955_v34 = vsub.f32 1.0, %v3724_v6  ;;  %v961_v38 = vmul.f32 %v3724_v6, %v3986_v57 }
0x144f   :  { %v946_v8 = vpop.permute.xlu1 %945 }
0x1450   :  { %v948_v11 = vmul.f32 %v3724_v6, %v946_v8 }
0x1452   :  { %950 = vrot.lane.b32.xlu0 %v948_v11, %s3784_s11 }
0x1456   :  { %1004 = vrot.lane.b32.xlu0 %v981_v16, %s3785_s0 }
0x145a   :  { %1174 = vrot.lane.b32.xlu0 %v997_v33, %s3784_s11 }
0x14b8   :  { %v1162_v47 = vpop.f32.mrb[8].mxu0 }
0x14b9   :  { %v3287_v48 = vpop.f32.mrb[9].mxu0 }
0x14c4   :  { %v951_v2 = vpop.permute.xlu0 %950 }
0x14c5   :  { %v953_v18 = vadd.f32 %v951_v2, %v860_v62 }
0x14c7   :  { %3725 = vtanh.f32 %v953_v18 }
0x14c8   :  { %v1005_v30 = vpop.permute.xlu0 %1004 }
0x14c9   :  { %3274 = vmatprep.mubr.msk.f32.mxu1 %vm36_vm0, %v1005_v30 }
0x14cc   :  { %v4059_v49 = vpop.permute.xlu0 %1174 }
0x14cd   :  { %v1177_v35 = vadd.f32 %v4059_v49, %v1162_v47 }
0x14d1   :  { %v3726_v31 = vpop.eup %3725 }
0x14d2   :  { %957 = vrot.lane.b32.xlu1 %v3726_v31, %s3785_s0 }
0x1544   :  { %v958_v36 = vpop.permute.xlu1 %957 }
0x1545   :  { %v960_v39 = vmul.f32 %v958_v36, %v955_v34 }
0x1547   :  { %v962_v41 = vadd.f32 %v961_v38, %v960_v39 }
0x1549   :  { %v974_v42 = vrot.slane %v962_v41, 2 }
0x154b   :  { %v984_v45 = vsel %vm980_vm8, %v983_v44, %v974_v42 }
0x154c   :  { %1006 = vrot.lane.b32.xlu1 %v984_v45, %s3785_s0 }
0x1550   :  { %1179 = vrot.lane.b32.xlu1 %v1177_v35, %s3784_s11 }
0x15be   :  { %v1007_v50 = vpop.permute.xlu1 %1006 }
0x15bf   :  { %3275 = vmatmul.mubr.msk.f32.vlgmr.msra.gmra.mrb[10].mxu1 %vm36_vm0, %v1007_v50 }
0x15c0   :  { %3479 = vmatpush3.bf16.msra.mxu1 %v4014_v22  ;;  %3296 = vmatprep.mubr.msk.f32.mxu1 %vm3782_vm1, %v3783_v5 }
0x15c1   :  { %3480 = vmatprep.subr.bf16.mxu1 %v3781_v4 }
0x15c2   :  { %v1180_v61 = vpop.permute.xlu1 %1179 }
0x15c4   :  { %3482 = vmatpush3.bf16.msra.mxu1 %v4032_v28 }
0x15c5   :  { %3489 = vmatprep.subr.bf16.mxu1 %v3781_v4 }
0x1692   :  { %v3276_v52 = vpop.f32.mrb[10].mxu1 }
0x1693   :  { %v1084_v53 = vadd.f32 %v3276_v52, %v1001_v10  ;;  %v1078_v54 = vpop.f32.mrb[11].mxu1 }
0x1694   :  { %v1079_v55 = vadd.f32 %v1078_v54, %v1001_v10 }
0x1695   :  { %1091 = vst.msk [vmem:[#allocation2 + $0x8] sm:$0x3] %vm118_vm2, %v1084_v53 }
0x1696   :  { %1092 = vst.msk [vmem:[#allocation2 + $0x8] sm:$0xc] %vm121_vm3, %v1084_v53  ;;  %1088 = vst.msk [vmem:[#allocation2] sm:$0xc] %vm121_vm3, %v1079_v55 }
0x1697   :  { %1093 = vst.msk [vmem:[#allocation2 + $0x8] sm:$0x30] %vm124_vm4, %v1084_v53  ;;  %1089 = vst.msk [vmem:[#allocation2] sm:$0x30] %vm124_vm4, %v1079_v55 }
0x1698   :  { %1094 = vst.msk [vmem:[#allocation2 + $0x8] sm:$0xc0] %vm127_vm5, %v1084_v53  ;;  %1090 = vst.msk [vmem:[#allocation2] sm:$0xc0] %vm127_vm5, %v1079_v55 }
0x1699   :  { %1087 = vst.msk [vmem:[#allocation2] sm:$0x3] %vm118_vm2, %v1079_v55 }
0x169d   :  { %v1197_v2 = vld [vmem:[#allocation2 + $0x2] sm:$0x3] }
0x169e   :  { %v1300_v39 = vld [vmem:[#allocation2 + $0x4] sm:$0x3] }
0x16a0   :  { %v1095_v56 = vld [vmem:[#allocation2] sm:$0x3] }
0x16a1   :  { %v1166_v57 = vadd.f32 %v1162_v47, %v1095_v56 }
0x16a3   :  { %v2950_v58 = vmul.f32 -1.442695, %v1166_v57 }
0x16a5   :  { %3727 = vpow2.f32 %v2950_v58 }
0x16af   :  { %v3728_v59 = vpop.eup %3727 }
0x16b0   :  { %v1170_v60 = vadd.f32 1.0, %v3728_v59 }
0x16b2   :  { %3729 = vrcp.f32 %v1170_v60  ;;  %v1403_v60 = vld [vmem:[#allocation2 + $0x6] sm:$0x3] }
0x16bc   :  { %v3730_v62 = vpop.eup %3729 }
0x16bd   :  { %v1182_v63 = vmul.f32 %v3730_v62, %v1180_v61  ;;  %v1189_v6 = vsub.f32 1.0, %v3730_v62  ;;  %v1195_v8 = vmul.f32 0.0, %v3730_v62 }
0x16bf   :  { %1184 = vrot.lane.b32.xlu0 %v1182_v63, %s3784_s11 }
0x1731   :  { %v1185_v0 = vpop.permute.xlu0 %1184 }
0x1732   :  { %v1187_v1 = vadd.f32 %v1185_v0, %v1095_v56 }
0x1734   :  { %3731 = vtanh.f32 %v1187_v1 }
0x173e   :  { %v3732_v3 = vpop.eup %3731 }
0x173f   :  { %1191 = vrot.lane.b32.xlu1 %v3732_v3, %s3785_s0 }
0x17b1   :  { %v1192_v7 = vpop.permute.xlu1 %1191 }
0x17b2   :  { %v1194_v9 = vmul.f32 %v1192_v7, %v1189_v6 }
0x17b4   :  { %v4081_v11 = vadd.f32 %v1195_v8, %v1194_v9 }
0x17b6   :  { %1199 = vrot.lane.b32.xlu0 %v4081_v11, %s3785_s0 }
0x1828   :  { %v1200_v27 = vpop.permute.xlu0 %1199 }
0x1829   :  { %3297 = vmatmul.mubr.msk.f32.vlgmr.msra.gmra.mrb[12].mxu1 %vm36_vm0, %v1200_v27 }
0x182a   :  { %3491 = vmatpush3.bf16.msra.mxu1 %v4014_v22  ;;  %3318 = vmatprep.mubr.msk.f32.mxu1 %vm3782_vm1, %v3783_v5 }
0x182b   :  { %3492 = vmatprep.subr.bf16.mxu1 %v3781_v4 }
0x182e   :  { %3494 = vmatpush3.bf16.msra.mxu1 %v4032_v28 }
0x182f   :  { %3501 = vmatprep.subr.bf16.mxu1 %v3781_v4 }
0x18fc   :  { %v1269_v14 = vpop.f32.mrb[12].mxu1 }
0x18fd   :  { %v1280_v15 = vadd.f32 %v1269_v14, %v4059_v49  ;;  %v3298_v16 = vpop.f32.mrb[13].mxu1  ;;  %v1273_v18 = vadd.f32 %v1269_v14, %v1197_v2 }
0x18ff   :  { %1282 = vrot.lane.b32.xlu1 %v1280_v15, %s3784_s11  ;;  %v2952_v30 = vmul.f32 -1.442695, %v1273_v18 }
0x1901   :  { %3733 = vpow2.f32 %v2952_v30 }
0x190b   :  { %v3734_v51 = vpop.eup %3733 }
0x190c   :  { %v1277_v46 = vadd.f32 1.0, %v3734_v51 }
0x190e   :  { %3735 = vrcp.f32 %v1277_v46 }
0x1918   :  { %v3736_v20 = vpop.eup %3735 }
0x1919   :  { %v1292_v19 = vsub.f32 1.0, %v3736_v20  ;;  %v1298_v31 = vmul.f32 %v3736_v20, %v4081_v11 }
0x1971   :  { %v1283_v13 = vpop.permute.xlu1 %1282 }
0x1972   :  { %v1285_v23 = vmul.f32 %v3736_v20, %v1283_v13  ;;  %v1506_v20 = vld [vmem:[#allocation2 + $0x8] sm:$0x3] }
0x1974   :  { %1287 = vrot.lane.b32.xlu0 %v1285_v23, %s3784_s11 }
0x19e6   :  { %v1288_v24 = vpop.permute.xlu0 %1287 }
0x19e7   :  { %v1290_v25 = vadd.f32 %v1288_v24, %v1197_v2 }
0x19e9   :  { %3737 = vtanh.f32 %v1290_v25 }
0x19f3   :  { %v3738_v26 = vpop.eup %3737 }
0x19f4   :  { %1294 = vrot.lane.b32.xlu1 %v3738_v26, %s3785_s0 }
0x1a66   :  { %v1295_v29 = vpop.permute.xlu1 %1294 }
0x1a67   :  { %v1297_v32 = vmul.f32 %v1295_v29, %v1292_v19 }
0x1a69   :  { %v4097_v33 = vadd.f32 %v1298_v31, %v1297_v32 }
0x1a6b   :  { %1302 = vrot.lane.b32.xlu0 %v4097_v33, %s3785_s0 }
0x1add   :  { %v1303_v34 = vpop.permute.xlu0 %1302 }
0x1ade   :  { %3308 = vmatmul.mubr.msk.f32.vlgmr.msra.gmra.mrb[10].mxu0 %vm36_vm0, %v1303_v34 }
0x1adf   :  { %3497 = vmatpush3.bf16.msra.mxu0 %v4014_v22  ;;  %3329 = vmatprep.mubr.msk.f32.mxu0 %vm3782_vm1, %v3783_v5 }
0x1ae0   :  { %3498 = vmatprep.subr.bf16.mxu0 %v3781_v4 }
0x1ae3   :  { %3500 = vmatpush3.bf16.msra.mxu0 %v4032_v28 }
0x1ae4   :  { %3507 = vmatprep.subr.bf16.mxu0 %v3781_v4 }
0x1bb1   :  { %v1372_v36 = vpop.f32.mrb[10].mxu0 }
0x1bb2   :  { %v1383_v37 = vadd.f32 %v1372_v36, %v4059_v49  ;;  %v3309_v38 = vpop.f32.mrb[11].mxu0  ;;  %v1376_v40 = vadd.f32 %v1372_v36, %v1300_v39 }
0x1bb4   :  { %1385 = vrot.lane.b32.xlu1 %v1383_v37, %s3784_s11  ;;  %v2954_v41 = vmul.f32 -1.442695, %v1376_v40 }
0x1bb6   :  { %3739 = vpow2.f32 %v2954_v41 }
0x1bc0   :  { %v3740_v42 = vpop.eup %3739 }
0x1bc1   :  { %v1380_v43 = vadd.f32 1.0, %v3740_v42 }
0x1bc3   :  { %3741 = vrcp.f32 %v1380_v43 }
0x1bcd   :  { %v3742_v44 = vpop.eup %3741 }
0x1bce   :  { %v1395_v10 = vsub.f32 1.0, %v3742_v44  ;;  %v1401_v53 = vmul.f32 %v3742_v44, %v4097_v33 }
0x1c26   :  { %v1386_v45 = vpop.permute.xlu1 %1385 }
0x1c27   :  { %v1388_v47 = vmul.f32 %v3742_v44, %v1386_v45  ;;  %v1609_v45 = vld [vmem:[#allocation2 + $0xa] sm:$0x3] }
0x1c29   :  { %1390 = vrot.lane.b32.xlu0 %v1388_v47, %s3784_s11 }
0x1c9b   :  { %v1391_v48 = vpop.permute.xlu0 %1390 }
0x1c9c   :  { %v1393_v35 = vadd.f32 %v1391_v48, %v1300_v39 }
0x1c9e   :  { %3743 = vtanh.f32 %v1393_v35 }
0x1ca8   :  { %v3744_v50 = vpop.eup %3743 }
0x1ca9   :  { %1397 = vrot.lane.b32.xlu1 %v3744_v50, %s3785_s0 }
0x1d1b   :  { %v1398_v52 = vpop.permute.xlu1 %1397 }
0x1d1c   :  { %v1400_v54 = vmul.f32 %v1398_v52, %v1395_v10 }
0x1d1e   :  { %v4113_v55 = vadd.f32 %v1401_v53, %v1400_v54 }
0x1d20   :  { %1405 = vrot.lane.b32.xlu0 %v4113_v55, %s3785_s0 }
0x1d92   :  { %v1406_v56 = vpop.permute.xlu0 %1405 }
0x1d93   :  { %3319 = vmatmul.mubr.msk.f32.vlgmr.msra.gmra.mrb[14].mxu1 %vm36_vm0, %v1406_v56 }
0x1d94   :  { %3503 = vmatpush3.bf16.msra.mxu1 %v4014_v22  ;;  %3340 = vmatprep.mubr.msk.f32.mxu1 %vm3782_vm1, %v3783_v5 }
0x1d95   :  { %3504 = vmatprep.subr.bf16.mxu1 %v3781_v4 }
0x1d98   :  { %3506 = vmatpush3.bf16.msra.mxu1 %v4032_v28 }
0x1d99   :  { %3513 = vmatprep.subr.bf16.mxu1 %v3781_v4 }
0x1e66   :  { %v1475_v57 = vpop.f32.mrb[14].mxu1 }
0x1e67   :  { %v1486_v58 = vadd.f32 %v1475_v57, %v4059_v49  ;;  %v3320_v59 = vpop.f32.mrb[15].mxu1  ;;  %v1479_v61 = vadd.f32 %v1475_v57, %v1403_v60 }
0x1e69   :  { %1488 = vrot.lane.b32.xlu1 %v1486_v58, %s3784_s11  ;;  %v2956_v62 = vmul.f32 -1.442695, %v1479_v61 }
0x1e6b   :  { %3745 = vpow2.f32 %v2956_v62 }
0x1e75   :  { %v3746_v63 = vpop.eup %3745 }
0x1e76   :  { %v1483_v0 = vadd.f32 1.0, %v3746_v63 }
0x1e78   :  { %3747 = vrcp.f32 %v1483_v0 }
0x1e82   :  { %v3748_v1 = vpop.eup %3747 }
0x1e83   :  { %v1498_v27 = vsub.f32 1.0, %v3748_v1  ;;  %v1504_v15 = vmul.f32 %v3748_v1, %v4113_v55 }
0x1edb   :  { %v1489_v3 = vpop.permute.xlu1 %1488 }
0x1edc   :  { %v1491_v6 = vmul.f32 %v3748_v1, %v1489_v3  ;;  %v1712_v1 = vld [vmem:[#allocation2 + $0xc] sm:$0x3] }
0x1ede   :  { %1493 = vrot.lane.b32.xlu0 %v1491_v6, %s3784_s11 }
0x1f50   :  { %v1494_v7 = vpop.permute.xlu0 %1493 }
0x1f51   :  { %v1496_v8 = vadd.f32 %v1494_v7, %v1403_v60 }
0x1f53   :  { %3749 = vtanh.f32 %v1496_v8 }
0x1f5d   :  { %v3750_v9 = vpop.eup %3749 }
0x1f5e   :  { %1500 = vrot.lane.b32.xlu1 %v3750_v9, %s3785_s0 }
0x1fd0   :  { %v1501_v14 = vpop.permute.xlu1 %1500 }
0x1fd1   :  { %v1503_v16 = vmul.f32 %v1501_v14, %v1498_v27 }
0x1fd3   :  { %v4129_v2 = vadd.f32 %v1504_v15, %v1503_v16 }
0x1fd5   :  { %1508 = vrot.lane.b32.xlu0 %v4129_v2, %s3785_s0 }
0x2047   :  { %v1509_v18 = vpop.permute.xlu0 %1508 }
0x2048   :  { %3330 = vmatmul.mubr.msk.f32.vlgmr.msra.gmra.mrb[12].mxu0 %vm36_vm0, %v1509_v18 }
0x2049   :  { %3509 = vmatpush3.bf16.msra.mxu0 %v4014_v22  ;;  %3351 = vmatprep.mubr.msk.f32.mxu0 %vm3782_vm1, %v3783_v5 }
0x204a   :  { %3510 = vmatprep.subr.bf16.mxu0 %v3781_v4 }
0x204d   :  { %3512 = vmatpush3.bf16.msra.mxu0 %v4032_v28 }
0x211b   :  { %v1578_v30 = vpop.f32.mrb[12].mxu0 }
0x211c   :  { %v1589_v51 = vadd.f32 %v1578_v30, %v4059_v49  ;;  %v3331_v46 = vpop.f32.mrb[13].mxu0  ;;  %v1582_v13 = vadd.f32 %v1578_v30, %v1506_v20 }
0x211e   :  { %1591 = vrot.lane.b32.xlu1 %v1589_v51, %s3784_s11  ;;  %v2958_v23 = vmul.f32 -1.442695, %v1582_v13 }
0x2120   :  { %3751 = vpow2.f32 %v2958_v23 }
0x212a   :  { %v3752_v24 = vpop.eup %3751 }
0x212b   :  { %v1586_v25 = vadd.f32 1.0, %v3752_v24  ;;  %v1938_v24 = vld [vmem:[%s4720_s2 + $0x8] sm:$0xff] }
0x212d   :  { %3753 = vrcp.f32 %v1586_v25  ;;  %v1944_v25 = vld [vmem:[%s4720_s2 + $0x38] sm:$0xff] }
0x2137   :  { %v3754_v26 = vpop.eup %3753 }
0x2138   :  { %v1601_v36 = vsub.f32 1.0, %v3754_v26  ;;  %v1607_v38 = vmul.f32 %v3754_v26, %v4129_v2 }
0x2190   :  { %v1592_v19 = vpop.permute.xlu1 %1591 }
0x2191   :  { %v1594_v29 = vmul.f32 %v3754_v26, %v1592_v19  ;;  %v1940_v26 = vld [vmem:[%s4720_s2 + $0x18] sm:$0xff]  ;;  %v3519_v19 = vpack.c.bf16 %v1944_v25, %v1938_v24  ;;  %v2350_v25 = vld [vmem:[%s4721_s3 + $0x10] sm:$0xff] }
0x2193   :  { %1596 = vrot.lane.b32.xlu0 %v1594_v29, %s3784_s11  ;;  %v1946_v29 = vld [vmem:[%s4720_s2 + $0x48] sm:$0xff]  ;;  %3520 = vmatprep.subr.bf16.mxu0 %v3519_v19  ;;  %v2368_v19 = vld [vmem:[%s4721_s3 + $0xa0] sm:$0xff] }
0x2205   :  { %v1597_v31 = vpop.permute.xlu0 %1596 }
0x2206   :  { %v1599_v32 = vadd.f32 %v1597_v31, %v1506_v20  ;;  %v1937_v31 = vld [vmem:[%s4720_s2] sm:$0xff] }
0x2208   :  { %3755 = vtanh.f32 %v1599_v32  ;;  %v1943_v32 = vld [vmem:[%s4720_s2 + $0x30] sm:$0xff] }
0x2212   :  { %v3756_v34 = vpop.eup %3755 }
0x2213   :  { %1603 = vrot.lane.b32.xlu1 %v3756_v34, %s3785_s0  ;;  %v3527_v34 = vpack.c.bf16 %v1946_v29, %v1940_v26  ;;  %v2351_v26 = vld [vmem:[%s4721_s3 + $0x18] sm:$0xff]  ;;  %v2369_v29 = vld [vmem:[%s4721_s3 + $0xa8] sm:$0xff] }
0x2285   :  { %v1604_v37 = vpop.permute.xlu1 %1603 }
0x2286   :  { %v1606_v39 = vmul.f32 %v1604_v37, %v1601_v36  ;;  %v3521_v36 = vpack.c.bf16 %v1943_v32, %v1937_v31  ;;  %v1939_v37 = vld [vmem:[%s4720_s2 + $0x10] sm:$0xff]  ;;  %v3549_v31 = vpack.c.bf16 %v2351_v26, %v2350_v25  ;;  %v3551_v32 = vpack.c.bf16 %v2369_v29, %v2368_v19 }
0x2288   :  { %v4144_v40 = vadd.f32 %v1607_v38, %v1606_v39  ;;  %v1945_v38 = vld [vmem:[%s4720_s2 + $0x40] sm:$0xff] }
0x228a   :  { %1611 = vrot.lane.b32.xlu0 %v4144_v40, %s3785_s0 }
0x22fc   :  { %v1612_v41 = vpop.permute.xlu0 %1611 }
0x22fd   :  { %3341 = vmatmul.mubr.msk.f32.vlgmr.msra.gmra.mrb[16].mxu1 %vm36_vm0, %v1612_v41  ;;  %v3529_v41 = vpack.c.bf16 %v1945_v38, %v1939_v37  ;;  %v2370_v37 = vld [vmem:[%s4721_s3 + $0xb0] sm:$0xff]  ;;  %v2371_v38 = vld [vmem:[%s4721_s3 + $0xb8] sm:$0xff] }
0x22fe   :  { %3515 = vmatpush3.bf16.msra.mxu1 %v4014_v22  ;;  %3362 = vmatprep.mubr.msk.f32.mxu1 %vm3782_vm1, %v3783_v5 }
0x22ff   :  { %3516 = vmatprep.subr.bf16.mxu1 %v3781_v4 }
0x2302   :  { %3518 = vmatpush3.bf16.msra.mxu1 %v4032_v28 }
0x2303   :  { %3528 = vmatprep.subr.bf16.mxu1 %v3527_v34  ;;  %v2352_v34 = vld [vmem:[%s4721_s3 + $0x20] sm:$0xff] }
0x23d0   :  { %v1681_v42 = vpop.f32.mrb[16].mxu1 }
0x23d1   :  { %v1692_v43 = vadd.f32 %v1681_v42, %v4059_v49  ;;  %v3342_v44 = vpop.f32.mrb[17].mxu1  ;;  %v1685_v47 = vadd.f32 %v1681_v42, %v1609_v45 }
0x23d2   :  { %v1815_v44 = vld [vmem:[#allocation2 + $0xe] sm:$0x3] }
0x23d3   :  { %1694 = vrot.lane.b32.xlu1 %v1692_v43, %s3784_s11  ;;  %v2960_v48 = vmul.f32 -1.442695, %v1685_v47 }
0x23d5   :  { %3757 = vpow2.f32 %v2960_v48 }
0x23df   :  { %v3758_v35 = vpop.eup %3757 }
0x23e0   :  { %v1689_v50 = vadd.f32 1.0, %v3758_v35 }
0x23e2   :  { %3759 = vrcp.f32 %v1689_v50  ;;  %v1950_v50 = vld [vmem:[%s4720_s2 + $0x68] sm:$0xff] }
0x23ec   :  { %v3760_v22 = vpop.eup %3759 }
0x23ed   :  { %v1704_v56 = vsub.f32 1.0, %v3760_v22  ;;  %v1710_v58 = vmul.f32 %v3760_v22, %v4144_v40 }
0x2445   :  { %v1695_v10 = vpop.permute.xlu1 %1694 }
0x2446   :  { %v1697_v52 = vmul.f32 %v3760_v22, %v1695_v10  ;;  %v1952_v22 = vld [vmem:[%s4720_s2 + $0x78] sm:$0xff] }
0x2448   :  { %1699 = vrot.lane.b32.xlu0 %v1697_v52, %s3784_s11  ;;  %v1958_v52 = vld [vmem:[%s4720_s2 + $0xa8] sm:$0xff] }
0x24ba   :  { %v1700_v53 = vpop.permute.xlu0 %1699 }
0x24bb   :  { %v1702_v28 = vadd.f32 %v1700_v53, %v1609_v45  ;;  %v1949_v53 = vld [vmem:[%s4720_s2 + $0x60] sm:$0xff] }
0x24bd   :  { %3761 = vtanh.f32 %v1702_v28  ;;  %v1955_v28 = vld [vmem:[%s4720_s2 + $0x90] sm:$0xff] }
0x24c7   :  { %v3762_v54 = vpop.eup %3761 }
0x24c8   :  { %1706 = vrot.lane.b32.xlu1 %v3762_v54, %s3785_s0  ;;  %v3531_v54 = vpack.c.bf16 %v1958_v52, %v1952_v22 }
0x253a   :  { %v1707_v57 = vpop.permute.xlu1 %1706 }
0x253b   :  { %v1709_v59 = vmul.f32 %v1707_v57, %v1704_v56  ;;  %v3525_v56 = vpack.c.bf16 %v1955_v28, %v1949_v53  ;;  %v1951_v57 = vld [vmem:[%s4720_s2 + $0x70] sm:$0xff]  ;;  %v2356_v53 = vld [vmem:[%s4721_s3 + $0x40] sm:$0xff]  ;;  %v2357_v28 = vld [vmem:[%s4721_s3 + $0x48] sm:$0xff] }
0x253d   :  { %v4159_v60 = vadd.f32 %v1710_v58, %v1709_v59  ;;  %v1957_v58 = vld [vmem:[%s4720_s2 + $0xa0] sm:$0xff] }
0x253e   :  { %v3533_v59 = vpack.c.bf16 %v1957_v58, %v1951_v57  ;;  %v3561_v57 = vpack.c.bf16 %v2357_v28, %v2356_v53  ;;  %v2381_v53 = vld [vmem:[%s4721_s3 + $0x108] sm:$0xff] }
0x253f   :  { %1714 = vrot.lane.b32.xlu0 %v4159_v60, %s3785_s0 }
0x25b1   :  { %v1715_v61 = vpop.permute.xlu0 %1714 }
0x25b2   :  { %3352 = vmatmul.mubr.msk.f32.vlgmr.msra.gmra.mrb[14].mxu0 %vm36_vm0, %v1715_v61 }
0x25b3   :  { %2065 = vmatprep.mubr.f32.mxu0 %v3783_v5  ;;  %3522 = vmatpush1.bf16.msra.mxu0 %v3521_v36  ;;  %v2353_v36 = vld [vmem:[%s4721_s3 + $0x28] sm:$0xff] }
0x2685   :  { %v1784_v62 = vpop.f32.mrb[14].mxu0 }
0x2686   :  { %v1795_v63 = vadd.f32 %v1784_v62, %v4059_v49  ;;  %v3353_v0 = vpop.f32.mrb[15].mxu0  ;;  %v1788_v3 = vadd.f32 %v1784_v62, %v1712_v1  ;;  %v1918_v62 = vrot.slane %v4097_v33, 6 }
0x2687   :  { %v1920_v0 = vrot.slane %v4113_v55, 4  ;;  %v1942_v55 = vld [vmem:[%s4720_s2 + $0x28] sm:$0xff] }
0x2688   :  { %1797 = vrot.lane.b32.xlu1 %v1795_v63, %s3784_s11  ;;  %v2962_v6 = vmul.f32 -1.442695, %v1788_v3  ;;  %v1922_v3 = vrot.slane %v4129_v2, 2  ;;  %v1948_v2 = vld [vmem:[%s4720_s2 + $0x58] sm:$0xff] }
0x268a   :  { %3763 = vpow2.f32 %v2962_v6  ;;  %v1931_v6 = vsel %vm976_vm6, %v4081_v11, %v1918_v62  ;;  %v2359_v62 = vld [vmem:[%s4721_s3 + $0x58] sm:$0xff] }
0x2694   :  { %v3764_v7 = vpop.eup %3763 }
0x2695   :  { %v1792_v8 = vadd.f32 1.0, %v3764_v7  ;;  %v1932_v7 = vsel %vm978_vm7, %v1931_v6, %v1920_v0  ;;  %v2377_v0 = vld [vmem:[%s4721_s3 + $0xe8] sm:$0xff]  ;;  %v2360_v6 = vld [vmem:[%s4721_s3 + $0x60] sm:$0xff] }
0x2697   :  { %3765 = vrcp.f32 %v1792_v8  ;;  %v1933_v8 = vsel %vm980_vm8, %v1932_v7, %v1922_v3  ;;  %v2361_v7 = vld [vmem:[%s4721_s3 + $0x68] sm:$0xff] }
0x26a1   :  { %v3766_v9 = vpop.eup %3765 }
0x26a2   :  { %v1807_v30 = vsub.f32 1.0, %v3766_v9  ;;  %v1813_v46 = vmul.f32 %v3766_v9, %v4159_v60 }
0x26fa   :  { %v1798_v27 = vpop.permute.xlu1 %1797 }
0x26fb   :  { %v1800_v14 = vmul.f32 %v3766_v9, %v1798_v27 }
0x26fd   :  { %1802 = vrot.lane.b32.xlu0 %v1800_v14, %s3784_s11  ;;  %v2364_v14 = vld [vmem:[%s4721_s3 + $0x80] sm:$0xff] }
0x276f   :  { %v1803_v15 = vpop.permute.xlu0 %1802 }
0x2770   :  { %v1805_v16 = vadd.f32 %v1803_v15, %v1712_v1  ;;  %v2365_v15 = vld [vmem:[%s4721_s3 + $0x88] sm:$0xff] }
0x2772   :  { %3767 = vtanh.f32 %v1805_v16  ;;  %v2348_v16 = vld [vmem:[%s4721_s3] sm:$0xff] }
0x277c   :  { %v3768_v18 = vpop.eup %3767 }
0x277d   :  { %1809 = vrot.lane.b32.xlu1 %v3768_v18, %s3785_s0  ;;  %v3535_v18 = vpack.c.bf16 %v1948_v2, %v1942_v55  ;;  %v2379_v2 = vld [vmem:[%s4721_s3 + $0xf8] sm:$0xff] }
0x27ef   :  { %v1810_v51 = vpop.permute.xlu1 %1809 }
0x27f0   :  { %v1812_v20 = vmul.f32 %v1810_v51, %v1807_v30  ;;  %v3543_v30 = vpack.c.bf16 %v2365_v15, %v2364_v14  ;;  %v2349_v51 = vld [vmem:[%s4721_s3 + $0x8] sm:$0xff]  ;;  %v2362_v14 = vld [vmem:[%s4721_s3 + $0x70] sm:$0xff]  ;;  %v2363_v15 = vld [vmem:[%s4721_s3 + $0x78] sm:$0xff] }
0x27f2   :  { %v4170_v13 = vadd.f32 %v1813_v46, %v1812_v20  ;;  %v2366_v46 = vld [vmem:[%s4721_s3 + $0x90] sm:$0xff]  ;;  %v2367_v20 = vld [vmem:[%s4721_s3 + $0x98] sm:$0xff] }
0x27f3   :  { %v3547_v24 = vpack.c.bf16 %v2367_v20, %v2366_v46 }
0x27f4   :  { %1817 = vrot.lane.b32.xlu0 %v4170_v13, %s3785_s0  ;;  %v1926_v19 = vrot.slane %v4170_v13, 4 }
0x2866   :  { %v1818_v23 = vpop.permute.xlu0 %1817 }
0x2867   :  { %3363 = vmatmul.mubr.msk.f32.vlgmr.msra.gmra.mrb[18].mxu1 %vm36_vm0, %v1818_v23  ;;  %v3545_v23 = vpack.c.bf16 %v2349_v51, %v2348_v16  ;;  %v2397_v51 = vld [vmem:[%s4721_s3 + $0x188] sm:$0xff] }
0x2868   :  { %2142 = vmatprep.mubr.f32.mxu1 %v3783_v5  ;;  %3530 = vmatpush1.bf16.msra.mxu1 %v3529_v41  ;;  %v3553_v41 = vpack.c.bf16 %v2353_v36, %v2352_v34 }
0x2869   :  { %3532 = vmatprep.subr.bf16.mxu1 %v3531_v54  ;;  %v2374_v54 = vld [vmem:[%s4721_s3 + $0xd0] sm:$0xff] }
0x286c   :  { %3534 = vmatpush1.bf16.msra.mxu1 %v3533_v59  ;;  %v2358_v59 = vld [vmem:[%s4721_s3 + $0x50] sm:$0xff] }
0x286d   :  { %3544 = vmatprep.subr.bf16.mxu1 %v3543_v30  ;;  %v2396_v30 = vld [vmem:[%s4721_s3 + $0x180] sm:$0xff] }
0x286e   :  { %v3575_v46 = vpack.c.bf16 %v2397_v51, %v2396_v30  ;;  %v2405_v30 = vld [vmem:[%s4721_s3 + $0x1c8] sm:$0xff] }
0x293a   :  { %v1887_v39 = vpop.f32.mrb[18].mxu1 }
0x293b   :  { %v1898_v42 = vadd.f32 %v1887_v39, %v4059_v49  ;;  %v3364_v43 = vpop.f32.mrb[19].mxu1  ;;  %v1891_v45 = vadd.f32 %v1887_v39, %v1815_v44  ;;  %v1956_v49 = vld [vmem:[%s4720_s2 + $0x98] sm:$0xff]  ;;  %v1941_v39 = vld [vmem:[%s4720_s2 + $0x20] sm:$0xff] }
0x293c   :  { %v3523_v10 = vpack.c.bf16 %v1956_v49, %v1950_v50  ;;  %v3555_v43 = vpack.c.bf16 %v2371_v38, %v2370_v37  ;;  %v2373_v50 = vld [vmem:[%s4721_s3 + $0xc8] sm:$0xff]  ;;  %v1960_v49 = vld [vmem:[%s4720_s2 + $0xb8] sm:$0xff]  ;;  %v2412_v38 = vld [vmem:[%s4721_s3 + $0x200] sm:$0xff] }
0x293d   :  { %1900 = vrot.lane.b32.xlu1 %v1898_v42, %s3784_s11  ;;  %v2964_v47 = vmul.f32 -1.442695, %v1891_v45  ;;  %v1947_v42 = vld [vmem:[%s4720_s2 + $0x50] sm:$0xff]  ;;  %v2355_v45 = vld [vmem:[%s4721_s3 + $0x38] sm:$0xff] }
0x293e   :  { %3524 = vmatprep.subr.bf16.mxu0 %v3523_v10 }
0x293f   :  { %3769 = vpow2.f32 %v2964_v47  ;;  %3526 = vmatpush1.bf16.msra.mxu0 %v3525_v56  ;;  %v3537_v47 = vpack.c.bf16 %v1947_v42, %v1941_v39  ;;  %v2375_v56 = vld [vmem:[%s4721_s3 + $0xd8] sm:$0xff]  ;;  %v2413_v39 = vld [vmem:[%s4721_s3 + $0x208] sm:$0xff] }
0x2940   :  { %3536 = vmatprep.subr.bf16.mxu0 %v3535_v18  ;;  %v3563_v58 = vpack.c.bf16 %v2375_v56, %v2374_v54  ;;  %v3573_v18 = vpack.c.bf16 %v2363_v15, %v2362_v14  ;;  %v2386_v15 = vld [vmem:[%s4721_s3 + $0x130] sm:$0xff] }
0x2949   :  { %v3770_v48 = vpop.eup %3769 }
0x294a   :  { %v1895_v35 = vadd.f32 1.0, %v3770_v48  ;;  %v1954_v48 = vld [vmem:[%s4720_s2 + $0x88] sm:$0xff] }
0x294b   :  { %v3539_v22 = vpack.c.bf16 %v1960_v49, %v1954_v48 }
0x294c   :  { %3771 = vrcp.f32 %v1895_v35  ;;  %v2372_v35 = vld [vmem:[%s4721_s3 + $0xc0] sm:$0xff] }
0x294d   :  { %v3559_v52 = vpack.c.bf16 %v2373_v50, %v2372_v35 }
0x2956   :  { %v4226_v61 = vpop.eup %3771 }
0x2957   :  { %v1910_v20 = vsub.f32 1.0, %v4226_v61  ;;  %v1916_v25 = vmul.f32 %v4226_v61, %v4170_v13 }
0x29af   :  { %v1901_v63 = vpop.permute.xlu1 %1900 }
0x29b0   :  { %v1903_v1 = vmul.f32 %v4226_v61, %v1901_v63  ;;  %v2376_v63 = vld [vmem:[%s4721_s3 + $0xe0] sm:$0xff]  ;;  %v1962_v61 = vld [vmem:[%s4720_s2 + $0xc8] sm:$0x7] }
0x29b1   :  { %v3567_v3 = vpack.c.bf16 %v2377_v0, %v2376_v63  ;;  %v2308_v37 = vrot.slane %v1962_v61, %v3851_v17  ;;  %v4409_v35 = vrot.slane %v1962_v61, %v3880_v21  ;;  %v2382_v0 = vld [vmem:[%s4721_s3 + $0x110] sm:$0xff] }
0x29b2   :  { %1905 = vrot.lane.b32.xlu0 %v1903_v1, %s3784_s11  ;;  %v3565_v1 = vpack.c.bf16 %v2359_v62, %v2358_v59 }
0x29b6   :  { %1993 = vrot.lane.b32.xlu0 %v1933_v8, %s3785_s0  ;;  %v3569_v8 = vpack.c.bf16 %v2361_v7, %v2360_v6  ;;  %v2400_v6 = vld [vmem:[%s4721_s3 + $0x1a0] sm:$0xff]  ;;  %v2401_v7 = vld [vmem:[%s4721_s3 + $0x1a8] sm:$0xff] }
0x2a24   :  { %v1906_v9 = vpop.permute.xlu0 %1905 }
0x2a25   :  { %v1908_v33 = vadd.f32 %v1906_v9, %v1815_v44  ;;  %v2354_v44 = vld [vmem:[%s4721_s3 + $0x30] sm:$0xff]  ;;  %v1953_v9 = vld [vmem:[%s4720_s2 + $0x80] sm:$0xff] }
0x2a26   :  { %v3557_v10 = vpack.c.bf16 %v2355_v45, %v2354_v44 }
0x2a27   :  { %3773 = vtanh.f32 %v1908_v33  ;;  %v1959_v33 = vld [vmem:[%s4720_s2 + $0xb0] sm:$0xff] }
0x2a28   :  { %v4238_v27 = vpop.permute.xlu0 %1993  ;;  %v3541_v55 = vpack.c.bf16 %v1959_v33, %v1953_v9  ;;  %v3583_v9 = vpack.c.bf16 %v2401_v7, %v2400_v6  ;;  %v2384_v33 = vld [vmem:[%s4721_s3 + $0x120] sm:$0xff] }
0x2a29   :  { %2965 = vmatmul.mubr.msk.f32.vlgmr.msra.gmra.mrb[16].mxu0 %vm36_vm0, %v4238_v27  ;;  %2967 = vmatmul.mubr.msk.f32.vlgmr.msra.gmra.mrb[20].mxu1 %vm36_vm0, %v4238_v27  ;;  %v2424_v7 = vld [vmem:[%s4721_s3 + $0x260] sm:$0xff] }
0x2a2a   :  { %2071 = vmatprep.mubr.f32.mxu0 %v3783_v5  ;;  %2148 = vmatprep.mubr.f32.mxu1 %v3783_v5 }
0x2a2b   :  { %3546 = vmatpush3.bf16.msra.mxu1 %v3545_v23  ;;  %3538 = vmatpush1.bf16.msra.mxu0 %v3537_v47 }
0x2a2c   :  { %3548 = vmatprep.subr.bf16.mxu1 %v3547_v24  ;;  %3540 = vmatprep.subr.bf16.mxu0 %v3539_v22  ;;  %v1924_v24 = vrot.slane %v4159_v60, 6  ;;  %v1961_v60 = vld [vmem:[%s4720_s2 + $0xc0] sm:$0x7]  ;;  %v1964_v22 = vld [vmem:[%s4720_s2 + $0xd8] sm:$0x7] }
0x2a2d   :  { %v2304_v13 = vrot.slane %v1961_v60, %v3851_v17  ;;  %v4412_v50 = vrot.slane %v1961_v60, %v3880_v21  ;;  %v4426_v54 = vrot.slane %v1964_v22, %v3880_v21 }
0x2a2f   :  { %3550 = vmatpush3.bf16.msra.mxu1 %v3549_v31  ;;  %3542 = vmatpush1.bf16.msra.mxu0 %v3541_v55 }
0x2a30   :  { %3552 = vmatprep.subr.bf16.mxu1 %v3551_v32  ;;  %3576 = vmatprep.subr.bf16.mxu0 %v3575_v46  ;;  %v1934_v32 = vsel %vm976_vm6, %v4144_v40, %v1924_v24  ;;  %v4392_v40 = vsub.s32 2, %v3837_v12  ;;  %v2406_v24 = vld [vmem:[%s4721_s3 + $0x1d0] sm:$0xff] }
0x2a31   :  { %v3774_v11 = vpop.eup %3773  ;;  %v1935_v34 = vsel %vm978_vm7, %v1934_v32, %v1926_v19  ;;  %2311 = vrot.lane.b32.xlu0 %v2304_v13, %s3784_s11  ;;  %v2408_v32 = vld [vmem:[%s4721_s3 + $0x1e0] sm:$0xff]  ;;  %v2393_v13 = vld [vmem:[%s4721_s3 + $0x168] sm:$0xff] }
0x2a32   :  { %1912 = vrot.lane.b32.xlu1 %v3774_v11, %s3785_s0  ;;  %v2378_v11 = vld [vmem:[%s4721_s3 + $0xf0] sm:$0xff]  ;;  %v2326_v42 = vrot.slane %v1961_v60, %v4392_v40 }
0x2a33   :  { %3554 = vmatpush3.bf16.msra.mxu1 %v3553_v41  ;;  %v3571_v16 = vpack.c.bf16 %v2379_v2, %v2378_v11  ;;  %v3607_v41 = vpack.c.bf16 %v2413_v39, %v2412_v38  ;;  %v2385_v11 = vld [vmem:[%s4721_s3 + $0x128] sm:$0xff]  ;;  %v2410_v38 = vld [vmem:[%s4721_s3 + $0x1f0] sm:$0xff]  ;;  %v2411_v39 = vld [vmem:[%s4721_s3 + $0x1f8] sm:$0xff] }
0x2a34   :  { %3556 = vmatprep.subr.bf16.mxu1 %v3555_v43  ;;  %v2330_v43 = vrot.slane %v1962_v61, %v4392_v40  ;;  %v3585_v2 = vpack.c.bf16 %v2385_v11, %v2384_v33  ;;  %v2392_v61 = vld [vmem:[%s4721_s3 + $0x160] sm:$0xff]  ;;  %v2426_v33 = vld [vmem:[%s4721_s3 + $0x270] sm:$0xff]  ;;  %v2427_v11 = vld [vmem:[%s4721_s3 + $0x278] sm:$0xff] }
0x2a35   :  { %2333 = vrot.lane.b32.xlu0 %v2326_v42, %s3784_s11 }
0x2a37   :  { %3558 = vmatpush3.bf16.msra.mxu1 %v3557_v10 }
0x2a38   :  { %3560 = vmatprep.subr.bf16.mxu1 %v3559_v52  ;;  %v2380_v52 = vld [vmem:[%s4721_s3 + $0x100] sm:$0xff] }
0x2a39   :  { %v3577_v59 = vpack.c.bf16 %v2381_v53, %v2380_v52  ;;  %v2415_v52 = vld [vmem:[%s4721_s3 + $0x218] sm:$0xff] }
0x2a3b   :  { %3562 = vmatpush3.bf16.msra.mxu1 %v3561_v57  ;;  %v2398_v57 = vld [vmem:[%s4721_s3 + $0x190] sm:$0xff] }
0x2a3c   :  { %3564 = vmatprep.subr.bf16.mxu1 %v3563_v58  ;;  %v2399_v58 = vld [vmem:[%s4721_s3 + $0x198] sm:$0xff] }
0x2a3d   :  { %v3579_v63 = vpack.c.bf16 %v2399_v58, %v2398_v57  ;;  %v2418_v57 = vld [vmem:[%s4721_s3 + $0x230] sm:$0xff]  ;;  %v2419_v58 = vld [vmem:[%s4721_s3 + $0x238] sm:$0xff] }
0x2a3f   :  { %3566 = vmatpush3.bf16.msra.mxu1 %v3565_v1  ;;  %v2383_v1 = vld [vmem:[%s4721_s3 + $0x118] sm:$0xff] }
0x2a40   :  { %3568 = vmatprep.subr.bf16.mxu1 %v3567_v3 }
0x2a43   :  { %3570 = vmatpush3.bf16.msra.mxu1 %v3569_v8  ;;  %v3581_v8 = vpack.c.bf16 %v2383_v1, %v2382_v0  ;;  %v2422_v0 = vld [vmem:[%s4721_s3 + $0x250] sm:$0xff] }
0x2a44   :  { %3572 = vmatprep.subr.bf16.mxu1 %v3571_v16  ;;  %v2387_v16 = vld [vmem:[%s4721_s3 + $0x138] sm:$0xff] }
0x2a45   :  { %v3589_v51 = vpack.c.bf16 %v2387_v16, %v2386_v15  ;;  %v2431_v15 = vld [vmem:[%s4721_s3 + $0x298] sm:$0xff] }
0x2a47   :  { %3574 = vmatpush3.bf16.msra.mxu1 %v3573_v18  ;;  %v2404_v18 = vld [vmem:[%s4721_s3 + $0x1c0] sm:$0xff] }
0x2a48   :  { %3608 = vmatprep.subr.bf16.mxu1 %v3607_v41  ;;  %v3591_v46 = vpack.c.bf16 %v2405_v30, %v2404_v18  ;;  %v2432_v18 = vld [vmem:[%s4721_s3 + $0x2a0] sm:$0xff]  ;;  %v2433_v30 = vld [vmem:[%s4721_s3 + $0x2a8] sm:$0xff] }
0x2aa4   :  { %v1913_v23 = vpop.permute.xlu1 %1912 }
0x2aa5   :  { %v1915_v26 = vmul.f32 %v1913_v23, %v1910_v20  ;;  %v2388_v20 = vld [vmem:[%s4721_s3 + $0x140] sm:$0xff]  ;;  %v2389_v23 = vld [vmem:[%s4721_s3 + $0x148] sm:$0xff] }
0x2aa7   :  { %v1917_v29 = vadd.f32 %v1916_v25, %v1915_v26  ;;  %v2407_v25 = vld [vmem:[%s4721_s3 + $0x1d8] sm:$0xff]  ;;  %v3593_v26 = vpack.c.bf16 %v2389_v23, %v2388_v20 }
0x2aa8   :  { %v3595_v19 = vpack.c.bf16 %v2407_v25, %v2406_v24  ;;  %v2435_v20 = vld [vmem:[%s4721_s3 + $0x2b8] sm:$0xff]  ;;  %v2436_v24 = vld [vmem:[%s4721_s3 + $0x2c0] sm:$0xff]  ;;  %v2437_v25 = vld [vmem:[%s4721_s3 + $0x2c8] sm:$0xff] }
0x2aa9   :  { %v1929_v31 = vrot.slane %v1917_v29, 2  ;;  %v2390_v29 = vld [vmem:[%s4721_s3 + $0x150] sm:$0xff] }
0x2aab   :  { %v1936_v36 = vsel %vm980_vm8, %v1935_v34, %v1929_v31  ;;  %v2391_v31 = vld [vmem:[%s4721_s3 + $0x158] sm:$0xff]  ;;  %v2409_v34 = vld [vmem:[%s4721_s3 + $0x1e8] sm:$0xff] }
0x2aac   :  { %1995 = vrot.lane.b32.xlu1 %v1936_v36, %s3785_s0  ;;  %v3597_v36 = vpack.c.bf16 %v2391_v31, %v2390_v29  ;;  %v3599_v60 = vpack.c.bf16 %v2409_v34, %v2408_v32  ;;  %v2439_v29 = vld [vmem:[%s4721_s3 + $0x2d8] sm:$0xff]  ;;  %v1965_v32 = vld [vmem:[%s4720_s2 + $0xe0] sm:$0x7] }
0x2ab0   :  { %2313 = vrot.lane.b32.xlu1 %v2308_v37, %s3784_s11  ;;  %v1963_v37 = vld [vmem:[%s4720_s2 + $0xd0] sm:$0x7] }
0x2ab1   :  { %v4518_v42 = vrot.slane %v1963_v37, %v3880_v21 }
0x2ab4   :  { %2335 = vrot.lane.b32.xlu1 %v2330_v43, %s3784_s11  ;;  %v3603_v43 = vpack.c.bf16 %v2411_v39, %v2410_v38  ;;  %v1986_v38 = vrot.slane %v1965_v32, %v3880_v21  ;;  %v1966_v39 = vld [vmem:[%s4720_s2 + $0xe8] sm:$0x7] }
0x2afc   :  { %v2067_v44 = vpop.f32.mrb[16].mxu0  ;;  %v4406_v45 = vpop.f32.mrb[20].mxu1 }
0x2afd   :  { %v2069_v47 = vpop.f32.mrb[17].mxu0  ;;  %v2146_v48 = vpop.f32.mrb[21].mxu1  ;;  %v2068_v10 = vadd.f32 %v2067_v44, %v4412_v50  ;;  %v2394_v44 = vld [vmem:[%s4721_s3 + $0x170] sm:$0xff] }
0x2afe   :  { %v2070_v49 = vadd.f32 %v2069_v47, %v4409_v35  ;;  %v2147_v3 = vadd.f32 %v2146_v48, %v4426_v54  ;;  %v2395_v47 = vld [vmem:[%s4721_s3 + $0x178] sm:$0xff] }
0x2aff   :  { %v2232_v62 = vmax.f32 %v2068_v10, 0.0  ;;  %v3605_v48 = vpack.c.bf16 %v2395_v47, %v2394_v44  ;;  %v2414_v10 = vld [vmem:[%s4721_s3 + $0x210] sm:$0xff] }
0x2b00   :  { %v2233_v28 = vmax.f32 %v2070_v49, 0.0  ;;  %v2235_v55 = vmax.f32 %v2147_v3, 0.0  ;;  %v2145_v49 = vadd.f32 %v4406_v45, %v4518_v42  ;;  %v3611_v53 = vpack.c.bf16 %v2415_v52, %v2414_v10  ;;  %v2416_v45 = vld [vmem:[%s4721_s3 + $0x220] sm:$0xff]  ;;  %v2423_v3 = vld [vmem:[%s4721_s3 + $0x258] sm:$0xff] }
0x2b01   :  { %v3627_v6 = vpack.c.bf16 %v2423_v3, %v2422_v0 }
0x2b02   :  { %v2234_v22 = vmax.f32 %v2145_v49, 0.0 }
0x2b1e   :  { %v1996_v56 = vpop.permute.xlu1 %1995 }
0x2b1f   :  { %2966 = vmatmul.mubr.msk.f32.gmra.mrb[18].mxu0 %vm36_vm0, %v1996_v56  ;;  %2968 = vmatmul.mubr.msk.f32.gmra.mrb[22].mxu1 %vm36_vm0, %v1996_v56 }
0x2b20   :  { %2525 = vmatprep.mubr.f32.mxu1 %v2233_v28  ;;  %2219 = vmatprep.mubr.f32.mxu0 %v3783_v5  ;;  %v2417_v28 = vld [vmem:[%s4721_s3 + $0x228] sm:$0xff] }
0x2b23   :  { %2969 = vmatmul.mubr.msk.f32.vlgmr.msra.gmra.mrb[20].mxu0 %vm36_vm0, %v4238_v27  ;;  %2526 = vmatmul.mubr.f32.vlgmr.msra.gmra.mrb[24].mxu1 %v2232_v62  ;;  %v2402_v27 = vld [vmem:[%s4721_s3 + $0x1b0] sm:$0xff]  ;;  %v2420_v62 = vld [vmem:[%s4721_s3 + $0x240] sm:$0xff] }
0x2b24   :  { %3578 = vmatpush3.bf16.msra.mxu0 %v3577_v59  ;;  %2225 = vmatprep.mubr.f32.mxu0 %v3783_v5  ;;  %v2403_v5 = vld [vmem:[%s4721_s3 + $0x1b8] sm:$0xff]  ;;  %v3619_v59 = vpack.c.bf16 %v2419_v58, %v2418_v57 }
0x2b25   :  { %3580 = vmatprep.subr.bf16.mxu0 %v3579_v63  ;;  %3610 = vmatpush3.bf16.msra.mxu1 %v3607_v41  ;;  %v3587_v14 = vpack.c.bf16 %v2403_v5, %v2402_v27  ;;  %v3601_v41 = vpack.c.bf16 %v2393_v13, %v2392_v61  ;;  %v2421_v63 = vld [vmem:[%s4721_s3 + $0x248] sm:$0xff]  ;;  %v2428_v27 = vld [vmem:[%s4721_s3 + $0x280] sm:$0xff] }
0x2b26   :  { %3612 = vmatprep.subr.bf16.mxu1 %v3611_v53  ;;  %v3624_v1 = vpack.c.bf16 %v2421_v63, %v2420_v62  ;;  %v2429_v5 = vld [vmem:[%s4721_s3 + $0x288] sm:$0xff] }
0x2b27   :  { %2970 = vmatmul.mubr.msk.f32.gmra.mrb[22].mxu0 %vm36_vm0, %v1996_v56  ;;  %v3615_v56 = vpack.c.bf16 %v2417_v28, %v2416_v45 }
0x2b28   :  { %3582 = vmatpush3.bf16.msra.mxu0 %v3581_v8  ;;  %2600 = vmatprep.mubr.f32.mxu0 %v2235_v55  ;;  %v2425_v8 = vld [vmem:[%s4721_s3 + $0x268] sm:$0xff]  ;;  %v3633_v55 = vpack.c.bf16 %v2427_v11, %v2426_v33 }
0x2b29   :  { %3584 = vmatprep.subr.bf16.mxu0 %v3583_v9  ;;  %3614 = vmatpush3.bf16.msra.mxu1 %v3611_v53  ;;  %v3630_v9 = vpack.c.bf16 %v2425_v8, %v2424_v7 }
0x2b2a   :  { %3616 = vmatprep.subr.bf16.mxu1 %v3615_v56 }
0x2b2c   :  { %3586 = vmatpush3.bf16.msra.mxu0 %v3585_v2  ;;  %v3636_v2 = vpack.c.bf16 %v2429_v5, %v2428_v27 }
0x2b2d   :  { %3588 = vmatprep.subr.bf16.mxu0 %v3587_v14  ;;  %3618 = vmatpush3.bf16.msra.mxu1 %v3615_v56  ;;  %v2430_v14 = vld [vmem:[%s4721_s3 + $0x290] sm:$0xff] }
0x2b2e   :  { %3620 = vmatprep.subr.bf16.mxu1 %v3619_v59  ;;  %v3639_v16 = vpack.c.bf16 %v2431_v15, %v2430_v14 }
0x2b30   :  { %3590 = vmatpush3.bf16.msra.mxu0 %v3589_v51  ;;  %v3642_v51 = vpack.c.bf16 %v2433_v30, %v2432_v18 }
0x2b31   :  { %3592 = vmatprep.subr.bf16.mxu0 %v3591_v46  ;;  %3622 = vmatpush3.bf16.msra.mxu1 %v3619_v59  ;;  %v2434_v46 = vld [vmem:[%s4721_s3 + $0x2b0] sm:$0xff] }
0x2b32   :  { %v3645_v23 = vpack.c.bf16 %v2435_v20, %v2434_v46 }
0x2b34   :  { %3594 = vmatpush3.bf16.msra.mxu0 %v3593_v26  ;;  %v3648_v26 = vpack.c.bf16 %v2437_v25, %v2436_v24  ;;  %v4637_v25 = vld [vmem:[%s4721_s3 + $0x330] sm:$0x1f] }
0x2b35   :  { %3596 = vmatprep.subr.bf16.mxu0 %v3595_v19  ;;  %v2438_v19 = vld [vmem:[%s4721_s3 + $0x2d0] sm:$0xff] }
0x2b36   :  { %v3651_v31 = vpack.c.bf16 %v2439_v29, %v2438_v19 }
0x2b38   :  { %3598 = vmatpush3.bf16.msra.mxu0 %v3597_v36 }
0x2b39   :  { %3600 = vmatprep.subr.bf16.mxu0 %v3599_v60 }
0x2b3c   :  { %3602 = vmatpush3.bf16.msra.mxu0 %v3601_v41 }
0x2b3d   :  { %3604 = vmatprep.subr.bf16.mxu0 %v3603_v43 }
0x2b40   :  { %3606 = vmatpush3.bf16.msra.mxu0 %v3605_v48 }
0x2b41   :  { %3623 = vmatprep.subr.bf16.mxu0 %v3781_v4 }
0x2b43   :  { %2601 = vmatmul.mubr.f32.vlgmr.msra.gmra.mrb[24].mxu0 %v2234_v22 }
0x2b44   :  { %3625 = vmatpush1.bf16.msra.mxu0 %v3624_v1 }
0x2b45   :  { %3626 = vmatprep.subr.bf16.mxu0 %v3781_v4 }
0x2b48   :  { %3628 = vmatpush1.bf16.msra.mxu0 %v3627_v6 }
0x2b49   :  { %3629 = vmatprep.subr.bf16.mxu0 %v3781_v4 }
0x2b4c   :  { %3631 = vmatpush1.bf16.msra.mxu0 %v3630_v9 }
0x2b4d   :  { %3632 = vmatprep.subr.bf16.mxu0 %v3781_v4 }
0x2b50   :  { %3634 = vmatpush1.bf16.msra.mxu0 %v3633_v55 }
0x2b51   :  { %3635 = vmatprep.subr.bf16.mxu0 %v3781_v4 }
0x2b54   :  { %3637 = vmatpush1.bf16.msra.mxu0 %v3636_v2 }
0x2b55   :  { %3638 = vmatprep.subr.bf16.mxu0 %v3781_v4 }
0x2b58   :  { %3640 = vmatpush1.bf16.msra.mxu0 %v3639_v16 }
0x2b59   :  { %3641 = vmatprep.subr.bf16.mxu0 %v3781_v4 }
0x2b5c   :  { %3643 = vmatpush1.bf16.msra.mxu0 %v3642_v51 }
0x2b5d   :  { %3644 = vmatprep.subr.bf16.mxu0 %v3781_v4 }
0x2b60   :  { %3646 = vmatpush1.bf16.msra.mxu0 %v3645_v23 }
0x2b61   :  { %3647 = vmatprep.subr.bf16.mxu0 %v3781_v4 }
0x2b64   :  { %3649 = vmatpush1.bf16.msra.mxu0 %v3648_v26 }
0x2b65   :  { %3650 = vmatprep.subr.bf16.mxu0 %v3781_v4 }
0x2b68   :  { %3652 = vmatpush1.bf16.msra.mxu0 %v3651_v31 }
0x2bf2   :  { %v2073_v34 = vpop.f32.mrb[18].mxu0  ;;  %v2150_v36 = vpop.f32.mrb[22].mxu1 }
0x2bf3   :  { %v2074_v60 = vadd.f32 %v2073_v34, %v4412_v50  ;;  %v2151_v61 = vadd.f32 %v2150_v36, %v4518_v42  ;;  %v2075_v13 = vpop.f32.mrb[19].mxu0  ;;  %v2152_v37 = vpop.f32.mrb[23].mxu1  ;;  %v1990_v50 = vrot.slane %v1966_v39, %v3880_v21 }
0x2bf4   :  { %v2076_v4 = vadd.f32 %v2075_v13, %v4409_v35  ;;  %v2153_v41 = vadd.f32 %v2152_v37, %v4426_v54 }
0x2bf5   :  { %v2237_v49 = vmax.f32 %v2074_v60, 0.0  ;;  %v2239_v42 = vmax.f32 %v2151_v61, 0.0  ;;  %v4645_v60 = vrot.slane %v4637_v25, %v3880_v21 }
0x2bf6   :  { %v2238_v43 = vmax.f32 %v2076_v4, 0.0  ;;  %v2240_v44 = vmax.f32 %v2153_v41, 0.0  ;;  %v2221_v47 = vpop.f32.mrb[20].mxu0  ;;  %v3101_v48 = vpop.f32.mrb[24].mxu1 }
0x2bf7   :  { %v2222_v22 = vadd.f32 %v2221_v47, %v1986_v38  ;;  %v2223_v10 = vpop.f32.mrb[21].mxu0  ;;  %v3102_v52 = vpop.f32.mrb[25].mxu1 }
0x2bf8   :  { %v3103_v53 = vadd.f32 %v3102_v52, %v3101_v48  ;;  %2530 = vmatprep.mubr.f32.mxu1 %v2238_v43  ;;  %2605 = vmatprep.mubr.f32.mxu0 %v2240_v44  ;;  %v2224_v35 = vadd.f32 %v2223_v10, %v1990_v50 }
0x2bf9   :  { %v2236_v45 = vmax.f32 %v2222_v22, 0.0  ;;  %2531 = vmatmul.mubr.f32.gmra.mrb[26].mxu1 %v2237_v49  ;;  %2606 = vmatmul.mubr.f32.gmra.mrb[26].mxu0 %v2239_v42  ;;  %v2243_v58 = vsel %vm2242_vm10, %v2222_v22, 0.0 }
0x2bfa   :  { %v2227_v54 = vpop.f32.mrb[22].mxu0  ;;  %v2253_v63 = vsel %vm2252_vm11, %v2224_v35, 0.0  ;;  %v2528_v41 = vadd.f32 %v3103_v53, %v4645_v60  ;;  %v2314_v53 = vpop.permute.xlu1 %2313 }
0x2bfb   :  { %v2228_v28 = vadd.f32 %v2227_v54, %v1986_v38  ;;  %v2229_v56 = vpop.f32.mrb[23].mxu0  ;;  %3381 = vmatprep.mubr.msk.f32.mxu1 %vm2315_vm9, %v2236_v45 }
0x2bfc   :  { %v2230_v57 = vadd.f32 %v2229_v56, %v1990_v50  ;;  %v2312_v56 = vpop.permute.xlu0 %2311 }
0x2bfd   :  { %v2241_v59 = vmax.f32 %v2228_v28, 0.0  ;;  %v2244_v62 = vsel %vm2242_vm10, %v2228_v28, 0.0 }
0x2bfe   :  { %v2245_v0 = vadd.f32 %v2244_v62, %v2243_v58  ;;  %v2254_v1 = vsel %vm2252_vm11, %v2230_v57, 0.0 }
0x2bff   :  { %v2255_v3 = vadd.f32 %v2254_v1, %v2253_v63  ;;  %3382 = vmatmul.mubr.msk.f32.vlgmr.msra.gmra.mrb[28].mxu1 %vm2315_vm9, %v2241_v59  ;;  %v2336_v59 = vpop.permute.xlu1 %2335 }
0x2c00   :  { %v2246_v6 = vrot.slane %v2245_v0, 4  ;;  %v2334_v58 = vpop.permute.xlu0 %2333 }
0x2c01   :  { %v2256_v7 = vrot.slane %v2255_v3, 4 }
0x2c02   :  { %v2247_v8 = vadd.f32 %v2246_v6, %v2245_v0 }
0x2c03   :  { %v2257_v9 = vadd.f32 %v2256_v7, %v2255_v3 }
0x2c04   :  { %v2248_v33 = vrot.slane %v2247_v8, 2 }
0x2c05   :  { %v2258_v11 = vrot.slane %v2257_v9, 2 }
0x2c06   :  { %v2249_v55 = vadd.f32 %v2248_v33, %v2247_v8  ;;  %v2316_v8 = vsel %vm2315_vm9, %v2312_v56, %v2314_v53 }
0x2c07   :  { %v2259_v27 = vadd.f32 %v2258_v11, %v2257_v9  ;;  %v2337_v9 = vsel %vm2315_vm9, %v2334_v58, %v2336_v59 }
0x2c08   :  { %v2250_v5 = vrot.slane %v2249_v55, 1 }
0x2c09   :  { %v2260_v2 = vrot.slane %v2259_v27, 1 }
0x2c0a   :  { %v2251_v14 = vadd.f32 %v2250_v5, %v2249_v55 }
0x2c0b   :  { %v2261_v15 = vadd.f32 %v2260_v2, %v2259_v27 }
0x2c0c   :  { %v2263_v16 = vmul.f32 0.0625, %v2251_v14 }
0x2c0d   :  { %v2264_v18 = vmul.f32 0.0625, %v2261_v15 }
0x2c0e   :  { %v2267_v30 = vsub.f32 %v2228_v28, %v2263_v16  ;;  %v2265_v51 = vsub.f32 %v2222_v22, %v2263_v16 }
0x2c0f   :  { %v2266_v46 = vsub.f32 %v2224_v35, %v2264_v18  ;;  %v2268_v20 = vsub.f32 %v2230_v57, %v2264_v18 }
0x2c10   :  { %v2271_v23 = vmul.f32 %v2267_v30, %v2267_v30  ;;  %v2269_v24 = vmul.f32 %v2265_v51, %v2265_v51 }
0x2c11   :  { %v2270_v26 = vmul.f32 %v2266_v46, %v2266_v46  ;;  %v2272_v19 = vmul.f32 %v2268_v20, %v2268_v20 }
0x2c12   :  { %v2274_v29 = vsel %vm2242_vm10, %v2271_v23, 0.0  ;;  %v2273_v31 = vsel %vm2242_vm10, %v2269_v24, 0.0 }
0x2c13   :  { %v2282_v32 = vsel %vm2252_vm11, %v2270_v26, 0.0  ;;  %v2283_v34 = vsel %vm2252_vm11, %v2272_v19, 0.0  ;;  %v2275_v36 = vadd.f32 %v2274_v29, %v2273_v31 }
0x2c14   :  { %v2284_v61 = vadd.f32 %v2283_v34, %v2282_v32 }
0x2c15   :  { %v2276_v13 = vrot.slane %v2275_v36, 4 }
0x2c16   :  { %v2285_v37 = vrot.slane %v2284_v61, 4  ;;  %v3139_v38 = vpop.f32.mrb[24].mxu0 }
0x2c17   :  { %v3140_v39 = vpop.f32.mrb[25].mxu0  ;;  %v2277_v4 = vadd.f32 %v2276_v13, %v2275_v36 }
0x2c18   :  { %v2286_v43 = vadd.f32 %v2285_v37, %v2284_v61  ;;  %v3141_v44 = vadd.f32 %v3140_v39, %v3139_v38 }
0x2c19   :  { %v2278_v47 = vrot.slane %v2277_v4, 2 }
0x2c1a   :  { %v2287_v48 = vrot.slane %v2286_v43, 2  ;;  %v4648_v50 = vadd.f32 %v3141_v44, %v2528_v41  ;;  %v2443_v44 = vld [vmem:[%s4721_s3 + $0x2f8] sm:$0xff] }
0x2c1b   :  { %v2279_v49 = vadd.f32 %v2278_v47, %v2277_v4  ;;  %v2440_v4 = vld [vmem:[%s4721_s3 + $0x2e0] sm:$0xff] }
0x2c1c   :  { %v2288_v42 = vadd.f32 %v2287_v48, %v2286_v43  ;;  %v2442_v43 = vld [vmem:[%s4721_s3 + $0x2f0] sm:$0xff]  ;;  %v2444_v48 = vld [vmem:[%s4721_s3 + $0x300] sm:$0xff] }
0x2c1d   :  { %v2280_v22 = vrot.slane %v2279_v49, 1  ;;  %v3657_v47 = vpack.c.bf16 %v2443_v44, %v2442_v43 }
0x2c1e   :  { %v2289_v10 = vrot.slane %v2288_v42, 1 }
0x2c1f   :  { %v2281_v21 = vadd.f32 %v2280_v22, %v2279_v49  ;;  %v2447_v22 = vld [vmem:[%s4721_s3 + $0x318] sm:$0xff] }
0x2c20   :  { %v2290_v52 = vadd.f32 %v2289_v10, %v2288_v42  ;;  %v2446_v42 = vld [vmem:[%s4721_s3 + $0x310] sm:$0xff] }
0x2c21   :  { %v2291_v45 = vmul.f32 0.0625, %v2281_v21  ;;  %v3665_v10 = vpack.c.bf16 %v2447_v22, %v2446_v42  ;;  %v2448_v21 = vld [vmem:[%s4721_s3 + $0x320] sm:$0xff] }
0x2c22   :  { %v2292_v35 = vmul.f32 0.0625, %v2290_v52  ;;  %v2449_v52 = vld [vmem:[%s4721_s3 + $0x328] sm:$0xff] }
0x2c23   :  { %v2293_v54 = vadd.f32 1e-05, %v2291_v45  ;;  %v3669_v45 = vpack.c.bf16 %v2449_v52, %v2448_v21 }
0x2c24   :  { %v2294_v28 = vadd.f32 1e-05, %v2292_v35  ;;  %v2689_v35 = vrot.slane %v4637_v25, %v3851_v17 }
0x2c25   :  { %3775 = vrsqrt.f32 %v2293_v54 }
0x2c26   :  { %3777 = vrsqrt.f32 %v2294_v28 }
0x2c2f   :  { %v3776_v57 = vpop.eup %3775 }
0x2c30   :  { %v3778_v62 = vpop.eup %3777  ;;  %v2297_v63 = vmul.f32 %v3776_v57, %v2265_v51  ;;  %v2299_v0 = vmul.f32 %v3776_v57, %v2267_v30 }
0x2c31   :  { %v2300_v1 = vmul.f32 %v3778_v62, %v2268_v20  ;;  %v2298_v3 = vmul.f32 %v3778_v62, %v2266_v46 }
0x2c32   :  { %v2319_v6 = vmul.f32 %v2312_v56, %v2297_v63  ;;  %v2321_v7 = vmul.f32 %v2312_v56, %v2299_v0 }
0x2c33   :  { %v2320_v33 = vmul.f32 %v2316_v8, %v2298_v3  ;;  %v2322_v11 = vmul.f32 %v2316_v8, %v2300_v1 }
0x2c34   :  { %v2340_v55 = vadd.f32 %v2334_v58, %v2319_v6  ;;  %v2342_v5 = vadd.f32 %v2334_v58, %v2321_v7 }
0x2c35   :  { %v2341_v27 = vadd.f32 %v2337_v9, %v2320_v33  ;;  %v2343_v14 = vadd.f32 %v2337_v9, %v2322_v11 }
0x2c36   :  { %v2344_v2 = vmax.f32 %v2340_v55, 0.0  ;;  %v2346_v16 = vmax.f32 %v2342_v5, 0.0 }
0x2c37   :  { %v2345_v15 = vmax.f32 %v2341_v27, 0.0  ;;  %v2347_v18 = vmax.f32 %v2343_v14, 0.0 }
0x2c38   :  { %2694 = vrot.lane.b32.xlu0 %v2344_v2, %s3784_s11 }
0x2c39   :  { %2696 = vrot.lane.b32.xlu1 %v2345_v15, %s3784_s11 }
0x2c3c   :  { %2698 = vrot.lane.b32.xlu0 %v2346_v16, %s3784_s11 }
0x2c3d   :  { %2700 = vrot.lane.b32.xlu1 %v2347_v18, %s3784_s11 }
0x2caa   :  { %v2695_v30 = vpop.permute.xlu0 %2694 }
0x2cab   :  { %v2697_v51 = vpop.permute.xlu1 %2696 }
0x2cac   :  { %v2702_v46 = vsel %vm2315_vm9, %v2695_v30, %v2697_v51  ;;  %2973 = vmatprep.mubr.msk.f32.mxu0 %vm36_vm0, %v2697_v51 }
0x2cad   :  { %2775 = vmatmul.mubr.f32.vlgmr.msra.gmra.mrb[28].mxu0 %v2702_v46 }
0x2cae   :  { %v2699_v20 = vpop.permute.xlu0 %2698 }
0x2caf   :  { %v2701_v23 = vpop.permute.xlu1 %2700 }
0x2cb0   :  { %2974 = vmatprep.mubr.msk.f32.mxu0 %vm36_vm0, %v2701_v23  ;;  %v2703_v24 = vsel %vm2315_vm9, %v2699_v20, %v2701_v23  ;;  %v2822_v23 = vsub.s32 3, %v3837_v12 }
0x2cb1   :  { %2780 = vmatmul.mubr.f32.gmra.mrb[30].mxu0 %v2703_v24  ;;  %v2817_v24 = vrot.slane %v4637_v25, %v4392_v40 }
0x2ccc   :  { %v3104_v26 = vpop.f32.mrb[26].mxu1  ;;  %v3142_v19 = vpop.f32.mrb[26].mxu0 }
0x2ccd   :  { %v3105_v29 = vpop.f32.mrb[27].mxu1  ;;  %v3143_v31 = vpop.f32.mrb[27].mxu0 }
0x2cce   :  { %v3106_v32 = vadd.f32 %v3105_v29, %v3104_v26  ;;  %v3144_v34 = vadd.f32 %v3143_v31, %v3142_v19  ;;  %v2823_v31 = vrot.slane %v4637_v25, %v2822_v23 }
0x2cd0   :  { %v2533_v36 = vadd.f32 %v3106_v32, %v4645_v60  ;;  %v2441_v60 = vld [vmem:[%s4721_s3 + $0x2e8] sm:$0xff] }
0x2cd1   :  { %v3653_v41 = vpack.c.bf16 %v2441_v60, %v2440_v4 }
0x2cd2   :  { %v2608_v61 = vadd.f32 %v3144_v34, %v2533_v36  ;;  %v3383_v13 = vpop.f32.mrb[28].mxu1 }
0x2cd3   :  { %v2677_v37 = vpop.f32.mrb[29].mxu1  ;;  %3654 = vmatprep.subr.bf16.mxu1 %v3653_v41 }
0x2cd4   :  { %v2683_v38 = vadd.f32 %v3383_v13, %v2608_v61  ;;  %v2678_v39 = vadd.f32 %v2677_v37, %v4648_v50  ;;  %3656 = vmatpush3.bf16.msra.mxu1 %v3653_v41  ;;  %v2445_v50 = vld [vmem:[%s4721_s3 + $0x308] sm:$0xff]  ;;  %s3786_s3 = smov 24  }
0x2cd5   :  { %3658 = vmatprep.subr.bf16.mxu1 %v3657_v47  ;;  %v3661_v49 = vpack.c.bf16 %v2445_v50, %v2444_v48 }
0x2cd6   :  { %2915 = vst.msk [vmem:[%s4722_s4 + $0x8] sm:$0xff] %vm2913_vm12, %v2683_v38  ;;  %2914 = vst.msk [vmem:[%s4722_s4] sm:$0xff] %vm2913_vm12, %v2678_v39  ;;  %v2830_v38 = vsub.s32 4, %v3837_v12 }
0x2cd8   :  { %3660 = vmatpush3.bf16.msra.mxu1 %v3657_v47  ;;  %v2831_v39 = vrot.slane %v4637_v25, %v2830_v38 }
0x2cd9   :  { %3662 = vmatprep.subr.bf16.mxu1 %v3661_v49 }
0x2cdc   :  { %3664 = vmatpush3.bf16.msra.mxu1 %v3661_v49 }
0x2cdd   :  { %3666 = vmatprep.subr.bf16.mxu1 %v3665_v10 }
0x2ce0   :  { %3668 = vmatpush3.bf16.msra.mxu1 %v3665_v10 }
0x2ce1   :  { %3670 = vmatprep.subr.bf16.mxu1 %v3669_v45 }
0x2ce4   :  { %3672 = vmatpush3.bf16.msra.mxu1 %v3669_v45 }
0x2d80   :  { %v2776_v54 = vpop.f32.mrb[28].mxu0 }
0x2d81   :  { %v2778_v28 = vpop.f32.mrb[29].mxu0  ;;  %v2777_v56 = vadd.f32 %v2776_v54, %v2689_v35 }
0x2d83   :  { %v2786_v59 = vsel %vm2785_vm13, %v2777_v56, 0.0 }
0x2d84   :  { %v2781_v53 = vpop.f32.mrb[30].mxu0 }
0x2d85   :  { %v2782_v57 = vadd.f32 %v2781_v53, %v2689_v35  ;;  %v2783_v58 = vpop.f32.mrb[31].mxu0 }
0x2d87   :  { %v2787_v62 = vsel %vm2785_vm13, %v2782_v57, 0.0 }
0x2d88   :  { %v2788_v63 = vadd.f32 %v2787_v62, %v2786_v59 }
0x2d8a   :  { %v2789_v0 = vrot.slane %v2788_v63, 4 }
0x2d8c   :  { %v2790_v1 = vadd.f32 %v2789_v0, %v2788_v63 }
0x2d8e   :  { %v2791_v3 = vrot.slane %v2790_v1, 2 }
0x2d90   :  { %v2792_v6 = vadd.f32 %v2791_v3, %v2790_v1 }
0x2d92   :  { %v2793_v7 = vrot.slane %v2792_v6, 1 }
0x2d94   :  { %v2794_v8 = vadd.f32 %v2793_v7, %v2792_v6 }
0x2d96   :  { %v2795_v9 = vmul.f32 0.0625, %v2794_v8 }
0x2d98   :  { %v2796_v17 = vsub.f32 %v2777_v56, %v2795_v9  ;;  %v2797_v33 = vsub.f32 %v2782_v57, %v2795_v9 }
0x2d9a   :  { %v2798_v11 = vmul.f32 %v2796_v17, %v2796_v17  ;;  %v2799_v55 = vmul.f32 %v2797_v33, %v2797_v33 }
0x2d9c   :  { %v2800_v27 = vsel %vm2785_vm13, %v2798_v11, 0.0  ;;  %v2801_v5 = vsel %vm2785_vm13, %v2799_v55, 0.0 }
0x2d9d   :  { %v2802_v2 = vadd.f32 %v2801_v5, %v2800_v27 }
0x2d9f   :  { %v2803_v14 = vrot.slane %v2802_v2, 4 }
0x2da1   :  { %v2804_v15 = vadd.f32 %v2803_v14, %v2802_v2 }
0x2da3   :  { %v2805_v16 = vrot.slane %v2804_v15, 2 }
0x2da5   :  { %v2806_v18 = vadd.f32 %v2805_v16, %v2804_v15 }
0x2da7   :  { %v2807_v30 = vrot.slane %v2806_v18, 1 }
0x2da9   :  { %v2808_v51 = vadd.f32 %v2807_v30, %v2806_v18 }
0x2dab   :  { %v2809_v46 = vmul.f32 0.0625, %v2808_v51 }
0x2dad   :  { %v2810_v20 = vadd.f32 1e-05, %v2809_v46 }
0x2daf   :  { %3779 = vrsqrt.f32 %v2810_v20 }
0x2db9   :  { %v3780_v26 = vpop.eup %3779 }
0x2dba   :  { %v2812_v19 = vmul.f32 %v3780_v26, %v2796_v17  ;;  %v2813_v29 = vmul.f32 %v3780_v26, %v2797_v33 }
0x2dbc   :  { %v2819_v32 = vmul.f32 %v2817_v24, %v2813_v29  ;;  %v2818_v34 = vmul.f32 %v2817_v24, %v2812_v19 }
0x2dbe   :  { %v2825_v36 = vadd.f32 %v2823_v31, %v2819_v32  ;;  %v2824_v61 = vadd.f32 %v2823_v31, %v2818_v34 }
0x2dc0   :  { %v2827_v13 = vmax.f32 %v2825_v36, 0.0  ;;  %v2826_v37 = vmax.f32 %v2824_v61, 0.0 }
0x2dc2   :  { %3404 = vmatprep.mubr.msk.f32.mxu1 %vm2785_vm13, %v2826_v37 }
0x2dc3   :  { %3405 = vmatmul.mubr.msk.f32.vlgmr.msra.gmra.mrb[30].mxu1 %vm2785_vm13, %v2827_v13 }
0x2e96   :  { %v3406_v40 = vpop.f32.mrb[30].mxu1 }
0x2e97   :  { %v2910_v4 = vadd.f32 %v3406_v40, %v2831_v39  ;;  %v2904_v60 = vpop.f32.mrb[31].mxu1 }
0x2e98   :  { %v2905_v41 = vadd.f32 %v2904_v60, %v2831_v39 }
0x2e99   :  { %2920 = vrot.lane.b32.xlu1 %v2910_v4, %s3786_s3 }
0x2e9a   :  { %2918 = vrot.lane.b32.xlu0 %v2905_v41, %s3786_s3 }
0x2f0b   :  { %v2921_v43 = vpop.permute.xlu1 %2920 }
0x2f0c   :  { %2926 = vst.msk [vmem:[%s4722_s4 + $0x8] sm:$0xff] %vm2924_vm14, %v2921_v43  ;;  %v2919_v44 = vpop.permute.xlu0 %2918 }
0x2f0d   :  { %2925 = vst.msk [vmem:[%s4722_s4] sm:$0xff] %vm2924_vm14, %v2919_v44 }

</bundles_post_ra>
